<compile_context>
chip_gen: v7x
topology: tpu7x:2x2x1
jax: 0.10.0
libtpu: 0.0.40
codegen_flags: <defaults>
</compile_context>

<pallas_src>
import functools

import jax
import jax.numpy as jnp
from jax.experimental import pallas as pl
from jax.experimental.pallas import tpu as pltpu

_EPS = 1e-5
_LANE = 128


# ----------------------------- small helpers --------------------------------

def _round_up(c, m=_LANE):
    return ((c + m - 1) // m) * m


def _pick_tile(m, cap=256):
    # Largest row tile that divides M; capped at 256 so double-buffered input
    # tiles + accumulator stay comfortably inside v7x's 64 MiB-physical VMEM
    # while still being in the >=85%-of-roofline regime from tiling sweeps.
    for t in (512, 256, 128, 64, 32, 16, 8):
        if t <= cap and m % t == 0:
            return t
    return m


def _cparams():
    return pltpu.CompilerParams(dimension_semantics=("parallel",))


def _pad_mat(a, rows, cols):
    return jnp.pad(a, ((0, rows - a.shape[0]), (0, cols - a.shape[1])))


def _pad_row(v, cols):
    v = v.reshape(1, -1)
    return jnp.pad(v, ((0, 0), (0, cols - v.shape[1])))


def _stats_rows(y):
    # (8, C) block: row0 = per-channel sum, row1 = per-channel sum of squares.
    s1 = jnp.sum(y, axis=0, keepdims=True)
    s2 = jnp.sum(y * y, axis=0, keepdims=True)
    zeros = jnp.zeros((6, y.shape[1]), jnp.float32)
    return jnp.concatenate([s1, s2, zeros], axis=0)


def _finalize_bn(partials, count, gamma_row, beta_row):
    # Tiny (8, C)-sized reduction in JAX: one-pass var = E[x^2] - mean^2.
    tot = jnp.sum(partials, axis=0)
    mean = tot[0:1] / count
    var = jnp.maximum(tot[1:2] / count - mean * mean, 0.0)
    scale = gamma_row * jax.lax.rsqrt(var + _EPS)   # zero on padded channels
    shift = beta_row - mean * scale
    return scale, shift


# ------------------------------- kernels -------------------------------------

def _mm_stats_kernel(x_ref, w_ref, o_ref, s_ref):
    # y = x @ w (bf16 MXU operands, f32 accumulate) + per-tile BN partial stats.
    y = jnp.dot(x_ref[...].astype(jnp.bfloat16), w_ref[...],
                preferred_element_type=jnp.float32)
    o_ref[...] = y
    s_ref[...] = _stats_rows(y)[None]


def _mm_prologue_stats_kernel(x_ref, sc_ref, sh_ref, w_ref, o_ref, s_ref):
    # Previous stage's BN + ReLU fused into this matmul's prologue (f32 math).
    h = jnp.maximum(x_ref[...] * sc_ref[...] + sh_ref[...], 0.0)
    y = jnp.dot(h.astype(jnp.bfloat16), w_ref[...],
                preferred_element_type=jnp.float32)
    o_ref[...] = y
    s_ref[...] = _stats_rows(y)[None]


def _bn_relu_kernel(x_ref, sc_ref, sh_ref, o_ref):
    o_ref[...] = jnp.maximum(x_ref[...] * sc_ref[...] + sh_ref[...], 0.0)


def _conv2_kernel(r0_ref, r1_ref, r2_ref, w_ref, o_ref, s_ref, *, stride, fp, Wo):
    # 3x3 conv for one output row (all batch images at once): 9 accumulated
    # matmuls over statically sliced taps of the three padded input rows.
    Nb = o_ref.shape[0]
    Np = o_ref.shape[3]
    acc = jnp.zeros((Nb * Wo, Np), jnp.float32)
    rows = (r0_ref, r1_ref, r2_ref)
    for kh in range(3):
        r = rows[kh][...]
        r = r.reshape(Nb, r.shape[2], r.shape[3])
        for kw in range(3):
            if stride == 1:
                patch = r[:, kw:kw + Wo, :]
            else:  # column-pairs layout: column 2*ow + kw -> (ow + kw//2, kw%2)
                q, p = kw // 2, kw % 2
                patch = r[:, q:q + Wo, p * fp:(p + 1) * fp]
            patch = patch.reshape(Nb * Wo, fp).astype(jnp.bfloat16)
            acc = acc + jnp.dot(patch, w_ref[kh * 3 + kw],
                                preferred_element_type=jnp.float32)
    o_ref[...] = acc.reshape(Nb, 1, Wo, Np)
    s_ref[...] = _stats_rows(acc)[None]


def _bn_add_relu_kernel(y_ref, res_ref, sc_ref, sh_ref, o_ref):
    o_ref[...] = jnp.maximum(
        y_ref[...] * sc_ref[...] + sh_ref[...] + res_ref[...], 0.0)


def _bn_proj_add_relu_kernel(y_ref, xs_ref, wp_ref, pb_ref, sc_ref, sh_ref, o_ref):
    # Downsample path: 1x1 projection matmul fused into the final epilogue.
    res = jnp.dot(xs_ref[...].astype(jnp.bfloat16), wp_ref[...],
                  preferred_element_type=jnp.float32) + pb_ref[...]
    o_ref[...] = jnp.maximum(y_ref[...] * sc_ref[...] + sh_ref[...] + res, 0.0)


# --------------------------- pallas_call wrappers -----------------------------

def _matmul_stats(x, w, scale=None, shift=None):
    M, K = x.shape
    Np = w.shape[1]
    TM = _pick_tile(M)
    T = M // TM
    in_specs = [pl.BlockSpec((TM, K), lambda i: (i, 0))]
    args = [x]
    if scale is not None:
        in_specs += [pl.BlockSpec((1, K), lambda i: (0, 0)),
                     pl.BlockSpec((1, K), lambda i: (0, 0))]
        args += [scale, shift]
        kernel = _mm_prologue_stats_kernel
    else:
        kernel = _mm_stats_kernel
    in_specs.append(pl.BlockSpec((K, Np), lambda i: (0, 0)))
    args.append(w)
    return pl.pallas_call(
        kernel,
        grid=(T,),
        in_specs=in_specs,
        out_specs=(pl.BlockSpec((TM, Np), lambda i: (i, 0)),
                   pl.BlockSpec((1, 8, Np), lambda i: (i, 0, 0))),
        out_shape=(jax.ShapeDtypeStruct((M, Np), jnp.float32),
                   jax.ShapeDtypeStruct((T, 8, Np), jnp.float32)),
        compiler_params=_cparams(),
    )(*args)


def _bn_relu(x, scale, shift):
    M, C = x.shape
    TM = _pick_tile(M)
    return pl.pallas_call(
        _bn_relu_kernel,
        grid=(M // TM,),
        in_specs=[pl.BlockSpec((TM, C), lambda i: (i, 0)),
                  pl.BlockSpec((1, C), lambda i: (0, 0)),
                  pl.BlockSpec((1, C), lambda i: (0, 0))],
        out_specs=pl.BlockSpec((TM, C), lambda i: (i, 0)),
        out_shape=jax.ShapeDtypeStruct((M, C), jnp.float32),
        compiler_params=_cparams(),
    )(x, scale, shift)


def _conv2_stats(h1p, w_taps, *, stride, N, W, Ho, Wo, fp, Np):
    if stride == 1:
        Wcols, Cin = W + 2, fp
    else:
        Wcols, Cin = (W + 2) // 2, 2 * fp
    row_specs = [
        pl.BlockSpec((N, 1, Wcols, Cin),
                     lambda oh, kk=k, s=stride: (0, s * oh + kk, 0, 0))
        for k in range(3)
    ]
    kernel = functools.partial(_conv2_kernel, stride=stride, fp=fp, Wo=Wo)
    return pl.pallas_call(
        kernel,
        grid=(Ho,),
        in_specs=row_specs + [pl.BlockSpec((9, fp, Np), lambda oh: (0, 0, 0))],
        out_specs=(pl.BlockSpec((N, 1, Wo, Np), lambda oh: (0, oh, 0, 0)),
                   pl.BlockSpec((1, 8, Np), lambda oh: (oh, 0, 0))),
        out_shape=(jax.ShapeDtypeStruct((N, Ho, Wo, Np), jnp.float32),
                   jax.ShapeDtypeStruct((Ho, 8, Np), jnp.float32)),
        compiler_params=_cparams(),
    )(h1p, h1p, h1p, w_taps)


def _bn_add_relu(y3, res, scale, shift):
    M, C = y3.shape
    TM = _pick_tile(M)
    return pl.pallas_call(
        _bn_add_relu_kernel,
        grid=(M // TM,),
        in_specs=[pl.BlockSpec((TM, C), lambda i: (i, 0)),
                  pl.BlockSpec((TM, C), lambda i: (i, 0)),
                  pl.BlockSpec((1, C), lambda i: (0, 0)),
                  pl.BlockSpec((1, C), lambda i: (0, 0))],
        out_specs=pl.BlockSpec((TM, C), lambda i: (i, 0)),
        out_shape=jax.ShapeDtypeStruct((M, C), jnp.float32),
        compiler_params=_cparams(),
    )(y3, res, scale, shift)


def _bn_proj_add_relu(y3, xs, wp, pb, scale, shift):
    M, C = y3.shape
    TM = _pick_tile(M)
    return pl.pallas_call(
        _bn_proj_add_relu_kernel,
        grid=(M // TM,),
        in_specs=[pl.BlockSpec((TM, C), lambda i: (i, 0)),
                  pl.BlockSpec((TM, C), lambda i: (i, 0)),
                  pl.BlockSpec((C, C), lambda i: (0, 0)),
                  pl.BlockSpec((1, C), lambda i: (0, 0)),
                  pl.BlockSpec((1, C), lambda i: (0, 0)),
                  pl.BlockSpec((1, C), lambda i: (0, 0))],
        out_specs=pl.BlockSpec((TM, C), lambda i: (i, 0)),
        out_shape=jax.ShapeDtypeStruct((M, C), jnp.float32),
        compiler_params=_cparams(),
    )(y3, xs, wp, pb, scale, shift)


# ------------------------------ module forward --------------------------------

@functools.partial(jax.jit, static_argnames=("downsample",))
def bottleneck_forward(x_nchw, params, downsample):
    f = params["conv1_w"].shape[0]
    C4 = 4 * f
    fp, C4p = _round_up(f), _round_up(C4)

    # TODO(synk): fold the NCHW<->NHWC layout changes into the first/last
    # kernel's index_map instead of leaving them to XLA as separate passes.
    x = jnp.transpose(x_nchw, (0, 2, 3, 1)).astype(jnp.float32)         # NHWC
    N, H, W, _ = x.shape
    xpad = jnp.pad(x, ((0, 0), (0, 0), (0, 0), (0, C4p - C4)))          # lane-dense channels
    M = N * H * W

    # Weights: (in, out) layout, zero-padded to lane multiples, bf16 for MXU.
    # conv1/conv2/conv3 biases are dropped (cancelled exactly by training BN).
    w1 = _pad_mat(params["conv1_w"].reshape(f, C4).T, C4p, fp).astype(jnp.bfloat16)
    w3 = _pad_mat(params["conv3_w"].reshape(C4, f).T, fp, C4p).astype(jnp.bfloat16)
    w2 = params["conv2_w"]                                              # (f, f, 3, 3) OIHW
    w2_taps = jnp.stack(
        [_pad_mat(w2[:, :, kh, kw].T, fp, fp) for kh in range(3) for kw in range(3)],
        axis=0).astype(jnp.bfloat16)                                    # (9, fp, fp)
    g1, b1 = _pad_row(params["bn1_g"], fp), _pad_row(params["bn1_b"], fp)
    g2, b2 = _pad_row(params["bn2_g"], fp), _pad_row(params["bn2_b"], fp)
    g3, b3 = _pad_row(params["bn3_g"], C4p), _pad_row(params["bn3_b"], C4p)

    # ---- stage 1: conv1 (1x1) fused with BN1 batch-stat accumulation --------
    y1, p1 = _matmul_stats(xpad.reshape(M, C4p), w1)
    sc1, sh1 = _finalize_bn(p1, M, g1, b1)
    h1 = _bn_relu(y1, sc1, sh1).reshape(N, H, W, fp)

    # ---- stage 2: conv2 (3x3, stride s) from halo rows, fused BN2 stats -----
    s = 2 if downsample else 1
    Ho, Wo = H // s, W // s
    h1p = jnp.pad(h1, ((0, 0), (1, 1), (1, 1), (0, 0)))                 # spatial halo
    if s == 2:                                                          # free column-pairs reshape
        h1p = h1p.reshape(N, H + 2, (W + 2) // 2, 2 * fp)
    y2, p2 = _conv2_stats(h1p, w2_taps, stride=s, N=N, W=W, Ho=Ho, Wo=Wo, fp=fp, Np=fp)
    M2 = N * Ho * Wo
    sc2, sh2 = _finalize_bn(p2, M2, g2, b2)

    # ---- stage 3: conv3 (1x1), BN2 + ReLU fused into its prologue -----------
    y3, p3 = _matmul_stats(y2.reshape(M2, fp), w3, scale=sc2, shift=sh2)
    sc3, sh3 = _finalize_bn(p3, M2, g3, b3)

    # ---- BN3 + residual (+ fused 1x1 projection) + ReLU ---------------------
    if downsample:
        xs = xpad[:, ::2, ::2, :].reshape(M2, C4p)
        wp = _pad_mat(params["proj_w"].reshape(C4, C4).T, C4p, C4p).astype(jnp.bfloat16)
        pb = _pad_row(params["proj_b"], C4p)
        out = _bn_proj_add_relu(y3, xs, wp, pb, sc3, sh3)
    else:
        out = _bn_add_relu(y3, xpad.reshape(M, C4p), sc3, sh3)

    out = out[:, :C4].reshape(N, Ho, Wo, C4)
    return jnp.transpose(out, (0, 3, 1, 2))                             # back to NCHW


# ------------------------------ pure-JAX reference ----------------------------

def reference_forward(x, params, downsample):
    def conv(inp, w, b, stride, pad):
        y = jax.lax.conv_general_dilated(
            inp, w, (stride, stride), [(pad, pad), (pad, pad)],
            dimension_numbers=("NCHW", "OIHW", "NCHW"),
            precision=jax.lax.Precision.HIGHEST,
        )
        return y + b.reshape(1, -1, 1, 1)

    def bn(inp, g, be):
        m = inp.mean(axis=(0, 2, 3), keepdims=True)
        v = inp.var(axis=(0, 2, 3), keepdims=True)
        return (inp - m) / jnp.sqrt(v + _EPS) * g.reshape(1, -1, 1, 1) + be.reshape(1, -1, 1, 1)

    out = jax.nn.relu(bn(conv(x, params["conv1_w"], params["conv1_b"], 1, 0),
                         params["bn1_g"], params["bn1_b"]))
    s = 2 if downsample else 1
    out = jax.nn.relu(bn(conv(out, params["conv2_w"], params["conv2_b"], s, 1),
                         params["bn2_g"], params["bn2_b"]))
    out = bn(conv(out, params["conv3_w"], params["conv3_b"], 1, 0),
             params["bn3_g"], params["bn3_b"])
    res = conv(x, params["proj_w"], params["proj_b"], 2, 0) if downsample else x
    return jax.nn.relu(out + res)


# ------------------------------------ main -------------------------------------

def make_params(key, filters):
    f, c4 = filters, 4 * filters
    ks = jax.random.split(key, 10)
    n = lambda k, shp, s=0.1: s * jax.random.normal(k, shp, jnp.float32)
    return {
        "conv1_w": n(ks[0], (f, c4, 1, 1)),  "conv1_b": n(ks[1], (f,)),
        "conv2_w": n(ks[2], (f, f, 3, 3)),   "conv2_b": n(ks[3], (f,)),
        "conv3_w": n(ks[4], (c4, f, 1, 1)),  "conv3_b": n(ks[5], (c4,)),
        "proj_w":  n(ks[6], (c4, c4, 1, 1)), "proj_b":  n(ks[7], (c4,)),
        "bn1_g": jnp.ones((f,), jnp.float32) + n(ks[8], (f,)),
        "bn1_b": n(ks[9], (f,)),
        "bn2_g": jnp.ones((f,), jnp.float32),
        "bn2_b": jnp.zeros((f,), jnp.float32),
        "bn3_g": jnp.ones((c4,), jnp.float32),
        "bn3_b": jnp.zeros((c4,), jnp.float32),
    }


if __name__ == "__main__":
    key = jax.random.PRNGKey(0)
    filters = 32                      # -> in/out channels = 128 (lane-dense)
    batch, spatial = 2, 16
    kx, kp = jax.random.split(key)
    x = jax.random.normal(kx, (batch, 4 * filters, spatial, spatial), jnp.float32)
    params = make_params(kp, filters)

    for downsample in (False, True):
        out = jax.block_until_ready(bottleneck_forward(x, params, downsample))
        ref = reference_forward(x, params, downsample)
        assert out.shape == ref.shape, (out.shape, ref.shape)
        # bf16 MXU operands (per perf guidance) vs an all-f32 HIGHEST-precision
        # reference through 3 BN-normalized stages -> slightly wider tolerance.
        assert jnp.allclose(out, ref, rtol=3e-2, atol=3e-2), (
            float(jnp.max(jnp.abs(out - ref))))

    print("KERNEL_OK")
</pallas_src>

<mosaic_0001>
module attributes {stable_mosaic.version = 11 : i64} {
  func.func @_mm_stats_kernel(%arg0: i32, %arg1: memref<256x128xf32, #tpu.memory_space<vmem>>, %arg2: memref<128x128xbf16, #tpu.memory_space<vmem>>, %arg3: memref<256x128xf32, #tpu.memory_space<vmem>>, %arg4: memref<1x8x128xf32, #tpu.memory_space<vmem>>) attributes {dimension_semantics = [#tpu.dimension_semantics<parallel>], iteration_bounds = array<i64: 2>, scalar_prefetch = 0 : i64, scratch_operands = 0 : i64, tpu.core_type = #tpu.core_type<tc>, window_params = [{transform_indices = @transform_0, window_bounds = array<i64: 256, 128>}, {pipeline_mode = #tpu.pipeline_mode<synchronous>, transform_indices = @transform_1, window_bounds = array<i64: 128, 128>}, {transform_indices = @transform_2, window_bounds = array<i64: 256, 128>}, {transform_indices = @transform_3, window_bounds = array<i64: 1, 8, 128>}]} {
    %c0 = arith.constant 0 : index
    %c0_0 = arith.constant 0 : index
    %0 = vector.load %arg1[%c0, %c0_0] : memref<256x128xf32, #tpu.memory_space<vmem>>, vector<256x128xf32>
    %1 = arith.truncf %0 : vector<256x128xf32> to vector<256x128xbf16>
    %c0_1 = arith.constant 0 : index
    %c0_2 = arith.constant 0 : index
    %2 = vector.load %arg2[%c0_1, %c0_2] : memref<128x128xbf16, #tpu.memory_space<vmem>>, vector<128x128xbf16>
    %cst = arith.constant dense<0.000000e+00> : vector<256x128xf32>
    %3 = tpu.matmul %1, %2, %cst {dimension_numbers = #tpu.dot_dimension_numbers<[1], [0], [0], [1], [0, 0, 1, 1], [], []>} : vector<256x128xbf16>, vector<128x128xbf16>, vector<256x128xf32> -> vector<256x128xf32>
    %c0_3 = arith.constant 0 : index
    %c0_4 = arith.constant 0 : index
    %4 = vector.load %arg3[%c0_3, %c0_4] : memref<256x128xf32, #tpu.memory_space<vmem>>, vector<256x128xf32>
    tpu.vector_store %arg3[%c0_3, %c0_4], %3 {strides = array<i32>} : memref<256x128xf32, #tpu.memory_space<vmem>>, vector<256x128xf32>,
    %cst_5 = arith.constant dense<0.000000e+00> : vector<128xf32>
    %5 = vector.multi_reduction <add>, %3, %cst_5 [0] : vector<256x128xf32> to vector<128xf32>
    %6 = vector.shape_cast %5 : vector<128xf32> to vector<1x128xf32>
    %7 = arith.mulf %3, %3 : vector<256x128xf32>
    %cst_6 = arith.constant dense<0.000000e+00> : vector<128xf32>
    %8 = vector.multi_reduction <add>, %7, %cst_6 [0] : vector<256x128xf32> to vector<128xf32>
    %9 = vector.shape_cast %8 : vector<128xf32> to vector<1x128xf32>
    %cst_7 = arith.constant 0.000000e+00 : f32
    %10 = vector.broadcast %cst_7 : f32 to vector<6x128xf32>
    %11 = tpu.concatenate %6, %9, %10 in 0 : vector<1x128xf32>, vector<1x128xf32>, vector<6x128xf32> -> vector<8x128xf32>
    %12 = vector.shape_cast %11 : vector<8x128xf32> to vector<1x8x128xf32>
    %c0_8 = arith.constant 0 : index
    %c0_9 = arith.constant 0 : index
    %c0_10 = arith.constant 0 : index
    %13 = vector.load %arg4[%c0_8, %c0_9, %c0_10] : memref<1x8x128xf32, #tpu.memory_space<vmem>>, vector<1x8x128xf32>
    tpu.vector_store %arg4[%c0_8, %c0_9, %c0_10], %12 {strides = array<i32>} : memref<1x8x128xf32, #tpu.memory_space<vmem>>, vector<1x8x128xf32>,
    return
  }
  func.func @transform_0(%arg0: i32) -> (i32, i32) {
    %c0_i32 = arith.constant 0 : i32
    %c0_i32_0 = arith.constant 0 : i32
    return %arg0, %c0_i32 : i32, i32
  }
  func.func @transform_1(%arg0: i32) -> (i32, i32) {
    %c0_i32 = arith.constant 0 : i32
    %c0_i32_0 = arith.constant 0 : i32
    %c0_i32_1 = arith.constant 0 : i32
    return %c0_i32, %c0_i32_0 : i32, i32
  }
  func.func @transform_2(%arg0: i32) -> (i32, i32) {
    %c0_i32 = arith.constant 0 : i32
    %c0_i32_0 = arith.constant 0 : i32
    return %arg0, %c0_i32 : i32, i32
  }
  func.func @transform_3(%arg0: i32) -> (i32, i32, i32) {
    %c0_i32 = arith.constant 0 : i32
    %c0_i32_0 = arith.constant 0 : i32
    %c0_i32_1 = arith.constant 0 : i32
    return %arg0, %c0_i32, %c0_i32_0 : i32, i32, i32
  }
}

module attributes {stable_mosaic.version = 11 : i64} {
  func.func @_bn_relu_kernel(%arg0: i32, %arg1: memref<256x128xf32, #tpu.memory_space<vmem>>, %arg2: memref<1x128xf32, #tpu.memory_space<vmem>>, %arg3: memref<1x128xf32, #tpu.memory_space<vmem>>, %arg4: memref<256x128xf32, #tpu.memory_space<vmem>>) attributes {dimension_semantics = [#tpu.dimension_semantics<parallel>], iteration_bounds = array<i64: 2>, scalar_prefetch = 0 : i64, scratch_operands = 0 : i64, tpu.core_type = #tpu.core_type<tc>, window_params = [{transform_indices = @transform_0, window_bounds = array<i64: 256, 128>}, {pipeline_mode = #tpu.pipeline_mode<synchronous>, transform_indices = @transform_1, window_bounds = array<i64: 1, 128>}, {pipeline_mode = #tpu.pipeline_mode<synchronous>, transform_indices = @transform_2, window_bounds = array<i64: 1, 128>}, {transform_indices = @transform_3, window_bounds = array<i64: 256, 128>}]} {
    %c0 = arith.constant 0 : index
    %c0_0 = arith.constant 0 : index
    %0 = vector.load %arg1[%c0, %c0_0] : memref<256x128xf32, #tpu.memory_space<vmem>>, vector<256x128xf32>
    %c0_1 = arith.constant 0 : index
    %c0_2 = arith.constant 0 : index
    %1 = vector.load %arg2[%c0_1, %c0_2] : memref<1x128xf32, #tpu.memory_space<vmem>>, vector<1x128xf32>
    %2 = vector.broadcast %1 : vector<1x128xf32> to vector<256x128xf32>
    %3 = arith.mulf %0, %2 : vector<256x128xf32>
    %c0_3 = arith.constant 0 : index
    %c0_4 = arith.constant 0 : index
    %4 = vector.load %arg3[%c0_3, %c0_4] : memref<1x128xf32, #tpu.memory_space<vmem>>, vector<1x128xf32>
    %5 = vector.broadcast %4 : vector<1x128xf32> to vector<256x128xf32>
    %6 = arith.addf %3, %5 : vector<256x128xf32>
    %cst = arith.constant 0.000000e+00 : f32
    %7 = vector.broadcast %cst : f32 to vector<256x128xf32>
    %8 = arith.maximumf %6, %7 : vector<256x128xf32>
    %c0_5 = arith.constant 0 : index
    %c0_6 = arith.constant 0 : index
    %9 = vector.load %arg4[%c0_5, %c0_6] : memref<256x128xf32, #tpu.memory_space<vmem>>, vector<256x128xf32>
    tpu.vector_store %arg4[%c0_5, %c0_6], %8 {strides = array<i32>} : memref<256x128xf32, #tpu.memory_space<vmem>>, vector<256x128xf32>,
    return
  }
  func.func @transform_0(%arg0: i32) -> (i32, i32) {
    %c0_i32 = arith.constant 0 : i32
    %c0_i32_0 = arith.constant 0 : i32
    return %arg0, %c0_i32 : i32, i32
  }
  func.func @transform_1(%arg0: i32) -> (i32, i32) {
    %c0_i32 = arith.constant 0 : i32
    %c0_i32_0 = arith.constant 0 : i32
    %c0_i32_1 = arith.constant 0 : i32
    return %c0_i32, %c0_i32_0 : i32, i32
  }
  func.func @transform_2(%arg0: i32) -> (i32, i32) {
    %c0_i32 = arith.constant 0 : i32
    %c0_i32_0 = arith.constant 0 : i32
    %c0_i32_1 = arith.constant 0 : i32
    return %c0_i32, %c0_i32_0 : i32, i32
  }
  func.func @transform_3(%arg0: i32) -> (i32, i32) {
    %c0_i32 = arith.constant 0 : i32
    %c0_i32_0 = arith.constant 0 : i32
    return %arg0, %c0_i32 : i32, i32
  }
}

module attributes {stable_mosaic.version = 11 : i64} {
  func.func @_conv2_kernel(%arg0: i32, %arg1: memref<2x1x18x128xf32, #tpu.memory_space<vmem>>, %arg2: memref<2x1x18x128xf32, #tpu.memory_space<vmem>>, %arg3: memref<2x1x18x128xf32, #tpu.memory_space<vmem>>, %arg4: memref<9x128x128xbf16, #tpu.memory_space<vmem>>, %arg5: memref<2x1x16x128xf32, #tpu.memory_space<vmem>>, %arg6: memref<1x8x128xf32, #tpu.memory_space<vmem>>) attributes {dimension_semantics = [#tpu.dimension_semantics<parallel>], iteration_bounds = array<i64: 16>, scalar_prefetch = 0 : i64, scratch_operands = 0 : i64, tpu.core_type = #tpu.core_type<tc>, window_params = [{transform_indices = @transform_0, window_bounds = array<i64: 2, 1, 18, 128>}, {transform_indices = @transform_1, window_bounds = array<i64: 2, 1, 18, 128>}, {transform_indices = @transform_2, window_bounds = array<i64: 2, 1, 18, 128>}, {pipeline_mode = #tpu.pipeline_mode<synchronous>, transform_indices = @transform_3, window_bounds = array<i64: 9, 128, 128>}, {transform_indices = @transform_4, window_bounds = array<i64: 2, 1, 16, 128>}, {transform_indices = @transform_5, window_bounds = array<i64: 1, 8, 128>}]} {
    %cst = arith.constant 0.000000e+00 : f32
    %0 = vector.broadcast %cst : f32 to vector<32x128xf32>
    %c0 = arith.constant 0 : index
    %c0_0 = arith.constant 0 : index
    %c0_1 = arith.constant 0 : index
    %c0_2 = arith.constant 0 : index
    %1 = vector.load %arg1[%c0, %c0_0, %c0_1, %c0_2] : memref<2x1x18x128xf32, #tpu.memory_space<vmem>>, vector<2x1x18x128xf32>
    %2 = vector.shape_cast %1 : vector<2x1x18x128xf32> to vector<2x18x128xf32>
    %3 = vector.extract_strided_slice %2 {offsets = [0, 0, 0], sizes = [2, 16, 128], strides = [1, 1, 1]} : vector<2x18x128xf32> to vector<2x16x128xf32>
    %4 = vector.shape_cast %3 : vector<2x16x128xf32> to vector<32x128xf32>
    %5 = arith.truncf %4 : vector<32x128xf32> to vector<32x128xbf16>
    %c0_3 = arith.constant 0 : index
    %c0_4 = arith.constant 0 : index
    %c0_5 = arith.constant 0 : index
    %6 = vector.load %arg4[%c0_3, %c0_4, %c0_5] : memref<9x128x128xbf16, #tpu.memory_space<vmem>>, vector<1x128x128xbf16>
    %7 = vector.shape_cast %6 : vector<1x128x128xbf16> to vector<128x128xbf16>
    %cst_6 = arith.constant dense<0.000000e+00> : vector<32x128xf32>
    %8 = tpu.matmul %5, %7, %cst_6 {dimension_numbers = #tpu.dot_dimension_numbers<[1], [0], [0], [1], [0, 0, 1, 1], [], []>} : vector<32x128xbf16>, vector<128x128xbf16>, vector<32x128xf32> -> vector<32x128xf32>
    %9 = arith.addf %0, %8 : vector<32x128xf32>
    %10 = vector.extract_strided_slice %2 {offsets = [0, 1, 0], sizes = [2, 16, 128], strides = [1, 1, 1]} : vector<2x18x128xf32> to vector<2x16x128xf32>
    %11 = vector.shape_cast %10 : vector<2x16x128xf32> to vector<32x128xf32>
    %12 = arith.truncf %11 : vector<32x128xf32> to vector<32x128xbf16>
    %c1 = arith.constant 1 : index
    %c0_7 = arith.constant 0 : index
    %c0_8 = arith.constant 0 : index
    %13 = vector.load %arg4[%c1, %c0_7, %c0_8] : memref<9x128x128xbf16, #tpu.memory_space<vmem>>, vector<1x128x128xbf16>
    %14 = vector.shape_cast %13 : vector<1x128x128xbf16> to vector<128x128xbf16>
    %cst_9 = arith.constant dense<0.000000e+00> : vector<32x128xf32>
    %15 = tpu.matmul %12, %14, %cst_9 {dimension_numbers = #tpu.dot_dimension_numbers<[1], [0], [0], [1], [0, 0, 1, 1], [], []>} : vector<32x128xbf16>, vector<128x128xbf16>, vector<32x128xf32> -> vector<32x128xf32>
    %16 = arith.addf %9, %15 : vector<32x128xf32>
    %17 = vector.extract_strided_slice %2 {offsets = [0, 2, 0], sizes = [2, 16, 128], strides = [1, 1, 1]} : vector<2x18x128xf32> to vector<2x16x128xf32>
    %18 = vector.shape_cast %17 : vector<2x16x128xf32> to vector<32x128xf32>
    %19 = arith.truncf %18 : vector<32x128xf32> to vector<32x128xbf16>
    %c2 = arith.constant 2 : index
    %c0_10 = arith.constant 0 : index
    %c0_11 = arith.constant 0 : index
    %20 = vector.load %arg4[%c2, %c0_10, %c0_11] : memref<9x128x128xbf16, #tpu.memory_space<vmem>>, vector<1x128x128xbf16>
    %21 = vector.shape_cast %20 : vector<1x128x128xbf16> to vector<128x128xbf16>
    %cst_12 = arith.constant dense<0.000000e+00> : vector<32x128xf32>
    %22 = tpu.matmul %19, %21, %cst_12 {dimension_numbers = #tpu.dot_dimension_numbers<[1], [0], [0], [1], [0, 0, 1, 1], [], []>} : vector<32x128xbf16>, vector<128x128xbf16>, vector<32x128xf32> -> vector<32x128xf32>
    %23 = arith.addf %16, %22 : vector<32x128xf32>
    %c0_13 = arith.constant 0 : index
    %c0_14 = arith.constant 0 : index
    %c0_15 = arith.constant 0 : index
    %c0_16 = arith.constant 0 : index
    %24 = vector.load %arg2[%c0_13, %c0_14, %c0_15, %c0_16] : memref<2x1x18x128xf32, #tpu.memory_space<vmem>>, vector<2x1x18x128xf32>
    %25 = vector.shape_cast %24 : vector<2x1x18x128xf32> to vector<2x18x128xf32>
    %26 = vector.extract_strided_slice %25 {offsets = [0, 0, 0], sizes = [2, 16, 128], strides = [1, 1, 1]} : vector<2x18x128xf32> to vector<2x16x128xf32>
    %27 = vector.shape_cast %26 : vector<2x16x128xf32> to vector<32x128xf32>
    %28 = arith.truncf %27 : vector<32x128xf32> to vector<32x128xbf16>
    %c3 = arith.constant 3 : index
    %c0_17 = arith.constant 0 : index
    %c0_18 = arith.constant 0 : index
    %29 = vector.load %arg4[%c3, %c0_17, %c0_18] : memref<9x128x128xbf16, #tpu.memory_space<vmem>>, vector<1x128x128xbf16>
    %30 = vector.shape_cast %29 : vector<1x128x128xbf16> to vector<128x128xbf16>
    %cst_19 = arith.constant dense<0.000000e+00> : vector<32x128xf32>
    %31 = tpu.matmul %28, %30, %cst_19 {dimension_numbers = #tpu.dot_dimension_numbers<[1], [0], [0], [1], [0, 0, 1, 1], [], []>} : vector<32x128xbf16>, vector<128x128xbf16>, vector<32x128xf32> -> vector<32x128xf32>
    %32 = arith.addf %23, %31 : vector<32x128xf32>
    %33 = vector.extract_strided_slice %25 {offsets = [0, 1, 0], sizes = [2, 16, 128], strides = [1, 1, 1]} : vector<2x18x128xf32> to vector<2x16x128xf32>
    %34 = vector.shape_cast %33 : vector<2x16x128xf32> to vector<32x128xf32>
    %35 = arith.truncf %34 : vector<32x128xf32> to vector<32x128xbf16>
    %c4 = arith.constant 4 : index
    %c0_20 = arith.constant 0 : index
    %c0_21 = arith.constant 0 : index
    %36 = vector.load %arg4[%c4, %c0_20, %c0_21] : memref<9x128x128xbf16, #tpu.memory_space<vmem>>, vector<1x128x128xbf16>
    %37 = vector.shape_cast %36 : vector<1x128x128xbf16> to vector<128x128xbf16>
    %cst_22 = arith.constant dense<0.000000e+00> : vector<32x128xf32>
    %38 = tpu.matmul %35, %37, %cst_22 {dimension_numbers = #tpu.dot_dimension_numbers<[1], [0], [0], [1], [0, 0, 1, 1], [], []>} : vector<32x128xbf16>, vector<128x128xbf16>, vector<32x128xf32> -> vector<32x128xf32>
    %39 = arith.addf %32, %38 : vector<32x128xf32>
    %40 = vector.extract_strided_slice %25 {offsets = [0, 2, 0], sizes = [2, 16, 128], strides = [1, 1, 1]} : vector<2x18x128xf32> to vector<2x16x128xf32>
    %41 = vector.shape_cast %40 : vector<2x16x128xf32> to vector<32x128xf32>
    %42 = arith.truncf %41 : vector<32x128xf32> to vector<32x128xbf16>
    %c5 = arith.constant 5 : index
    %c0_23 = arith.constant 0 : index
    %c0_24 = arith.constant 0 : index
    %43 = vector.load %arg4[%c5, %c0_23, %c0_24] : memref<9x128x128xbf16, #tpu.memory_space<vmem>>, vector<1x128x128xbf16>
    %44 = vector.shape_cast %43 : vector<1x128x128xbf16> to vector<128x128xbf16>
    %cst_25 = arith.constant dense<0.000000e+00> : vector<32x128xf32>
    %45 = tpu.matmul %42, %44, %cst_25 {dimension_numbers = #tpu.dot_dimension_numbers<[1], [0], [0], [1], [0, 0, 1, 1], [], []>} : vector<32x128xbf16>, vector<128x128xbf16>, vector<32x128xf32> -> vector<32x128xf32>
    %46 = arith.addf %39, %45 : vector<32x128xf32>
    %c0_26 = arith.constant 0 : index
    %c0_27 = arith.constant 0 : index
    %c0_28 = arith.constant 0 : index
    %c0_29 = arith.constant 0 : index
    %47 = vector.load %arg3[%c0_26, %c0_27, %c0_28, %c0_29] : memref<2x1x18x128xf32, #tpu.memory_space<vmem>>, vector<2x1x18x128xf32>
    %48 = vector.shape_cast %47 : vector<2x1x18x128xf32> to vector<2x18x128xf32>
    %49 = vector.extract_strided_slice %48 {offsets = [0, 0, 0], sizes = [2, 16, 128], strides = [1, 1, 1]} : vector<2x18x128xf32> to vector<2x16x128xf32>
    %50 = vector.shape_cast %49 : vector<2x16x128xf32> to vector<32x128xf32>
    %51 = arith.truncf %50 : vector<32x128xf32> to vector<32x128xbf16>
    %c6 = arith.constant 6 : index
    %c0_30 = arith.constant 0 : index
    %c0_31 = arith.constant 0 : index
    %52 = vector.load %arg4[%c6, %c0_30, %c0_31] : memref<9x128x128xbf16, #tpu.memory_space<vmem>>, vector<1x128x128xbf16>
    %53 = vector.shape_cast %52 : vector<1x128x128xbf16> to vector<128x128xbf16>
    %cst_32 = arith.constant dense<0.000000e+00> : vector<32x128xf32>
    %54 = tpu.matmul %51, %53, %cst_32 {dimension_numbers = #tpu.dot_dimension_numbers<[1], [0], [0], [1], [0, 0, 1, 1], [], []>} : vector<32x128xbf16>, vector<128x128xbf16>, vector<32x128xf32> -> vector<32x128xf32>
    %55 = arith.addf %46, %54 : vector<32x128xf32>
    %56 = vector.extract_strided_slice %48 {offsets = [0, 1, 0], sizes = [2, 16, 128], strides = [1, 1, 1]} : vector<2x18x128xf32> to vector<2x16x128xf32>
    %57 = vector.shape_cast %56 : vector<2x16x128xf32> to vector<32x128xf32>
    %58 = arith.truncf %57 : vector<32x128xf32> to vector<32x128xbf16>
    %c7 = arith.constant 7 : index
    %c0_33 = arith.constant 0 : index
    %c0_34 = arith.constant 0 : index
    %59 = vector.load %arg4[%c7, %c0_33, %c0_34] : memref<9x128x128xbf16, #tpu.memory_space<vmem>>, vector<1x128x128xbf16>
    %60 = vector.shape_cast %59 : vector<1x128x128xbf16> to vector<128x128xbf16>
    %cst_35 = arith.constant dense<0.000000e+00> : vector<32x128xf32>
    %61 = tpu.matmul %58, %60, %cst_35 {dimension_numbers = #tpu.dot_dimension_numbers<[1], [0], [0], [1], [0, 0, 1, 1], [], []>} : vector<32x128xbf16>, vector<128x128xbf16>, vector<32x128xf32> -> vector<32x128xf32>
    %62 = arith.addf %55, %61 : vector<32x128xf32>
    %63 = vector.extract_strided_slice %48 {offsets = [0, 2, 0], sizes = [2, 16, 128], strides = [1, 1, 1]} : vector<2x18x128xf32> to vector<2x16x128xf32>
    %64 = vector.shape_cast %63 : vector<2x16x128xf32> to vector<32x128xf32>
    %65 = arith.truncf %64 : vector<32x128xf32> to vector<32x128xbf16>
    %c8 = arith.constant 8 : index
    %c0_36 = arith.constant 0 : index
    %c0_37 = arith.constant 0 : index
    %66 = vector.load %arg4[%c8, %c0_36, %c0_37] : memref<9x128x128xbf16, #tpu.memory_space<vmem>>, vector<1x128x128xbf16>
    %67 = vector.shape_cast %66 : vector<1x128x128xbf16> to vector<128x128xbf16>
    %cst_38 = arith.constant dense<0.000000e+00> : vector<32x128xf32>
    %68 = tpu.matmul %65, %67, %cst_38 {dimension_numbers = #tpu.dot_dimension_numbers<[1], [0], [0], [1], [0, 0, 1, 1], [], []>} : vector<32x128xbf16>, vector<128x128xbf16>, vector<32x128xf32> -> vector<32x128xf32>
    %69 = arith.addf %62, %68 : vector<32x128xf32>
    %70 = vector.shape_cast %69 : vector<32x128xf32> to vector<2x1x16x128xf32>
    %c0_39 = arith.constant 0 : index
    %c0_40 = arith.constant 0 : index
    %c0_41 = arith.constant 0 : index
    %c0_42 = arith.constant 0 : index
    %71 = vector.load %arg5[%c0_39, %c0_40, %c0_41, %c0_42] : memref<2x1x16x128xf32, #tpu.memory_space<vmem>>, vector<2x1x16x128xf32>
    tpu.vector_store %arg5[%c0_39, %c0_40, %c0_41, %c0_42], %70 {strides = array<i32>} : memref<2x1x16x128xf32, #tpu.memory_space<vmem>>, vector<2x1x16x128xf32>,
    %cst_43 = arith.constant dense<0.000000e+00> : vector<128xf32>
    %72 = vector.multi_reduction <add>, %69, %cst_43 [0] : vector<32x128xf32> to vector<128xf32>
    %73 = vector.shape_cast %72 : vector<128xf32> to vector<1x128xf32>
    %74 = arith.mulf %69, %69 : vector<32x128xf32>
    %cst_44 = arith.constant dense<0.000000e+00> : vector<128xf32>
    %75 = vector.multi_reduction <add>, %74, %cst_44 [0] : vector<32x128xf32> to vector<128xf32>
    %76 = vector.shape_cast %75 : vector<128xf32> to vector<1x128xf32>
    %cst_45 = arith.constant 0.000000e+00 : f32
    %77 = vector.broadcast %cst_45 : f32 to vector<6x128xf32>
    %78 = tpu.concatenate %73, %76, %77 in 0 : vector<1x128xf32>, vector<1x128xf32>, vector<6x128xf32> -> vector<8x128xf32>
    %79 = vector.shape_cast %78 : vector<8x128xf32> to vector<1x8x128xf32>
    %c0_46 = arith.constant 0 : index
    %c0_47 = arith.constant 0 : index
    %c0_48 = arith.constant 0 : index
    %80 = vector.load %arg6[%c0_46, %c0_47, %c0_48] : memref<1x8x128xf32, #tpu.memory_space<vmem>>, vector<1x8x128xf32>
    tpu.vector_store %arg6[%c0_46, %c0_47, %c0_48], %79 {strides = array<i32>} : memref<1x8x128xf32, #tpu.memory_space<vmem>>, vector<1x8x128xf32>,
    return
  }
  func.func @transform_0(%arg0: i32) -> (i32, i32, i32, i32) {
    %c1_i32 = arith.constant 1 : i32
    %0 = arith.muli %c1_i32, %arg0 : i32
    %c0_i32 = arith.constant 0 : i32
    %1 = arith.addi %0, %c0_i32 : i32
    %c0_i32_0 = arith.constant 0 : i32
    %c0_i32_1 = arith.constant 0 : i32
    %c0_i32_2 = arith.constant 0 : i32
    %c0_i32_3 = arith.constant 0 : i32
    return %c0_i32_0, %1, %c0_i32_1, %c0_i32_2 : i32, i32, i32, i32
  }
  func.func @transform_1(%arg0: i32) -> (i32, i32, i32, i32) {
    %c1_i32 = arith.constant 1 : i32
    %0 = arith.muli %c1_i32, %arg0 : i32
    %c1_i32_0 = arith.constant 1 : i32
    %1 = arith.addi %0, %c1_i32_0 : i32
    %c0_i32 = arith.constant 0 : i32
    %c0_i32_1 = arith.constant 0 : i32
    %c0_i32_2 = arith.constant 0 : i32
    %c0_i32_3 = arith.constant 0 : i32
    return %c0_i32, %1, %c0_i32_1, %c0_i32_2 : i32, i32, i32, i32
  }
  func.func @transform_2(%arg0: i32) -> (i32, i32, i32, i32) {
    %c1_i32 = arith.constant 1 : i32
    %0 = arith.muli %c1_i32, %arg0 : i32
    %c2_i32 = arith.constant 2 : i32
    %1 = arith.addi %0, %c2_i32 : i32
    %c0_i32 = arith.constant 0 : i32
    %c0_i32_0 = arith.constant 0 : i32
    %c0_i32_1 = arith.constant 0 : i32
    %c0_i32_2 = arith.constant 0 : i32
    return %c0_i32, %1, %c0_i32_0, %c0_i32_1 : i32, i32, i32, i32
  }
  func.func @transform_3(%arg0: i32) -> (i32, i32, i32) {
    %c0_i32 = arith.constant 0 : i32
    %c0_i32_0 = arith.constant 0 : i32
    %c0_i32_1 = arith.constant 0 : i32
    %c0_i32_2 = arith.constant 0 : i32
    return %c0_i32, %c0_i32_0, %c0_i32_1 : i32, i32, i32
  }
  func.func @transform_4(%arg0: i32) -> (i32, i32, i32, i32) {
    %c0_i32 = arith.constant 0 : i32
    %c0_i32_0 = arith.constant 0 : i32
    %c0_i32_1 = arith.constant 0 : i32
    %c0_i32_2 = arith.constant 0 : i32
    return %c0_i32, %arg0, %c0_i32_0, %c0_i32_1 : i32, i32, i32, i32
  }
  func.func @transform_5(%arg0: i32) -> (i32, i32, i32) {
    %c0_i32 = arith.constant 0 : i32
    %c0_i32_0 = arith.constant 0 : i32
    %c0_i32_1 = arith.constant 0 : i32
    return %arg0, %c0_i32, %c0_i32_0 : i32, i32, i32
  }
}

module attributes {stable_mosaic.version = 11 : i64} {
  func.func @_mm_prologue_stats_kernel(%arg0: i32, %arg1: memref<256x128xf32, #tpu.memory_space<vmem>>, %arg2: memref<1x128xf32, #tpu.memory_space<vmem>>, %arg3: memref<1x128xf32, #tpu.memory_space<vmem>>, %arg4: memref<128x128xbf16, #tpu.memory_space<vmem>>, %arg5: memref<256x128xf32, #tpu.memory_space<vmem>>, %arg6: memref<1x8x128xf32, #tpu.memory_space<vmem>>) attributes {dimension_semantics = [#tpu.dimension_semantics<parallel>], iteration_bounds = array<i64: 2>, scalar_prefetch = 0 : i64, scratch_operands = 0 : i64, tpu.core_type = #tpu.core_type<tc>, window_params = [{transform_indices = @transform_0, window_bounds = array<i64: 256, 128>}, {pipeline_mode = #tpu.pipeline_mode<synchronous>, transform_indices = @transform_1, window_bounds = array<i64: 1, 128>}, {pipeline_mode = #tpu.pipeline_mode<synchronous>, transform_indices = @transform_2, window_bounds = array<i64: 1, 128>}, {pipeline_mode = #tpu.pipeline_mode<synchronous>, transform_indices = @transform_3, window_bounds = array<i64: 128, 128>}, {transform_indices = @transform_4, window_bounds = array<i64: 256, 128>}, {transform_indices = @transform_5, window_bounds = array<i64: 1, 8, 128>}]} {
    %c0 = arith.constant 0 : index
    %c0_0 = arith.constant 0 : index
    %0 = vector.load %arg1[%c0, %c0_0] : memref<256x128xf32, #tpu.memory_space<vmem>>, vector<256x128xf32>
    %c0_1 = arith.constant 0 : index
    %c0_2 = arith.constant 0 : index
    %1 = vector.load %arg2[%c0_1, %c0_2] : memref<1x128xf32, #tpu.memory_space<vmem>>, vector<1x128xf32>
    %2 = vector.broadcast %1 : vector<1x128xf32> to vector<256x128xf32>
    %3 = arith.mulf %0, %2 : vector<256x128xf32>
    %c0_3 = arith.constant 0 : index
    %c0_4 = arith.constant 0 : index
    %4 = vector.load %arg3[%c0_3, %c0_4] : memref<1x128xf32, #tpu.memory_space<vmem>>, vector<1x128xf32>
    %5 = vector.broadcast %4 : vector<1x128xf32> to vector<256x128xf32>
    %6 = arith.addf %3, %5 : vector<256x128xf32>
    %cst = arith.constant 0.000000e+00 : f32
    %7 = vector.broadcast %cst : f32 to vector<256x128xf32>
    %8 = arith.maximumf %6, %7 : vector<256x128xf32>
    %9 = arith.truncf %8 : vector<256x128xf32> to vector<256x128xbf16>
    %c0_5 = arith.constant 0 : index
    %c0_6 = arith.constant 0 : index
    %10 = vector.load %arg4[%c0_5, %c0_6] : memref<128x128xbf16, #tpu.memory_space<vmem>>, vector<128x128xbf16>
    %cst_7 = arith.constant dense<0.000000e+00> : vector<256x128xf32>
    %11 = tpu.matmul %9, %10, %cst_7 {dimension_numbers = #tpu.dot_dimension_numbers<[1], [0], [0], [1], [0, 0, 1, 1], [], []>} : vector<256x128xbf16>, vector<128x128xbf16>, vector<256x128xf32> -> vector<256x128xf32>
    %c0_8 = arith.constant 0 : index
    %c0_9 = arith.constant 0 : index
    %12 = vector.load %arg5[%c0_8, %c0_9] : memref<256x128xf32, #tpu.memory_space<vmem>>, vector<256x128xf32>
    tpu.vector_store %arg5[%c0_8, %c0_9], %11 {strides = array<i32>} : memref<256x128xf32, #tpu.memory_space<vmem>>, vector<256x128xf32>,
    %cst_10 = arith.constant dense<0.000000e+00> : vector<128xf32>
    %13 = vector.multi_reduction <add>, %11, %cst_10 [0] : vector<256x128xf32> to vector<128xf32>
    %14 = vector.shape_cast %13 : vector<128xf32> to vector<1x128xf32>
    %15 = arith.mulf %11, %11 : vector<256x128xf32>
    %cst_11 = arith.constant dense<0.000000e+00> : vector<128xf32>
    %16 = vector.multi_reduction <add>, %15, %cst_11 [0] : vector<256x128xf32> to vector<128xf32>
    %17 = vector.shape_cast %16 : vector<128xf32> to vector<1x128xf32>
    %cst_12 = arith.constant 0.000000e+00 : f32
    %18 = vector.broadcast %cst_12 : f32 to vector<6x128xf32>
    %19 = tpu.concatenate %14, %17, %18 in 0 : vector<1x128xf32>, vector<1x128xf32>, vector<6x128xf32> -> vector<8x128xf32>
    %20 = vector.shape_cast %19 : vector<8x128xf32> to vector<1x8x128xf32>
    %c0_13 = arith.constant 0 : index
    %c0_14 = arith.constant 0 : index
    %c0_15 = arith.constant 0 : index
    %21 = vector.load %arg6[%c0_13, %c0_14, %c0_15] : memref<1x8x128xf32, #tpu.memory_space<vmem>>, vector<1x8x128xf32>
    tpu.vector_store %arg6[%c0_13, %c0_14, %c0_15], %20 {strides = array<i32>} : memref<1x8x128xf32, #tpu.memory_space<vmem>>, vector<1x8x128xf32>,
    return
  }
  func.func @transform_0(%arg0: i32) -> (i32, i32) {
    %c0_i32 = arith.constant 0 : i32
    %c0_i32_0 = arith.constant 0 : i32
    return %arg0, %c0_i32 : i32, i32
  }
  func.func @transform_1(%arg0: i32) -> (i32, i32) {
    %c0_i32 = arith.constant 0 : i32
    %c0_i32_0 = arith.constant 0 : i32
    %c0_i32_1 = arith.constant 0 : i32
    return %c0_i32, %c0_i32_0 : i32, i32
  }
  func.func @transform_2(%arg0: i32) -> (i32, i32) {
    %c0_i32 = arith.constant 0 : i32
    %c0_i32_0 = arith.constant 0 : i32
    %c0_i32_1 = arith.constant 0 : i32
    return %c0_i32, %c0_i32_0 : i32, i32
  }
  func.func @transform_3(%arg0: i32) -> (i32, i32) {
    %c0_i32 = arith.constant 0 : i32
    %c0_i32_0 = arith.constant 0 : i32
    %c0_i32_1 = arith.constant 0 : i32
    return %c0_i32, %c0_i32_0 : i32, i32
  }
  func.func @transform_4(%arg0: i32) -> (i32, i32) {
    %c0_i32 = arith.constant 0 : i32
    %c0_i32_0 = arith.constant 0 : i32
    return %arg0, %c0_i32 : i32, i32
  }
  func.func @transform_5(%arg0: i32) -> (i32, i32, i32) {
    %c0_i32 = arith.constant 0 : i32
    %c0_i32_0 = arith.constant 0 : i32
    %c0_i32_1 = arith.constant 0 : i32
    return %arg0, %c0_i32, %c0_i32_0 : i32, i32, i32
  }
}

module attributes {stable_mosaic.version = 11 : i64} {
  func.func @_bn_add_relu_kernel(%arg0: i32, %arg1: memref<256x128xf32, #tpu.memory_space<vmem>>, %arg2: memref<256x128xf32, #tpu.memory_space<vmem>>, %arg3: memref<1x128xf32, #tpu.memory_space<vmem>>, %arg4: memref<1x128xf32, #tpu.memory_space<vmem>>, %arg5: memref<256x128xf32, #tpu.memory_space<vmem>>) attributes {dimension_semantics = [#tpu.dimension_semantics<parallel>], iteration_bounds = array<i64: 2>, scalar_prefetch = 0 : i64, scratch_operands = 0 : i64, tpu.core_type = #tpu.core_type<tc>, window_params = [{transform_indices = @transform_0, window_bounds = array<i64: 256, 128>}, {transform_indices = @transform_1, window_bounds = array<i64: 256, 128>}, {pipeline_mode = #tpu.pipeline_mode<synchronous>, transform_indices = @transform_2, window_bounds = array<i64: 1, 128>}, {pipeline_mode = #tpu.pipeline_mode<synchronous>, transform_indices = @transform_3, window_bounds = array<i64: 1, 128>}, {transform_indices = @transform_4, window_bounds = array<i64: 256, 128>}]} {
    %c0 = arith.constant 0 : index
    %c0_0 = arith.constant 0 : index
    %0 = vector.load %arg1[%c0, %c0_0] : memref<256x128xf32, #tpu.memory_space<vmem>>, vector<256x128xf32>
    %c0_1 = arith.constant 0 : index
    %c0_2 = arith.constant 0 : index
    %1 = vector.load %arg3[%c0_1, %c0_2] : memref<1x128xf32, #tpu.memory_space<vmem>>, vector<1x128xf32>
    %2 = vector.broadcast %1 : vector<1x128xf32> to vector<256x128xf32>
    %3 = arith.mulf %0, %2 : vector<256x128xf32>
    %c0_3 = arith.constant 0 : index
    %c0_4 = arith.constant 0 : index
    %4 = vector.load %arg4[%c0_3, %c0_4] : memref<1x128xf32, #tpu.memory_space<vmem>>, vector<1x128xf32>
    %5 = vector.broadcast %4 : vector<1x128xf32> to vector<256x128xf32>
    %6 = arith.addf %3, %5 : vector<256x128xf32>
    %c0_5 = arith.constant 0 : index
    %c0_6 = arith.constant 0 : index
    %7 = vector.load %arg2[%c0_5, %c0_6] : memref<256x128xf32, #tpu.memory_space<vmem>>, vector<256x128xf32>
    %8 = arith.addf %6, %7 : vector<256x128xf32>
    %cst = arith.constant 0.000000e+00 : f32
    %9 = vector.broadcast %cst : f32 to vector<256x128xf32>
    %10 = arith.maximumf %8, %9 : vector<256x128xf32>
    %c0_7 = arith.constant 0 : index
    %c0_8 = arith.constant 0 : index
    %11 = vector.load %arg5[%c0_7, %c0_8] : memref<256x128xf32, #tpu.memory_space<vmem>>, vector<256x128xf32>
    tpu.vector_store %arg5[%c0_7, %c0_8], %10 {strides = array<i32>} : memref<256x128xf32, #tpu.memory_space<vmem>>, vector<256x128xf32>,
    return
  }
  func.func @transform_0(%arg0: i32) -> (i32, i32) {
    %c0_i32 = arith.constant 0 : i32
    %c0_i32_0 = arith.constant 0 : i32
    return %arg0, %c0_i32 : i32, i32
  }
  func.func @transform_1(%arg0: i32) -> (i32, i32) {
    %c0_i32 = arith.constant 0 : i32
    %c0_i32_0 = arith.constant 0 : i32
    return %arg0, %c0_i32 : i32, i32
  }
  func.func @transform_2(%arg0: i32) -> (i32, i32) {
    %c0_i32 = arith.constant 0 : i32
    %c0_i32_0 = arith.constant 0 : i32
    %c0_i32_1 = arith.constant 0 : i32
    return %c0_i32, %c0_i32_0 : i32, i32
  }
  func.func @transform_3(%arg0: i32) -> (i32, i32) {
    %c0_i32 = arith.constant 0 : i32
    %c0_i32_0 = arith.constant 0 : i32
    %c0_i32_1 = arith.constant 0 : i32
    return %c0_i32, %c0_i32_0 : i32, i32
  }
  func.func @transform_4(%arg0: i32) -> (i32, i32) {
    %c0_i32 = arith.constant 0 : i32
    %c0_i32_0 = arith.constant 0 : i32
    return %arg0, %c0_i32 : i32, i32
  }
}

</mosaic_0001>

<bundles_post_ra>
// kernel: bottleneck_forward.6
= control target key start
LH: loop header
LB: loop body
LE: loop exit
PB: predicated region body
PF: predicated region fallthrough
CT: control target
= control target key end

     0   :  { %s453_s12 = smov 0   ;;  %s612_s0 = inlined_call_operand.vmem [shape: f32[512,128], index: 0, kind: input, shape index: {}]   ;;  %s613_s1 = inlined_call_operand.vmem [shape: f32[1,128], index: 1, kind: input, shape index: {}]   ;;  %s614_s2 = inlined_call_operand.vmem [shape: f32[1,128], index: 2, kind: input, shape index: {}]   ;;  %s615_s3 = inlined_call_operand.vmem [shape: f32[512,128], index: 3, kind: output, shape index: {}]  }
   0x1 LB: > { %s404_s13 = sadd.s32 4294967295, %s431_s12   ;;  %p408_p0 = scmp.ge.s32.totalorder %s431_s12, 1  ;;  %s431_s12 = sphi %s453_s12, %s13_s12  }
   0x2   : > { %p138_p1 = scmp.lt.s32.totalorder %s431_s12, 3 }
   0x4   : > { %p139_p2 = pnand %p408_p0, %p138_p1 }
   0x5   : > { %s409_s14 = sshll.u32 (!%p139_p2), %s404_s13, 5  ;;  %v464_v0 = vld [vmem:[%s613_s1] ss:$0 sm:$0xff] (!%p139_p2) }
   0x6   : > { %142 = sbr.rel (%p139_p2) target bundleno = 46 (0x2e), region = 32  ;;  %p163_p3 = scmp.lt.s32.totalorder (!%p139_p2), %s409_s14, 63  ;;  %v474_v1 = vld [vmem:[%s614_s2] ss:$0 sm:$0xff] (!%p139_p2) }
   0xd   : > { %s617_s14 = smov (!%p163_p3, %s409_s14), 63 }
   0xe   : > { %s410_s15 = sshll.u32 %s617_s14, 3 }
   0xf   : > { %s469_s20 = scalar_lea.vmem %s612_s0, %s410_s15  ;;  %s497_s25 = scalar_lea.vmem %s615_s3, %s410_s15 }
  0x10   : > { %v174_v2 = vld [vmem:[%s469_s20] sm:$0xff]  ;;  %v175_v3 = vld [vmem:[%s469_s20 + $0x8] sm:$0xff]  ;;  %v176_v4 = vld [vmem:[%s469_s20 + $0x10] sm:$0xff] }
  0x11   : > { %v213_v5 = vmul.f32 %v464_v0, %v174_v2  ;;  %v214_v6 = vmul.f32 %v464_v0, %v175_v3  ;;  %v215_v7 = vmul.f32 %v464_v0, %v176_v4  ;;  %v177_v8 = vld [vmem:[%s469_s20 + $0x18] sm:$0xff]  ;;  %v178_v9 = vld [vmem:[%s469_s20 + $0x20] sm:$0xff]  ;;  %v179_v10 = vld [vmem:[%s469_s20 + $0x28] sm:$0xff] }
  0x12   : > { %v216_v11 = vmul.f32 %v464_v0, %v177_v8  ;;  %v217_v12 = vmul.f32 %v464_v0, %v178_v9  ;;  %v218_v13 = vmul.f32 %v464_v0, %v179_v10  ;;  %v180_v14 = vld [vmem:[%s469_s20 + $0x30] sm:$0xff]  ;;  %v181_v15 = vld [vmem:[%s469_s20 + $0x38] sm:$0xff]  ;;  %v182_v24 = vld [vmem:[%s469_s20 + $0x40] sm:$0xff] }
  0x13   : > { %v252_v16 = vadd.f32 %v474_v1, %v213_v5  ;;  %v253_v17 = vadd.f32 %v474_v1, %v214_v6  ;;  %v254_v18 = vadd.f32 %v474_v1, %v215_v7  ;;  %v219_v19 = vmul.f32 %v464_v0, %v180_v14  ;;  %v183_v25 = vld [vmem:[%s469_s20 + $0x48] sm:$0xff]  ;;  %v184_v26 = vld [vmem:[%s469_s20 + $0x50] sm:$0xff]  ;;  %v185_v31 = vld [vmem:[%s469_s20 + $0x58] sm:$0xff] }
  0x14   : > { %v255_v20 = vadd.f32 %v474_v1, %v216_v11  ;;  %v256_v21 = vadd.f32 %v474_v1, %v217_v12  ;;  %v257_v22 = vadd.f32 %v474_v1, %v218_v13  ;;  %v220_v23 = vmul.f32 %v464_v0, %v181_v15  ;;  %v186_v32 = vld [vmem:[%s469_s20 + $0x60] sm:$0xff]  ;;  %v187_v33 = vld [vmem:[%s469_s20 + $0x68] sm:$0xff]  ;;  %v188_v38 = vld [vmem:[%s469_s20 + $0x70] sm:$0xff] }
  0x15   : > { %v284_v27 = vmax.f32 %v252_v16, 0.0  ;;  %v285_v28 = vmax.f32 %v253_v17, 0.0  ;;  %v286_v29 = vmax.f32 %v254_v18, 0.0  ;;  %v258_v30 = vadd.f32 %v474_v1, %v219_v19  ;;  %v189_v43 = vld [vmem:[%s469_s20 + $0x78] sm:$0xff]  ;;  %v190_v56 = vld [vmem:[%s469_s20 + $0x80] sm:$0xff]  ;;  %v191_v57 = vld [vmem:[%s469_s20 + $0x88] sm:$0xff] }
  0x16   : > { %v287_v34 = vmax.f32 %v255_v20, 0.0  ;;  %v288_v35 = vmax.f32 %v256_v21, 0.0  ;;  %v289_v36 = vmax.f32 %v257_v22, 0.0  ;;  %v259_v37 = vadd.f32 %v474_v1, %v220_v23  ;;  %v192_v58 = vld [vmem:[%s469_s20 + $0x90] sm:$0xff]  ;;  %v193_v63 = vld [vmem:[%s469_s20 + $0x98] sm:$0xff]  ;;  %v194_v2 = vld [vmem:[%s469_s20 + $0xa0] sm:$0xff] }
  0x17   : > { %316 = vst [vmem:[%s497_s25] sm:$0xff] %v284_v27  ;;  %317 = vst [vmem:[%s497_s25 + $0x8] sm:$0xff] %v285_v28  ;;  %v290_v39 = vmax.f32 %v258_v30, 0.0  ;;  %v221_v40 = vmul.f32 %v464_v0, %v182_v24  ;;  %v222_v41 = vmul.f32 %v464_v0, %v183_v25  ;;  %v223_v42 = vmul.f32 %v464_v0, %v184_v26  ;;  %v195_v3 = vld [vmem:[%s469_s20 + $0xa8] sm:$0xff]  ;;  %v196_v8 = vld [vmem:[%s469_s20 + $0xb0] sm:$0xff] }
  0x18   : > { %318 = vst [vmem:[%s497_s25 + $0x10] sm:$0xff] %v286_v29  ;;  %319 = vst [vmem:[%s497_s25 + $0x18] sm:$0xff] %v287_v34  ;;  %v291_v44 = vmax.f32 %v259_v37, 0.0  ;;  %v224_v45 = vmul.f32 %v464_v0, %v185_v31  ;;  %v225_v46 = vmul.f32 %v464_v0, %v186_v32  ;;  %v226_v47 = vmul.f32 %v464_v0, %v187_v33  ;;  %v197_v13 = vld [vmem:[%s469_s20 + $0xb8] sm:$0xff]  ;;  %v198_v26 = vld [vmem:[%s469_s20 + $0xc0] sm:$0xff] }
  0x19   : > { %320 = vst [vmem:[%s497_s25 + $0x20] sm:$0xff] %v288_v35  ;;  %321 = vst [vmem:[%s497_s25 + $0x28] sm:$0xff] %v289_v36  ;;  %v260_v48 = vadd.f32 %v474_v1, %v221_v40  ;;  %v261_v49 = vadd.f32 %v474_v1, %v222_v41  ;;  %v262_v50 = vadd.f32 %v474_v1, %v223_v42  ;;  %v199_v27 = vld [vmem:[%s469_s20 + $0xc8] sm:$0xff]  ;;  %v200_v28 = vld [vmem:[%s469_s20 + $0xd0] sm:$0xff] }
  0x1a   : > { %322 = vst [vmem:[%s497_s25 + $0x30] sm:$0xff] %v290_v39  ;;  %v227_v51 = vmul.f32 %v464_v0, %v188_v38  ;;  %323 = vst [vmem:[%s497_s25 + $0x38] sm:$0xff] %v291_v44  ;;  %v263_v52 = vadd.f32 %v474_v1, %v224_v45  ;;  %v264_v53 = vadd.f32 %v474_v1, %v225_v46  ;;  %v201_v33 = vld [vmem:[%s469_s20 + $0xd8] sm:$0xff]  ;;  %v202_v34 = vld [vmem:[%s469_s20 + $0xe0] sm:$0xff] }
  0x1b   : > { %v265_v54 = vadd.f32 %v474_v1, %v226_v47  ;;  %v228_v55 = vmul.f32 %v464_v0, %v189_v43  ;;  %v292_v59 = vmax.f32 %v260_v48, 0.0  ;;  %v293_v60 = vmax.f32 %v261_v49, 0.0  ;;  %v203_v35 = vld [vmem:[%s469_s20 + $0xe8] sm:$0xff]  ;;  %v204_v40 = vld [vmem:[%s469_s20 + $0xf0] sm:$0xff]  ;;  %v205_v45 = vld [vmem:[%s469_s20 + $0xf8] sm:$0xff] }
  0x1c   : > { %v294_v61 = vmax.f32 %v262_v50, 0.0  ;;  %v266_v62 = vadd.f32 %v474_v1, %v227_v51  ;;  %v295_v4 = vmax.f32 %v263_v52, 0.0  ;;  %v296_v5 = vmax.f32 %v264_v53, 0.0 }
  0x1d   : > { %v297_v6 = vmax.f32 %v265_v54, 0.0  ;;  %v267_v7 = vadd.f32 %v474_v1, %v228_v55  ;;  %324 = vst [vmem:[%s497_s25 + $0x40] sm:$0xff] %v292_v59  ;;  %325 = vst [vmem:[%s497_s25 + $0x48] sm:$0xff] %v293_v60  ;;  %v229_v10 = vmul.f32 %v464_v0, %v190_v56  ;;  %v230_v11 = vmul.f32 %v464_v0, %v191_v57 }
  0x1e   : > { %326 = vst [vmem:[%s497_s25 + $0x50] sm:$0xff] %v294_v61  ;;  %v298_v9 = vmax.f32 %v266_v62, 0.0  ;;  %v231_v12 = vmul.f32 %v464_v0, %v192_v58  ;;  %327 = vst [vmem:[%s497_s25 + $0x58] sm:$0xff] %v295_v4  ;;  %v232_v15 = vmul.f32 %v464_v0, %v193_v63  ;;  %v233_v16 = vmul.f32 %v464_v0, %v194_v2 }
  0x1f   : > { %328 = vst [vmem:[%s497_s25 + $0x60] sm:$0xff] %v296_v5  ;;  %329 = vst [vmem:[%s497_s25 + $0x68] sm:$0xff] %v297_v6  ;;  %v299_v14 = vmax.f32 %v267_v7, 0.0  ;;  %v234_v17 = vmul.f32 %v464_v0, %v195_v3  ;;  %v268_v18 = vadd.f32 %v474_v1, %v229_v10  ;;  %v269_v19 = vadd.f32 %v474_v1, %v230_v11 }
  0x20   : > { %330 = vst [vmem:[%s497_s25 + $0x70] sm:$0xff] %v298_v9  ;;  %v270_v20 = vadd.f32 %v474_v1, %v231_v12  ;;  %v235_v21 = vmul.f32 %v464_v0, %v196_v8  ;;  %v271_v22 = vadd.f32 %v474_v1, %v232_v15  ;;  %v272_v23 = vadd.f32 %v474_v1, %v233_v16 }
  0x21   : > { %331 = vst [vmem:[%s497_s25 + $0x78] sm:$0xff] %v299_v14  ;;  %v273_v24 = vadd.f32 %v474_v1, %v234_v17  ;;  %v236_v25 = vmul.f32 %v464_v0, %v197_v13  ;;  %v300_v29 = vmax.f32 %v268_v18, 0.0  ;;  %v301_v30 = vmax.f32 %v269_v19, 0.0 }
  0x22   : > { %v302_v31 = vmax.f32 %v270_v20, 0.0  ;;  %v274_v32 = vadd.f32 %v474_v1, %v235_v21  ;;  %v303_v36 = vmax.f32 %v271_v22, 0.0  ;;  %v304_v37 = vmax.f32 %v272_v23, 0.0 }
  0x23   : > { %v305_v38 = vmax.f32 %v273_v24, 0.0  ;;  %v275_v39 = vadd.f32 %v474_v1, %v236_v25  ;;  %332 = vst [vmem:[%s497_s25 + $0x80] sm:$0xff] %v300_v29  ;;  %333 = vst [vmem:[%s497_s25 + $0x88] sm:$0xff] %v301_v30  ;;  %v237_v42 = vmul.f32 %v464_v0, %v198_v26  ;;  %v238_v43 = vmul.f32 %v464_v0, %v199_v27 }
  0x24   : > { %334 = vst [vmem:[%s497_s25 + $0x90] sm:$0xff] %v302_v31  ;;  %v306_v41 = vmax.f32 %v274_v32, 0.0  ;;  %v239_v44 = vmul.f32 %v464_v0, %v200_v28  ;;  %335 = vst [vmem:[%s497_s25 + $0x98] sm:$0xff] %v303_v36  ;;  %v240_v47 = vmul.f32 %v464_v0, %v201_v33  ;;  %v241_v48 = vmul.f32 %v464_v0, %v202_v34 }
  0x25   : > { %336 = vst [vmem:[%s497_s25 + $0xa0] sm:$0xff] %v304_v37  ;;  %337 = vst [vmem:[%s497_s25 + $0xa8] sm:$0xff] %v305_v38  ;;  %v307_v46 = vmax.f32 %v275_v39, 0.0  ;;  %v242_v49 = vmul.f32 %v464_v0, %v203_v35  ;;  %v276_v50 = vadd.f32 %v474_v1, %v237_v42  ;;  %v277_v51 = vadd.f32 %v474_v1, %v238_v43 }
  0x26   : > { %338 = vst [vmem:[%s497_s25 + $0xb0] sm:$0xff] %v306_v41  ;;  %v278_v52 = vadd.f32 %v474_v1, %v239_v44  ;;  %v243_v53 = vmul.f32 %v464_v0, %v204_v40  ;;  %v279_v54 = vadd.f32 %v474_v1, %v240_v47  ;;  %v280_v55 = vadd.f32 %v474_v1, %v241_v48 }
  0x27   : > { %339 = vst [vmem:[%s497_s25 + $0xb8] sm:$0xff] %v307_v46  ;;  %v281_v56 = vadd.f32 %v474_v1, %v242_v49  ;;  %v244_v57 = vmul.f32 %v464_v0, %v205_v45  ;;  %v308_v58 = vmax.f32 %v276_v50, 0.0  ;;  %v309_v59 = vmax.f32 %v277_v51, 0.0 }
  0x28   : > { %v310_v60 = vmax.f32 %v278_v52, 0.0  ;;  %v282_v61 = vadd.f32 %v474_v1, %v243_v53  ;;  %v311_v62 = vmax.f32 %v279_v54, 0.0  ;;  %v312_v63 = vmax.f32 %v280_v55, 0.0 }
  0x29   : > { %v313_v2 = vmax.f32 %v281_v56, 0.0  ;;  %v283_v3 = vadd.f32 %v474_v1, %v244_v57  ;;  %340 = vst [vmem:[%s497_s25 + $0xc0] sm:$0xff] %v308_v58  ;;  %341 = vst [vmem:[%s497_s25 + $0xc8] sm:$0xff] %v309_v59 }
  0x2a   : > { %342 = vst [vmem:[%s497_s25 + $0xd0] sm:$0xff] %v310_v60  ;;  %v314_v4 = vmax.f32 %v282_v61, 0.0  ;;  %343 = vst [vmem:[%s497_s25 + $0xd8] sm:$0xff] %v311_v62 }
  0x2b   : > { %344 = vst [vmem:[%s497_s25 + $0xe0] sm:$0xff] %v312_v63  ;;  %345 = vst [vmem:[%s497_s25 + $0xe8] sm:$0xff] %v313_v2  ;;  %v315_v0 = vmax.f32 %v283_v3, 0.0 }
  0x2c   : > { %346 = vst [vmem:[%s497_s25 + $0xf0] sm:$0xff] %v314_v4 }
  0x2d   : > { %347 = vst [vmem:[%s497_s25 + $0xf8] sm:$0xff] %v315_v0 }
  0x2e PF: > { %s13_s12 = sadd.s32 1, %s431_s12  }
  0x2f   : > { %p10_p4 = scmp.ge.s32.totalorder %s13_s12, 4  }
  0x31   :  { %12 = sbr.rel (!%p10_p4) target bundleno = 1 (0x1), region = 62 }

// kernel: bottleneck_forward.5
= control target key start
LH: loop header
LB: loop body
LE: loop exit
PB: predicated region body
PF: predicated region fallthrough
CT: control target
= control target key end

     0   :  { %s841_s12 = smov 0   ;;  %s1043_s0 = inlined_call_operand.vmem [shape: f32[512,128], index: 0, kind: input, shape index: {}]   ;;  %s1044_s1 = inlined_call_operand.vmem [shape: bf16[128,128], index: 1, kind: input, shape index: {}]   ;;  %s1045_s2 = inlined_call_operand.vmem [shape: f32[512,128], index: 2, kind: output, shape index: {0}]   ;;  %s1046_s3 = inlined_call_operand.vmem [shape: f32[2,8,128], index: 3, kind: output, shape index: {1}]  }
   0x1 LB: > { %s847_s13 = sadd.s32 4294967295, %s819_s12   ;;  %p693_p0 = scmp.ge.s32.totalorder %s819_s12, 1  ;;  %s819_s12 = sphi %s841_s12, %s14_s12  }
   0x2   : > { %p141_p1 = scmp.lt.s32.totalorder %s819_s12, 3 }
   0x4   : > { %p142_p2 = pnand %p693_p0, %p141_p1 }
   0x5   : > { %v805_v0 = vld [vmem:[%s1044_s1] sm:$0xff] (!%p142_p2)   ;;  %s694_s16 = sshll.u32 (!%p142_p2), %s847_s13, 5  ;;  %v806_v1 = vld [vmem:[%s1044_s1 + $0x8] sm:$0xff] (!%p142_p2)   ;;  %v807_v2 = vld [vmem:[%s1044_s1 + $0x10] sm:$0xff] (!%p142_p2)   ;;  %p181_p4 = scmp.lt.s32.totalorder (!%p142_p2), %s847_s13, 1  ;;  %vm597_vm0 = vcmask (!%p142_p2), 1040384  }
   0x6   : > { %145 = sbr.rel (%p142_p2) target bundleno = 332 (0x14c), region = 28  ;;  %p170_p3 = scmp.lt.s32.totalorder (!%p142_p2), %s694_s16, 63  ;;  %733 = vmatprep.subr.bf16.mxu0 (!%p142_p2), %v805_v0  ;;  %781 = vmatprep.subr.bf16.mxu1 (!%p142_p2), %v805_v0  ;;  %v808_v3 = vld [vmem:[%s1044_s1 + $0x18] sm:$0xff] (!%p142_p2)   ;;  %v809_v7 = vld [vmem:[%s1044_s1 + $0x20] sm:$0xff] (!%p142_p2)   ;;  %v810_v11 = vld [vmem:[%s1044_s1 + $0x28] sm:$0xff] (!%p142_p2)   ;;  %vm599_vm1 = vcmask (!%p142_p2), 1041408  }
   0x7   : > { %734 = vmatpush3.bf16.msra.mxu0 (!%p142_p2), %v805_v0  ;;  %789 = vmatpush3.bf16.msra.mxu1 (!%p142_p2), %v805_v0  ;;  %v811_v12 = vld [vmem:[%s1044_s1 + $0x30] sm:$0xff] (!%p142_p2)   ;;  %v812_v13 = vld [vmem:[%s1044_s1 + $0x38] sm:$0xff] (!%p142_p2)  }
   0x8   : > { %735 = vmatprep.subr.bf16.mxu0 (!%p142_p2), %v806_v1  ;;  %782 = vmatprep.subr.bf16.mxu1 (!%p142_p2), %v806_v1 }
   0xb   : > { %736 = vmatpush3.bf16.msra.mxu0 (!%p142_p2), %v806_v1  ;;  %790 = vmatpush3.bf16.msra.mxu1 (!%p142_p2), %v806_v1 }
   0xc   : > { %737 = vmatprep.subr.bf16.mxu0 (!%p142_p2), %v807_v2  ;;  %783 = vmatprep.subr.bf16.mxu1 (!%p142_p2), %v807_v2 }
   0xd   : > { %s1048_s16 = smov (!%p170_p3, %s694_s16), 63  ;;  %s1050_s13 = smov (!%p181_p4, %s847_s13), 1 }
   0xe   : > { %s695_s21 = sshll.u32 %s1048_s16, 3  ;;  %s698_s11 = sshll.u32 %s1050_s13, 3 }
   0xf   : > { %s869_s24 = scalar_lea.vmem %s1043_s0, %s695_s21  ;;  %738 = vmatpush3.bf16.msra.mxu0 %v807_v2  ;;  %791 = vmatpush3.bf16.msra.mxu1 %v807_v2  ;;  %s923_s10 = scalar_lea.vmem %s1045_s2, %s695_s21 }
  0x10   : > { %v186_v4 = vld [vmem:[%s869_s24] sm:$0xff]  ;;  %v187_v5 = vld [vmem:[%s869_s24 + $0x8] sm:$0xff]  ;;  %739 = vmatprep.subr.bf16.mxu0 %v808_v3  ;;  %784 = vmatprep.subr.bf16.mxu1 %v808_v3  ;;  %v188_v14 = vld [vmem:[%s869_s24 + $0x10] sm:$0xff]  ;;  %s184_s16 = scalar_lea.vmem %s1046_s3, %s698_s11 }
  0x11   : > { %v218_v6 = vpack.c.bf16 %v187_v5, %v186_v4  ;;  %v202_v8 = vld [vmem:[%s869_s24 + $0x80] sm:$0xff]  ;;  %v203_v9 = vld [vmem:[%s869_s24 + $0x88] sm:$0xff]  ;;  %v189_v15 = vld [vmem:[%s869_s24 + $0x18] sm:$0xff] }
  0x12   : > { %v226_v10 = vpack.c.bf16 %v203_v9, %v202_v8  ;;  %v190_v16 = vld [vmem:[%s869_s24 + $0x20] sm:$0xff]  ;;  %v191_v17 = vld [vmem:[%s869_s24 + $0x28] sm:$0xff]  ;;  %v204_v18 = vld [vmem:[%s869_s24 + $0x90] sm:$0xff]  ;;  %v219_v22 = vpack.c.bf16 %v189_v15, %v188_v14 }
  0x13   : > { %749 = vmatprep.mubr.bf16.mxu0 %v218_v6  ;;  %740 = vmatpush3.bf16.msra.mxu0 %v808_v3  ;;  %v205_v19 = vld [vmem:[%s869_s24 + $0x98] sm:$0xff]  ;;  %v206_v20 = vld [vmem:[%s869_s24 + $0xa0] sm:$0xff]  ;;  %v207_v21 = vld [vmem:[%s869_s24 + $0xa8] sm:$0xff]  ;;  %v220_v23 = vpack.c.bf16 %v191_v17, %v190_v16 }
  0x14   : > { %741 = vmatprep.subr.bf16.mxu0 %v809_v7  ;;  %792 = vmatpush3.bf16.msra.mxu1 %v808_v3  ;;  %v227_v24 = vpack.c.bf16 %v205_v19, %v204_v18  ;;  %v228_v25 = vpack.c.bf16 %v207_v21, %v206_v20  ;;  %v192_v26 = vld [vmem:[%s869_s24 + $0x30] sm:$0xff]  ;;  %v193_v27 = vld [vmem:[%s869_s24 + $0x38] sm:$0xff]  ;;  %v194_v28 = vld [vmem:[%s869_s24 + $0x40] sm:$0xff] }
  0x15   : > { %785 = vmatprep.subr.bf16.mxu1 %v809_v7  ;;  %765 = vmatprep.mubr.bf16.mxu1 %v226_v10  ;;  %v195_v29 = vld [vmem:[%s869_s24 + $0x48] sm:$0xff]  ;;  %v208_v30 = vld [vmem:[%s869_s24 + $0xb0] sm:$0xff]  ;;  %v209_v31 = vld [vmem:[%s869_s24 + $0xb8] sm:$0xff]  ;;  %v221_v34 = vpack.c.bf16 %v193_v27, %v192_v26 }
  0x16   : > { %v210_v32 = vld [vmem:[%s869_s24 + $0xc0] sm:$0xff]  ;;  %v211_v33 = vld [vmem:[%s869_s24 + $0xc8] sm:$0xff]  ;;  %v222_v35 = vpack.c.bf16 %v195_v29, %v194_v28  ;;  %v229_v36 = vpack.c.bf16 %v209_v31, %v208_v30  ;;  %v196_v38 = vld [vmem:[%s869_s24 + $0x50] sm:$0xff] }
  0x17   : > { %742 = vmatpush3.bf16.msra.mxu0 %v809_v7  ;;  %v230_v37 = vpack.c.bf16 %v211_v33, %v210_v32  ;;  %v197_v39 = vld [vmem:[%s869_s24 + $0x58] sm:$0xff]  ;;  %v198_v40 = vld [vmem:[%s869_s24 + $0x60] sm:$0xff]  ;;  %v199_v41 = vld [vmem:[%s869_s24 + $0x68] sm:$0xff] }
  0x18   : > { %743 = vmatprep.subr.bf16.mxu0 %v810_v11  ;;  %793 = vmatpush3.bf16.msra.mxu1 %v809_v7  ;;  %v212_v42 = vld [vmem:[%s869_s24 + $0xd0] sm:$0xff]  ;;  %v213_v43 = vld [vmem:[%s869_s24 + $0xd8] sm:$0xff]  ;;  %v214_v44 = vld [vmem:[%s869_s24 + $0xe0] sm:$0xff]  ;;  %v223_v46 = vpack.c.bf16 %v197_v39, %v196_v38  ;;  %v224_v47 = vpack.c.bf16 %v199_v41, %v198_v40 }
  0x19   : > { %786 = vmatprep.subr.bf16.mxu1 %v810_v11  ;;  %v215_v45 = vld [vmem:[%s869_s24 + $0xe8] sm:$0xff]  ;;  %v231_v48 = vpack.c.bf16 %v213_v43, %v212_v42  ;;  %v200_v50 = vld [vmem:[%s869_s24 + $0x70] sm:$0xff]  ;;  %v201_v51 = vld [vmem:[%s869_s24 + $0x78] sm:$0xff] }
  0x1a   : > { %v232_v49 = vpack.c.bf16 %v215_v45, %v214_v44  ;;  %v216_v52 = vld [vmem:[%s869_s24 + $0xf0] sm:$0xff]  ;;  %v217_v53 = vld [vmem:[%s869_s24 + $0xf8] sm:$0xff]  ;;  %v225_v54 = vpack.c.bf16 %v201_v51, %v200_v50 }
  0x1b   : > { %744 = vmatpush3.bf16.msra.mxu0 %v810_v11  ;;  %v233_v55 = vpack.c.bf16 %v217_v53, %v216_v52 }
  0x1c   : > { %745 = vmatprep.subr.bf16.mxu0 %v811_v12  ;;  %794 = vmatpush3.bf16.msra.mxu1 %v810_v11 }
  0x1d   : > { %787 = vmatprep.subr.bf16.mxu1 %v811_v12 }
  0x1f   : > { %746 = vmatpush3.bf16.msra.mxu0 %v811_v12 }
  0x20   : > { %747 = vmatprep.subr.bf16.mxu0 %v812_v13  ;;  %795 = vmatpush3.bf16.msra.mxu1 %v811_v12 }
  0x21   : > { %788 = vmatprep.subr.bf16.mxu1 %v812_v13 }
  0x23   : > { %748 = vmatpush3.bf16.msra.mxu0 %v812_v13 }
  0x24   : > { %796 = vmatpush3.bf16.msra.mxu1 %v812_v13 }
  0x26   : > { %750 = vmatmul.mubr.bf16.vlgmr.msra.gmra.mrb[0].mxu0 %v219_v22 }
  0x27   : > { %753 = vmatprep.mubr.bf16.mxu0 %v220_v23  ;;  %766 = vmatmul.mubr.bf16.vlgmr.msra.gmra.mrb[0].mxu1 %v227_v24 }
  0x28   : > { %769 = vmatprep.mubr.bf16.mxu1 %v228_v25 }
  0x2e   : > { %754 = vmatmul.mubr.bf16.gmra.mrb[4].mxu0 %v221_v34 }
  0x2f   : > { %757 = vmatprep.mubr.bf16.mxu0 %v222_v35  ;;  %770 = vmatmul.mubr.bf16.gmra.mrb[4].mxu1 %v229_v36 }
  0x30   : > { %773 = vmatprep.mubr.bf16.mxu1 %v230_v37 }
  0x36   : > { %758 = vmatmul.mubr.bf16.gmra.mrb[8].mxu0 %v223_v46 }
  0x37   : > { %761 = vmatprep.mubr.bf16.mxu0 %v224_v47  ;;  %774 = vmatmul.mubr.bf16.gmra.mrb[8].mxu1 %v231_v48 }
  0x38   : > { %777 = vmatprep.mubr.bf16.mxu1 %v232_v49 }
  0x3e   : > { %762 = vmatmul.mubr.bf16.gmra.mrb[12].mxu0 %v225_v54 }
  0x3f   : > { %778 = vmatmul.mubr.bf16.gmra.mrb[12].mxu1 %v233_v55 }
  0xf9   : > { %v751_v56 = vpop.f32.mrb[0].mxu0 }
  0xfa   : > { %461 = vst [vmem:[%s923_s10 + $0x10] sm:$0xff] %v751_v56  ;;  %v332_v57 = vpop.f32.mrb[1].mxu0  ;;  %v926_v58 = vpop.f32.mrb[0].mxu1  ;;  %v530_v3 = vmul.f32 %v751_v56, %v751_v56 }
  0xfb   : > { %459 = vst [vmem:[%s923_s10] sm:$0xff] %v332_v57  ;;  %v752_v59 = vpop.f32.mrb[2].mxu0  ;;  %477 = vst [vmem:[%s923_s10 + $0x90] sm:$0xff] %v926_v58  ;;  %v931_v60 = vpop.f32.mrb[1].mxu1  ;;  %v528_v63 = vmul.f32 %v332_v57, %v332_v57 }
  0xfc   : > { %462 = vst [vmem:[%s923_s10 + $0x18] sm:$0xff] %v752_v59  ;;  %v335_v61 = vpop.f32.mrb[3].mxu0  ;;  %475 = vst [vmem:[%s923_s10 + $0x80] sm:$0xff] %v931_v60  ;;  %v936_v62 = vpop.f32.mrb[2].mxu1  ;;  %v531_v6 = vmul.f32 %v752_v59, %v752_v59 }
  0xfd   : > { %460 = vst [vmem:[%s923_s10 + $0x8] sm:$0xff] %v335_v61  ;;  %v491_v0 = vadd.f32 %v335_v61, %v332_v57  ;;  %v529_v1 = vmul.f32 %v335_v61, %v335_v61  ;;  %478 = vst [vmem:[%s923_s10 + $0x98] sm:$0xff] %v936_v62  ;;  %v941_v2 = vpop.f32.mrb[3].mxu1 }
  0xfe   : > { %476 = vst [vmem:[%s923_s10 + $0x88] sm:$0xff] %v941_v2 }
  0xff   : > { %v492_v4 = vadd.f32 %v751_v56, %v491_v0  ;;  %v560_v5 = vadd.f32 %v529_v1, %v528_v63 }
 0x101   : > { %v561_v7 = vadd.f32 %v560_v5, %v530_v3  ;;  %v755_v8 = vpop.f32.mrb[4].mxu0  ;;  %v493_v9 = vadd.f32 %v752_v59, %v492_v4 }
 0x102   : > { %465 = vst [vmem:[%s923_s10 + $0x30] sm:$0xff] %v755_v8  ;;  %v348_v10 = vpop.f32.mrb[5].mxu0  ;;  %v946_v11 = vpop.f32.mrb[4].mxu1  ;;  %v534_v23 = vmul.f32 %v755_v8, %v755_v8 }
 0x103   : > { %463 = vst [vmem:[%s923_s10 + $0x20] sm:$0xff] %v348_v10  ;;  %v494_v12 = vadd.f32 %v493_v9, %v348_v10  ;;  %v532_v13 = vmul.f32 %v348_v10, %v348_v10  ;;  %v562_v14 = vadd.f32 %v561_v7, %v531_v6  ;;  %v756_v15 = vpop.f32.mrb[6].mxu0  ;;  %481 = vst [vmem:[%s923_s10 + $0xb0] sm:$0xff] %v946_v11  ;;  %v951_v16 = vpop.f32.mrb[5].mxu1 }
 0x104   : > { %466 = vst [vmem:[%s923_s10 + $0x38] sm:$0xff] %v756_v15  ;;  %v351_v17 = vpop.f32.mrb[7].mxu0  ;;  %479 = vst [vmem:[%s923_s10 + $0xa0] sm:$0xff] %v951_v16  ;;  %v956_v18 = vpop.f32.mrb[6].mxu1  ;;  %v535_v26 = vmul.f32 %v756_v15, %v756_v15  ;;  %v544_v9 = vmul.f32 %v931_v60, %v931_v60 }
 0x105   : > { %v563_v19 = vadd.f32 %v562_v14, %v532_v13  ;;  %464 = vst [vmem:[%s923_s10 + $0x28] sm:$0xff] %v351_v17  ;;  %v495_v20 = vadd.f32 %v494_v12, %v351_v17  ;;  %v533_v21 = vmul.f32 %v351_v17, %v351_v17  ;;  %482 = vst [vmem:[%s923_s10 + $0xb8] sm:$0xff] %v956_v18  ;;  %v961_v22 = vpop.f32.mrb[7].mxu1 }
 0x106   : > { %480 = vst [vmem:[%s923_s10 + $0xa8] sm:$0xff] %v961_v22  ;;  %v546_v17 = vmul.f32 %v926_v58, %v926_v58 }
 0x107   : > { %v496_v24 = vadd.f32 %v755_v8, %v495_v20  ;;  %v564_v25 = vadd.f32 %v563_v19, %v533_v21  ;;  %v547_v21 = vmul.f32 %v936_v62, %v936_v62 }
 0x109   : > { %v565_v27 = vadd.f32 %v564_v25, %v534_v23  ;;  %v759_v28 = vpop.f32.mrb[8].mxu0  ;;  %v497_v29 = vadd.f32 %v756_v15, %v496_v24  ;;  %v545_v15 = vmul.f32 %v941_v2, %v941_v2 }
 0x10a   : > { %469 = vst [vmem:[%s923_s10 + $0x50] sm:$0xff] %v759_v28  ;;  %v364_v30 = vpop.f32.mrb[9].mxu0  ;;  %v966_v31 = vpop.f32.mrb[8].mxu1  ;;  %v538_v43 = vmul.f32 %v759_v28, %v759_v28 }
 0x10b   : > { %467 = vst [vmem:[%s923_s10 + $0x40] sm:$0xff] %v364_v30  ;;  %v498_v32 = vadd.f32 %v497_v29, %v364_v30  ;;  %v536_v33 = vmul.f32 %v364_v30, %v364_v30  ;;  %v566_v34 = vadd.f32 %v565_v27, %v535_v26  ;;  %v760_v35 = vpop.f32.mrb[10].mxu0  ;;  %485 = vst [vmem:[%s923_s10 + $0xd0] sm:$0xff] %v966_v31  ;;  %v971_v36 = vpop.f32.mrb[9].mxu1 }
 0x10c   : > { %470 = vst [vmem:[%s923_s10 + $0x58] sm:$0xff] %v760_v35  ;;  %v367_v37 = vpop.f32.mrb[11].mxu0  ;;  %483 = vst [vmem:[%s923_s10 + $0xc0] sm:$0xff] %v971_v36  ;;  %v976_v38 = vpop.f32.mrb[10].mxu1  ;;  %v539_v46 = vmul.f32 %v760_v35, %v760_v35 }
 0x10d   : > { %v567_v39 = vadd.f32 %v566_v34, %v536_v33  ;;  %468 = vst [vmem:[%s923_s10 + $0x48] sm:$0xff] %v367_v37  ;;  %v499_v40 = vadd.f32 %v498_v32, %v367_v37  ;;  %v537_v41 = vmul.f32 %v367_v37, %v367_v37  ;;  %486 = vst [vmem:[%s923_s10 + $0xd8] sm:$0xff] %v976_v38  ;;  %v981_v42 = vpop.f32.mrb[11].mxu1 }
 0x10e   : > { %484 = vst [vmem:[%s923_s10 + $0xc8] sm:$0xff] %v981_v42 }
 0x10f   : > { %v500_v44 = vadd.f32 %v759_v28, %v499_v40  ;;  %v568_v45 = vadd.f32 %v567_v39, %v537_v41  ;;  %v549_v28 = vmul.f32 %v961_v22, %v961_v22  ;;  %v553_v39 = vmul.f32 %v981_v42, %v981_v42 }
 0x111   : > { %v569_v47 = vadd.f32 %v568_v45, %v538_v43  ;;  %v763_v48 = vpop.f32.mrb[12].mxu0  ;;  %v501_v49 = vadd.f32 %v760_v35, %v500_v44 }
 0x112   : > { %473 = vst [vmem:[%s923_s10 + $0x70] sm:$0xff] %v763_v48  ;;  %v380_v50 = vpop.f32.mrb[13].mxu0  ;;  %v986_v51 = vpop.f32.mrb[12].mxu1  ;;  %v542_v3 = vmul.f32 %v763_v48, %v763_v48 }
 0x113   : > { %471 = vst [vmem:[%s923_s10 + $0x60] sm:$0xff] %v380_v50  ;;  %v502_v52 = vadd.f32 %v501_v49, %v380_v50  ;;  %v540_v53 = vmul.f32 %v380_v50, %v380_v50  ;;  %v570_v54 = vadd.f32 %v569_v47, %v539_v46  ;;  %v764_v55 = vpop.f32.mrb[14].mxu0  ;;  %489 = vst [vmem:[%s923_s10 + $0xf0] sm:$0xff] %v986_v51  ;;  %v444_v56 = vpop.f32.mrb[13].mxu1 }
 0x114   : > { %474 = vst [vmem:[%s923_s10 + $0x78] sm:$0xff] %v764_v55  ;;  %v383_v57 = vpop.f32.mrb[15].mxu0  ;;  %487 = vst [vmem:[%s923_s10 + $0xe0] sm:$0xff] %v444_v56  ;;  %v780_v59 = vpop.f32.mrb[14].mxu1  ;;  %v543_v6 = vmul.f32 %v764_v55, %v764_v55  ;;  %v556_v44 = vmul.f32 %v444_v56, %v444_v56  ;;  %v558_v49 = vmul.f32 %v986_v51, %v986_v51 }
 0x115   : > { %v571_v61 = vadd.f32 %v570_v54, %v540_v53  ;;  %472 = vst [vmem:[%s923_s10 + $0x68] sm:$0xff] %v383_v57  ;;  %v503_v63 = vadd.f32 %v502_v52, %v383_v57  ;;  %v541_v0 = vmul.f32 %v383_v57, %v383_v57  ;;  %490 = vst [vmem:[%s923_s10 + $0xf8] sm:$0xff] %v780_v59  ;;  %v447_v1 = vpop.f32.mrb[15].mxu1 }
 0x116   : > { %488 = vst [vmem:[%s923_s10 + $0xe8] sm:$0xff] %v447_v1  ;;  %v559_v52 = vmul.f32 %v780_v59, %v780_v59 }
 0x117   : > { %v504_v4 = vadd.f32 %v763_v48, %v503_v63  ;;  %v572_v5 = vadd.f32 %v571_v61, %v541_v0 }
 0x119   : > { %v573_v7 = vadd.f32 %v572_v5, %v542_v3  ;;  %v505_v8 = vadd.f32 %v764_v55, %v504_v4 }
 0x11b   : > { %v506_v10 = vadd.f32 %v505_v8, %v931_v60  ;;  %v574_v12 = vadd.f32 %v573_v7, %v543_v6  ;;  %v548_v60 = vmul.f32 %v951_v16, %v951_v16 }
 0x11d   : > { %v575_v13 = vadd.f32 %v574_v12, %v544_v9  ;;  %v507_v14 = vadd.f32 %v506_v10, %v941_v2 }
 0x11f   : > { %v508_v19 = vadd.f32 %v926_v58, %v507_v14  ;;  %v576_v20 = vadd.f32 %v575_v13, %v545_v15  ;;  %v550_v58 = vmul.f32 %v946_v11, %v946_v11 }
 0x121   : > { %v577_v23 = vadd.f32 %v576_v20, %v546_v17  ;;  %v509_v24 = vadd.f32 %v936_v62, %v508_v19  ;;  %v551_v62 = vmul.f32 %v956_v18, %v956_v18 }
 0x123   : > { %v510_v25 = vadd.f32 %v509_v24, %v951_v16  ;;  %v578_v26 = vadd.f32 %v577_v23, %v547_v21  ;;  %v552_v16 = vmul.f32 %v971_v36, %v971_v36 }
 0x125   : > { %v579_v27 = vadd.f32 %v578_v26, %v548_v60  ;;  %v511_v2 = vadd.f32 %v510_v25, %v961_v22 }
 0x127   : > { %v512_v29 = vadd.f32 %v946_v11, %v511_v2  ;;  %v580_v30 = vadd.f32 %v579_v27, %v549_v28  ;;  %v554_v11 = vmul.f32 %v966_v31, %v966_v31 }
 0x129   : > { %v581_v32 = vadd.f32 %v580_v30, %v550_v58  ;;  %v513_v33 = vadd.f32 %v956_v18, %v512_v29  ;;  %v555_v18 = vmul.f32 %v976_v38, %v976_v38 }
 0x12b   : > { %v514_v34 = vadd.f32 %v513_v33, %v971_v36  ;;  %v582_v35 = vadd.f32 %v581_v32, %v551_v62 }
 0x12d   : > { %v583_v37 = vadd.f32 %v582_v35, %v552_v16  ;;  %v515_v22 = vadd.f32 %v514_v34, %v981_v42  ;;  %v557_v42 = vmul.f32 %v447_v1, %v447_v1 }
 0x12f   : > { %v516_v40 = vadd.f32 %v966_v31, %v515_v22  ;;  %v584_v41 = vadd.f32 %v583_v37, %v553_v39 }
 0x131   : > { %v585_v43 = vadd.f32 %v584_v41, %v554_v11  ;;  %v517_v36 = vadd.f32 %v976_v38, %v516_v40 }
 0x133   : > { %v518_v45 = vadd.f32 %v517_v36, %v444_v56  ;;  %v586_v46 = vadd.f32 %v585_v43, %v555_v18 }
 0x135   : > { %v587_v47 = vadd.f32 %v586_v46, %v556_v44  ;;  %v519_v48 = vadd.f32 %v518_v45, %v447_v1 }
 0x137   : > { %v520_v31 = vadd.f32 %v986_v51, %v519_v48  ;;  %v588_v50 = vadd.f32 %v587_v47, %v557_v42 }
 0x139   : > { %v521_v53 = vadd.f32 %v780_v59, %v520_v31  ;;  %v589_v54 = vadd.f32 %v588_v50, %v558_v49 }
 0x13b   : > { %v522_v55 = vrot.slane %v521_v53, 4  ;;  %v590_v57 = vadd.f32 %v589_v54, %v559_v52 }
 0x13d   : > { %v523_v38 = vadd.f32 %v522_v55, %v521_v53  ;;  %v591_v61 = vrot.slane %v590_v57, 4 }
 0x13f   : > { %v524_v56 = vrot.slane %v523_v38, 2  ;;  %v592_v63 = vadd.f32 %v591_v61, %v590_v57 }
 0x141   : > { %v525_v0 = vadd.f32 %v524_v56, %v523_v38  ;;  %v593_v3 = vrot.slane %v592_v63, 2 }
 0x143   : > { %v526_v1 = vrot.slane %v525_v0, 1  ;;  %v594_v4 = vadd.f32 %v593_v3, %v592_v63 }
 0x145   : > { %v595_v5 = vrot.slane %v594_v4, 1  ;;  %v527_v51 = vadd.f32 %v526_v1, %v525_v0 }
 0x147   : > { %v596_v6 = vadd.f32 %v595_v5, %v594_v4 }
 0x149   : > { %v598_v59 = vsel %vm597_vm0, %v527_v51, %v596_v6 }
 0x14a   : > { %v600_v7 = vsel %vm599_vm1, %v598_v59, 0.0 }
 0x14b   : > { %601 = vst [vmem:[%s184_s16] sm:$0xff] %v600_v7 }
 0x14c PF: > { %s14_s12 = sadd.s32 1, %s819_s12  }
 0x14d   : > { %p11_p5 = scmp.ge.s32.totalorder %s14_s12, 4  }
 0x14f   :  { %13 = sbr.rel (!%p11_p5) target bundleno = 1 (0x1), region = 70 }

// kernel: bottleneck_forward.8
= control target key start
LH: loop header
LB: loop body
LE: loop exit
PB: predicated region body
PF: predicated region fallthrough
CT: control target
= control target key end

     0   :  { %s1017_s18 = smov 0   ;;  %s1313_s0 = inlined_call_operand.vmem [shape: f32[512,128], index: 0, kind: input, shape index: {}]   ;;  %s1314_s1 = inlined_call_operand.vmem [shape: f32[1,128], index: 1, kind: input, shape index: {}]   ;;  %s1315_s2 = inlined_call_operand.vmem [shape: f32[1,128], index: 2, kind: input, shape index: {}]   ;;  %s1316_s3 = inlined_call_operand.vmem [shape: bf16[128,128], index: 3, kind: input, shape index: {}]   ;;  %s1317_s4 = inlined_call_operand.vmem [shape: f32[512,128], index: 4, kind: output, shape index: {0}]   ;;  %s1318_s5 = inlined_call_operand.vmem [shape: f32[2,8,128], index: 5, kind: output, shape index: {1}]  }
   0x1 LB: > { %s1023_s19 = sadd.s32 4294967295, %s985_s18   ;;  %p857_p0 = scmp.ge.s32.totalorder %s985_s18, 1  ;;  %s985_s18 = sphi %s1017_s18, %s16_s18  }
   0x2   : > { %p191_p1 = scmp.lt.s32.totalorder %s985_s18, 3 }
   0x4   : > { %p192_p2 = pnand %p857_p0, %p191_p1 }
   0x5   : > { %v971_v0 = vld [vmem:[%s1316_s3] sm:$0xff] (!%p192_p2)   ;;  %s858_s22 = sshll.u32 (!%p192_p2), %s1023_s19, 5  ;;  %v972_v1 = vld [vmem:[%s1316_s3 + $0x8] sm:$0xff] (!%p192_p2)   ;;  %v973_v2 = vld [vmem:[%s1316_s3 + $0x10] sm:$0xff] (!%p192_p2)   ;;  %p235_p4 = scmp.lt.s32.totalorder (!%p192_p2), %s1023_s19, 1  ;;  %vm761_vm0 = vcmask (!%p192_p2), 1040384  }
   0x6   : > { %195 = sbr.rel (%p192_p2) target bundleno = 332 (0x14c), region = 36  ;;  %p224_p3 = scmp.lt.s32.totalorder (!%p192_p2), %s858_s22, 63  ;;  %899 = vmatprep.subr.bf16.mxu0 (!%p192_p2), %v971_v0  ;;  %947 = vmatprep.subr.bf16.mxu1 (!%p192_p2), %v971_v0  ;;  %v974_v3 = vld [vmem:[%s1316_s3 + $0x18] sm:$0xff] (!%p192_p2)   ;;  %v1055_v6 = vld [vmem:[%s1314_s1] ss:$0 sm:$0xff] (!%p192_p2)  ;;  %v976_v27 = vld [vmem:[%s1316_s3 + $0x28] sm:$0xff] (!%p192_p2)  }
   0x7   : > { %900 = vmatpush3.bf16.msra.mxu0 (!%p192_p2), %v971_v0  ;;  %955 = vmatpush3.bf16.msra.mxu1 (!%p192_p2), %v971_v0  ;;  %v1062_v9 = vld [vmem:[%s1315_s2] ss:$0 sm:$0xff] (!%p192_p2)  ;;  %v977_v35 = vld [vmem:[%s1316_s3 + $0x30] sm:$0xff] (!%p192_p2)   ;;  %v978_v52 = vld [vmem:[%s1316_s3 + $0x38] sm:$0xff] (!%p192_p2)   ;;  %vm763_vm1 = vcmask (!%p192_p2), 1041408  }
   0x8   : > { %901 = vmatprep.subr.bf16.mxu0 (!%p192_p2), %v972_v1  ;;  %948 = vmatprep.subr.bf16.mxu1 (!%p192_p2), %v972_v1  ;;  %v975_v17 = vld [vmem:[%s1316_s3 + $0x20] sm:$0xff] (!%p192_p2)  }
   0xb   : > { %902 = vmatpush3.bf16.msra.mxu0 (!%p192_p2), %v972_v1  ;;  %956 = vmatpush3.bf16.msra.mxu1 (!%p192_p2), %v972_v1 }
   0xc   : > { %903 = vmatprep.subr.bf16.mxu0 (!%p192_p2), %v973_v2  ;;  %949 = vmatprep.subr.bf16.mxu1 (!%p192_p2), %v973_v2 }
   0xd   : > { %s1320_s22 = smov (!%p224_p3, %s858_s22), 63  ;;  %s1322_s19 = smov (!%p235_p4, %s1023_s19), 1 }
   0xe   : > { %s859_s27 = sshll.u32 %s1320_s22, 3  ;;  %s862_s22 = sshll.u32 %s1322_s19, 3 }
   0xf   : > { %s1045_s30 = scalar_lea.vmem %s1313_s0, %s859_s27  ;;  %904 = vmatpush3.bf16.msra.mxu0 %v973_v2  ;;  %957 = vmatpush3.bf16.msra.mxu1 %v973_v2  ;;  %s1193_s25 = scalar_lea.vmem %s1317_s4, %s859_s27 }
  0x10   : > { %v240_v4 = vld [vmem:[%s1045_s30] sm:$0xff]  ;;  %v241_v5 = vld [vmem:[%s1045_s30 + $0x8] sm:$0xff]  ;;  %v242_v10 = vld [vmem:[%s1045_s30 + $0x10] sm:$0xff]  ;;  %905 = vmatprep.subr.bf16.mxu0 %v974_v3  ;;  %950 = vmatprep.subr.bf16.mxu1 %v974_v3  ;;  %s238_s28 = scalar_lea.vmem %s1318_s5, %s862_s22 }
  0x11   : > { %v279_v7 = vmul.f32 %v1055_v6, %v240_v4  ;;  %v280_v8 = vmul.f32 %v1055_v6, %v241_v5  ;;  %v243_v11 = vld [vmem:[%s1045_s30 + $0x18] sm:$0xff]  ;;  %v281_v12 = vmul.f32 %v1055_v6, %v242_v10  ;;  %v244_v16 = vld [vmem:[%s1045_s30 + $0x20] sm:$0xff]  ;;  %v245_v20 = vld [vmem:[%s1045_s30 + $0x28] sm:$0xff] }
  0x12   : > { %v282_v15 = vmul.f32 %v1055_v6, %v243_v11  ;;  %v283_v21 = vmul.f32 %v1055_v6, %v244_v16  ;;  %v246_v22 = vld [vmem:[%s1045_s30 + $0x30] sm:$0xff]  ;;  %v247_v26 = vld [vmem:[%s1045_s30 + $0x38] sm:$0xff]  ;;  %v284_v28 = vmul.f32 %v1055_v6, %v245_v20  ;;  %v256_v31 = vld [vmem:[%s1045_s30 + $0x80] sm:$0xff] }
  0x13   : > { %v318_v13 = vadd.f32 %v1062_v9, %v279_v7  ;;  %v319_v14 = vadd.f32 %v1062_v9, %v280_v8  ;;  %906 = vmatpush3.bf16.msra.mxu0 %v974_v3  ;;  %v320_v24 = vadd.f32 %v1062_v9, %v281_v12  ;;  %958 = vmatpush3.bf16.msra.mxu1 %v974_v3  ;;  %v248_v37 = vld [vmem:[%s1045_s30 + $0x40] sm:$0xff]  ;;  %v257_v38 = vld [vmem:[%s1045_s30 + $0x88] sm:$0xff]  ;;  %v258_v42 = vld [vmem:[%s1045_s30 + $0x90] sm:$0xff] }
  0x14   : > { %v321_v25 = vadd.f32 %v1062_v9, %v282_v15  ;;  %907 = vmatprep.subr.bf16.mxu0 %v975_v17  ;;  %951 = vmatprep.subr.bf16.mxu1 %v975_v17  ;;  %v285_v29 = vmul.f32 %v1055_v6, %v246_v22  ;;  %v286_v30 = vmul.f32 %v1055_v6, %v247_v26  ;;  %v249_v40 = vld [vmem:[%s1045_s30 + $0x48] sm:$0xff]  ;;  %v259_v44 = vld [vmem:[%s1045_s30 + $0x98] sm:$0xff]  ;;  %v260_v45 = vld [vmem:[%s1045_s30 + $0xa0] sm:$0xff] }
  0x15   : > { %v350_v18 = vmax.f32 %v318_v13, 0.0  ;;  %v351_v19 = vmax.f32 %v319_v14, 0.0  ;;  %v352_v32 = vmax.f32 %v320_v24, 0.0  ;;  %v1088_v34 = vadd.f32 %v1062_v9, %v283_v21  ;;  %v261_v50 = vld [vmem:[%s1045_s30 + $0xa8] sm:$0xff]  ;;  %v262_v51 = vld [vmem:[%s1045_s30 + $0xb0] sm:$0xff]  ;;  %v263_v61 = vld [vmem:[%s1045_s30 + $0xb8] sm:$0xff] }
  0x16   : > { %v353_v33 = vmax.f32 %v321_v25, 0.0  ;;  %v1094_v36 = vadd.f32 %v1062_v9, %v284_v28  ;;  %v1099_v39 = vadd.f32 %v1062_v9, %v285_v29  ;;  %v295_v41 = vmul.f32 %v1055_v6, %v256_v31  ;;  %v264_v2 = vld [vmem:[%s1045_s30 + $0xc0] sm:$0xff]  ;;  %v265_v8 = vld [vmem:[%s1045_s30 + $0xc8] sm:$0xff]  ;;  %v250_v14 = vld [vmem:[%s1045_s30 + $0x50] sm:$0xff] }
  0x17   : > { %v382_v23 = vpack.c.bf16 %v351_v19, %v350_v18  ;;  %908 = vmatpush3.bf16.msra.mxu0 %v975_v17  ;;  %959 = vmatpush3.bf16.msra.mxu1 %v975_v17  ;;  %v1105_v43 = vadd.f32 %v1062_v9, %v286_v30  ;;  %v354_v47 = vmax.f32 %v1088_v34, 0.0  ;;  %v287_v48 = vmul.f32 %v1055_v6, %v248_v37  ;;  %v251_v15 = vld [vmem:[%s1045_s30 + $0x58] sm:$0xff]  ;;  %v252_v20 = vld [vmem:[%s1045_s30 + $0x60] sm:$0xff]  ;;  %v253_v21 = vld [vmem:[%s1045_s30 + $0x68] sm:$0xff] }
  0x18   : > { %909 = vmatprep.subr.bf16.mxu0 %v976_v27  ;;  %952 = vmatprep.subr.bf16.mxu1 %v976_v27  ;;  %v1109_v46 = vpack.c.bf16 %v353_v33, %v352_v32  ;;  %v296_v49 = vmul.f32 %v1055_v6, %v257_v38  ;;  %v355_v53 = vmax.f32 %v1094_v36, 0.0  ;;  %v288_v54 = vmul.f32 %v1055_v6, %v249_v40  ;;  %v266_v30 = vld [vmem:[%s1045_s30 + $0xd0] sm:$0xff]  ;;  %v267_v31 = vld [vmem:[%s1045_s30 + $0xd8] sm:$0xff]  ;;  %v268_v36 = vld [vmem:[%s1045_s30 + $0xe0] sm:$0xff] }
  0x19   : > { %915 = vmatprep.mubr.bf16.mxu0 %v382_v23  ;;  %v334_v55 = vadd.f32 %v1062_v9, %v295_v41  ;;  %v297_v56 = vmul.f32 %v1055_v6, %v258_v42  ;;  %v356_v57 = vmax.f32 %v1099_v39, 0.0  ;;  %v298_v59 = vmul.f32 %v1055_v6, %v259_v44  ;;  %v269_v37 = vld [vmem:[%s1045_s30 + $0xe8] sm:$0xff] }
  0x1a   : > { %v335_v58 = vadd.f32 %v1062_v9, %v296_v49  ;;  %v299_v60 = vmul.f32 %v1055_v6, %v260_v45  ;;  %v300_v0 = vmul.f32 %v1055_v6, %v261_v50  ;;  %v301_v1 = vmul.f32 %v1055_v6, %v262_v51 }
  0x1b   : > { %910 = vmatpush3.bf16.msra.mxu0 %v976_v27  ;;  %960 = vmatpush3.bf16.msra.mxu1 %v976_v27  ;;  %v366_v62 = vmax.f32 %v334_v55, 0.0  ;;  %v336_v63 = vadd.f32 %v1062_v9, %v297_v56  ;;  %v1133_v3 = vadd.f32 %v1062_v9, %v287_v48  ;;  %v337_v5 = vadd.f32 %v1062_v9, %v298_v59  ;;  %v254_v56 = vld [vmem:[%s1045_s30 + $0x70] sm:$0xff] }
  0x1c   : > { %911 = vmatprep.subr.bf16.mxu0 %v977_v35  ;;  %953 = vmatprep.subr.bf16.mxu1 %v977_v35  ;;  %v367_v4 = vmax.f32 %v335_v58, 0.0  ;;  %v338_v7 = vadd.f32 %v1062_v9, %v299_v60  ;;  %v327_v10 = vadd.f32 %v1062_v9, %v288_v54  ;;  %v339_v12 = vadd.f32 %v1062_v9, %v300_v0  ;;  %v255_v58 = vld [vmem:[%s1045_s30 + $0x78] sm:$0xff]  ;;  %v270_v0 = vld [vmem:[%s1045_s30 + $0xf0] sm:$0xff] }
  0x1d   : > { %v368_v11 = vmax.f32 %v336_v63, 0.0  ;;  %v302_v13 = vmul.f32 %v1055_v6, %v263_v61  ;;  %v369_v17 = vmax.f32 %v337_v5, 0.0  ;;  %v303_v19 = vmul.f32 %v1055_v6, %v264_v2 }
  0x1e   : > { %v390_v16 = vpack.c.bf16 %v367_v4, %v366_v62  ;;  %v370_v18 = vmax.f32 %v338_v7, 0.0  ;;  %v371_v22 = vmax.f32 %v339_v12, 0.0  ;;  %v340_v23 = vadd.f32 %v1062_v9, %v301_v1  ;;  %v271_v1 = vld [vmem:[%s1045_s30 + $0xf8] sm:$0xff] }
  0x1f   : > { %912 = vmatpush3.bf16.msra.mxu0 %v977_v35  ;;  %961 = vmatpush3.bf16.msra.mxu1 %v977_v35  ;;  %v341_v24 = vadd.f32 %v1062_v9, %v302_v13  ;;  %v304_v25 = vmul.f32 %v1055_v6, %v265_v8  ;;  %v384_v26 = vpack.c.bf16 %v355_v53, %v354_v47  ;;  %v357_v27 = vmax.f32 %v1105_v43, 0.0 }
  0x20   : > { %913 = vmatprep.subr.bf16.mxu0 %v978_v52  ;;  %954 = vmatprep.subr.bf16.mxu1 %v978_v52  ;;  %v391_v28 = vpack.c.bf16 %v369_v17, %v368_v11  ;;  %v342_v29 = vadd.f32 %v1062_v9, %v303_v19  ;;  %v289_v32 = vmul.f32 %v1055_v6, %v250_v14  ;;  %v358_v38 = vmax.f32 %v1133_v3, 0.0 }
  0x21   : > { %v290_v33 = vmul.f32 %v1055_v6, %v251_v15  ;;  %931 = vmatprep.mubr.bf16.mxu1 %v390_v16  ;;  %v392_v34 = vpack.c.bf16 %v371_v22, %v370_v18  ;;  %v343_v35 = vadd.f32 %v1062_v9, %v304_v25  ;;  %v359_v40 = vmax.f32 %v327_v10, 0.0 }
  0x22   : > { %v291_v41 = vmul.f32 %v1055_v6, %v252_v20  ;;  %v292_v42 = vmul.f32 %v1055_v6, %v253_v21  ;;  %v372_v43 = vmax.f32 %v340_v23, 0.0  ;;  %v373_v44 = vmax.f32 %v341_v24, 0.0 }
  0x23   : > { %914 = vmatpush3.bf16.msra.mxu0 %v978_v52  ;;  %962 = vmatpush3.bf16.msra.mxu1 %v978_v52  ;;  %v305_v45 = vmul.f32 %v1055_v6, %v266_v30  ;;  %v306_v47 = vmul.f32 %v1055_v6, %v267_v31  ;;  %v374_v48 = vmax.f32 %v342_v29, 0.0  ;;  %v375_v49 = vmax.f32 %v343_v35, 0.0 }
  0x24   : > { %v307_v50 = vmul.f32 %v1055_v6, %v268_v36  ;;  %v308_v51 = vmul.f32 %v1055_v6, %v269_v37  ;;  %v328_v52 = vadd.f32 %v1062_v9, %v289_v32  ;;  %v329_v53 = vadd.f32 %v1062_v9, %v290_v33 }
  0x25   : > { %v330_v54 = vadd.f32 %v1062_v9, %v291_v41  ;;  %v331_v55 = vadd.f32 %v1062_v9, %v292_v42  ;;  %v393_v59 = vpack.c.bf16 %v373_v44, %v372_v43  ;;  %v344_v60 = vadd.f32 %v1062_v9, %v305_v45 }
  0x26   : > { %916 = vmatmul.mubr.bf16.vlgmr.msra.gmra.mrb[0].mxu0 %v1109_v46  ;;  %932 = vmatmul.mubr.bf16.vlgmr.msra.gmra.mrb[0].mxu1 %v391_v28  ;;  %v385_v46 = vpack.c.bf16 %v357_v27, %v356_v57  ;;  %v345_v61 = vadd.f32 %v1062_v9, %v306_v47  ;;  %v386_v62 = vpack.c.bf16 %v359_v40, %v358_v38  ;;  %v360_v2 = vmax.f32 %v328_v52, 0.0 }
  0x27   : > { %919 = vmatprep.mubr.bf16.mxu0 %v384_v26  ;;  %935 = vmatprep.mubr.bf16.mxu1 %v392_v34  ;;  %v394_v63 = vpack.c.bf16 %v375_v49, %v374_v48  ;;  %v346_v39 = vadd.f32 %v1062_v9, %v307_v50  ;;  %v347_v57 = vadd.f32 %v1062_v9, %v308_v51  ;;  %v361_v3 = vmax.f32 %v329_v53, 0.0 }
  0x28   : > { %v293_v4 = vmul.f32 %v1055_v6, %v254_v56  ;;  %v294_v5 = vmul.f32 %v1055_v6, %v255_v58  ;;  %v376_v7 = vmax.f32 %v344_v60, 0.0  ;;  %v377_v8 = vmax.f32 %v345_v61, 0.0 }
  0x29   : > { %v309_v10 = vmul.f32 %v1055_v6, %v270_v0  ;;  %v310_v11 = vmul.f32 %v1055_v6, %v271_v1  ;;  %v362_v12 = vmax.f32 %v330_v54, 0.0  ;;  %v363_v13 = vmax.f32 %v331_v55, 0.0 }
  0x2a   : > { %v378_v14 = vmax.f32 %v346_v39, 0.0  ;;  %v379_v15 = vmax.f32 %v347_v57, 0.0  ;;  %v387_v16 = vpack.c.bf16 %v361_v3, %v360_v2  ;;  %v332_v17 = vadd.f32 %v1062_v9, %v293_v4 }
  0x2b   : > { %v333_v18 = vadd.f32 %v1062_v9, %v294_v5  ;;  %v395_v19 = vpack.c.bf16 %v377_v8, %v376_v7  ;;  %v348_v20 = vadd.f32 %v1062_v9, %v309_v10  ;;  %v349_v21 = vadd.f32 %v1062_v9, %v310_v11 }
  0x2c   : > { %v388_v22 = vpack.c.bf16 %v363_v13, %v362_v12  ;;  %v396_v23 = vpack.c.bf16 %v379_v15, %v378_v14  ;;  %v364_v6 = vmax.f32 %v332_v17, 0.0 }
  0x2d   : > { %v365_v24 = vmax.f32 %v333_v18, 0.0  ;;  %v380_v25 = vmax.f32 %v348_v20, 0.0  ;;  %v381_v26 = vmax.f32 %v349_v21, 0.0 }
  0x2e   : > { %920 = vmatmul.mubr.bf16.gmra.mrb[4].mxu0 %v385_v46  ;;  %936 = vmatmul.mubr.bf16.gmra.mrb[4].mxu1 %v393_v59 }
  0x2f   : > { %923 = vmatprep.mubr.bf16.mxu0 %v386_v62  ;;  %939 = vmatprep.mubr.bf16.mxu1 %v394_v63  ;;  %v389_v27 = vpack.c.bf16 %v365_v24, %v364_v6  ;;  %v397_v28 = vpack.c.bf16 %v381_v26, %v380_v25 }
  0x36   : > { %924 = vmatmul.mubr.bf16.gmra.mrb[8].mxu0 %v387_v16  ;;  %940 = vmatmul.mubr.bf16.gmra.mrb[8].mxu1 %v395_v19 }
  0x37   : > { %927 = vmatprep.mubr.bf16.mxu0 %v388_v22  ;;  %943 = vmatprep.mubr.bf16.mxu1 %v396_v23 }
  0x3e   : > { %928 = vmatmul.mubr.bf16.gmra.mrb[12].mxu0 %v389_v27  ;;  %944 = vmatmul.mubr.bf16.gmra.mrb[12].mxu1 %v397_v28 }
  0xf9   : > { %v917_v9 = vpop.f32.mrb[0].mxu0  ;;  %v1195_v29 = vpop.f32.mrb[0].mxu1 }
  0xfa   : > { %625 = vst [vmem:[%s1193_s25 + $0x10] sm:$0xff] %v917_v9  ;;  %v496_v30 = vpop.f32.mrb[1].mxu0  ;;  %641 = vst [vmem:[%s1193_s25 + $0x90] sm:$0xff] %v1195_v29  ;;  %v1200_v31 = vpop.f32.mrb[1].mxu1  ;;  %v694_v40 = vmul.f32 %v917_v9, %v917_v9 }
  0xfb   : > { %623 = vst [vmem:[%s1193_s25] sm:$0xff] %v496_v30  ;;  %v918_v32 = vpop.f32.mrb[2].mxu0  ;;  %639 = vst [vmem:[%s1193_s25 + $0x80] sm:$0xff] %v1200_v31  ;;  %v1205_v33 = vpop.f32.mrb[2].mxu1  ;;  %v692_v36 = vmul.f32 %v496_v30, %v496_v30 }
  0xfc   : > { %626 = vst [vmem:[%s1193_s25 + $0x18] sm:$0xff] %v918_v32  ;;  %v499_v34 = vpop.f32.mrb[3].mxu0  ;;  %642 = vst [vmem:[%s1193_s25 + $0x98] sm:$0xff] %v1205_v33  ;;  %v1210_v35 = vpop.f32.mrb[3].mxu1  ;;  %v695_v43 = vmul.f32 %v918_v32, %v918_v32 }
  0xfd   : > { %624 = vst [vmem:[%s1193_s25 + $0x8] sm:$0xff] %v499_v34  ;;  %v655_v37 = vadd.f32 %v499_v34, %v496_v30  ;;  %v693_v38 = vmul.f32 %v499_v34, %v499_v34  ;;  %640 = vst [vmem:[%s1193_s25 + $0x88] sm:$0xff] %v1210_v35 }
  0xff   : > { %v656_v41 = vadd.f32 %v917_v9, %v655_v37  ;;  %v724_v42 = vadd.f32 %v693_v38, %v692_v36 }
 0x101   : > { %v725_v44 = vadd.f32 %v724_v42, %v694_v40  ;;  %v921_v45 = vpop.f32.mrb[4].mxu0  ;;  %v657_v47 = vadd.f32 %v918_v32, %v656_v41  ;;  %v1215_v48 = vpop.f32.mrb[4].mxu1 }
 0x102   : > { %629 = vst [vmem:[%s1193_s25 + $0x30] sm:$0xff] %v921_v45  ;;  %v512_v49 = vpop.f32.mrb[5].mxu0  ;;  %645 = vst [vmem:[%s1193_s25 + $0xb0] sm:$0xff] %v1215_v48  ;;  %v1220_v50 = vpop.f32.mrb[5].mxu1  ;;  %v698_v61 = vmul.f32 %v921_v45, %v921_v45 }
 0x103   : > { %627 = vst [vmem:[%s1193_s25 + $0x20] sm:$0xff] %v512_v49  ;;  %v658_v51 = vadd.f32 %v657_v47, %v512_v49  ;;  %v696_v46 = vmul.f32 %v512_v49, %v512_v49  ;;  %v726_v52 = vadd.f32 %v725_v44, %v695_v43  ;;  %v922_v53 = vpop.f32.mrb[6].mxu0  ;;  %643 = vst [vmem:[%s1193_s25 + $0xa0] sm:$0xff] %v1220_v50  ;;  %v1225_v54 = vpop.f32.mrb[6].mxu1 }
 0x104   : > { %630 = vst [vmem:[%s1193_s25 + $0x38] sm:$0xff] %v922_v53  ;;  %v515_v55 = vpop.f32.mrb[7].mxu0  ;;  %646 = vst [vmem:[%s1193_s25 + $0xb8] sm:$0xff] %v1225_v54  ;;  %v1230_v56 = vpop.f32.mrb[7].mxu1  ;;  %v699_v39 = vmul.f32 %v922_v53, %v922_v53  ;;  %v708_v47 = vmul.f32 %v1200_v31, %v1200_v31 }
 0x105   : > { %v727_v58 = vadd.f32 %v726_v52, %v696_v46  ;;  %628 = vst [vmem:[%s1193_s25 + $0x28] sm:$0xff] %v515_v55  ;;  %v659_v59 = vadd.f32 %v658_v51, %v515_v55  ;;  %v697_v60 = vmul.f32 %v515_v55, %v515_v55  ;;  %644 = vst [vmem:[%s1193_s25 + $0xa8] sm:$0xff] %v1230_v56 }
 0x106   : > { %v710_v55 = vmul.f32 %v1195_v29, %v1195_v29 }
 0x107   : > { %v660_v62 = vadd.f32 %v921_v45, %v659_v59  ;;  %v728_v63 = vadd.f32 %v727_v58, %v697_v60  ;;  %v711_v60 = vmul.f32 %v1205_v33, %v1205_v33 }
 0x109   : > { %v729_v57 = vadd.f32 %v728_v63, %v698_v61  ;;  %v925_v0 = vpop.f32.mrb[8].mxu0  ;;  %v661_v1 = vadd.f32 %v922_v53, %v660_v62  ;;  %v1235_v2 = vpop.f32.mrb[8].mxu1  ;;  %v709_v53 = vmul.f32 %v1210_v35, %v1210_v35 }
 0x10a   : > { %633 = vst [vmem:[%s1193_s25 + $0x50] sm:$0xff] %v925_v0  ;;  %v528_v3 = vpop.f32.mrb[9].mxu0  ;;  %649 = vst [vmem:[%s1193_s25 + $0xd0] sm:$0xff] %v1235_v2  ;;  %v1240_v4 = vpop.f32.mrb[9].mxu1  ;;  %v702_v17 = vmul.f32 %v925_v0, %v925_v0 }
 0x10b   : > { %631 = vst [vmem:[%s1193_s25 + $0x40] sm:$0xff] %v528_v3  ;;  %v662_v5 = vadd.f32 %v661_v1, %v528_v3  ;;  %v700_v7 = vmul.f32 %v528_v3, %v528_v3  ;;  %v730_v8 = vadd.f32 %v729_v57, %v699_v39  ;;  %v926_v10 = vpop.f32.mrb[10].mxu0  ;;  %647 = vst [vmem:[%s1193_s25 + $0xc0] sm:$0xff] %v1240_v4  ;;  %v1245_v11 = vpop.f32.mrb[10].mxu1 }
 0x10c   : > { %634 = vst [vmem:[%s1193_s25 + $0x58] sm:$0xff] %v926_v10  ;;  %v531_v12 = vpop.f32.mrb[11].mxu0  ;;  %650 = vst [vmem:[%s1193_s25 + $0xd8] sm:$0xff] %v1245_v11  ;;  %v1250_v13 = vpop.f32.mrb[11].mxu1  ;;  %v703_v20 = vmul.f32 %v926_v10, %v926_v10 }
 0x10d   : > { %v731_v14 = vadd.f32 %v730_v8, %v700_v7  ;;  %632 = vst [vmem:[%s1193_s25 + $0x48] sm:$0xff] %v531_v12  ;;  %v663_v15 = vadd.f32 %v662_v5, %v531_v12  ;;  %v701_v16 = vmul.f32 %v531_v12, %v531_v12  ;;  %648 = vst [vmem:[%s1193_s25 + $0xc8] sm:$0xff] %v1250_v13 }
 0x10f   : > { %v664_v18 = vadd.f32 %v925_v0, %v663_v15  ;;  %v732_v19 = vadd.f32 %v731_v14, %v701_v16  ;;  %v713_v0 = vmul.f32 %v1230_v56, %v1230_v56  ;;  %v717_v14 = vmul.f32 %v1250_v13, %v1250_v13 }
 0x111   : > { %v733_v21 = vadd.f32 %v732_v19, %v702_v17  ;;  %v929_v22 = vpop.f32.mrb[12].mxu0  ;;  %v665_v23 = vadd.f32 %v926_v10, %v664_v18  ;;  %v1255_v6 = vpop.f32.mrb[12].mxu1 }
 0x112   : > { %637 = vst [vmem:[%s1193_s25 + $0x70] sm:$0xff] %v929_v22  ;;  %v544_v24 = vpop.f32.mrb[13].mxu0  ;;  %653 = vst [vmem:[%s1193_s25 + $0xf0] sm:$0xff] %v1255_v6  ;;  %v608_v25 = vpop.f32.mrb[13].mxu1  ;;  %v706_v40 = vmul.f32 %v929_v22, %v929_v22 }
 0x113   : > { %635 = vst [vmem:[%s1193_s25 + $0x60] sm:$0xff] %v544_v24  ;;  %v666_v26 = vadd.f32 %v665_v23, %v544_v24  ;;  %v704_v27 = vmul.f32 %v544_v24, %v544_v24  ;;  %v734_v28 = vadd.f32 %v733_v21, %v703_v20  ;;  %v930_v9 = vpop.f32.mrb[14].mxu0  ;;  %651 = vst [vmem:[%s1193_s25 + $0xe0] sm:$0xff] %v608_v25  ;;  %v946_v30 = vpop.f32.mrb[14].mxu1 }
 0x114   : > { %638 = vst [vmem:[%s1193_s25 + $0x78] sm:$0xff] %v930_v9  ;;  %v547_v32 = vpop.f32.mrb[15].mxu0  ;;  %654 = vst [vmem:[%s1193_s25 + $0xf8] sm:$0xff] %v946_v30  ;;  %v611_v34 = vpop.f32.mrb[15].mxu1  ;;  %v707_v43 = vmul.f32 %v930_v9, %v930_v9  ;;  %v720_v18 = vmul.f32 %v608_v25, %v608_v25  ;;  %v722_v23 = vmul.f32 %v1255_v6, %v1255_v6 }
 0x115   : > { %v735_v36 = vadd.f32 %v734_v28, %v704_v27  ;;  %636 = vst [vmem:[%s1193_s25 + $0x68] sm:$0xff] %v547_v32  ;;  %v667_v37 = vadd.f32 %v666_v26, %v547_v32  ;;  %v705_v38 = vmul.f32 %v547_v32, %v547_v32  ;;  %652 = vst [vmem:[%s1193_s25 + $0xe8] sm:$0xff] %v611_v34 }
 0x116   : > { %v723_v26 = vmul.f32 %v946_v30, %v946_v30 }
 0x117   : > { %v668_v41 = vadd.f32 %v929_v22, %v667_v37  ;;  %v736_v42 = vadd.f32 %v735_v36, %v705_v38 }
 0x119   : > { %v737_v44 = vadd.f32 %v736_v42, %v706_v40  ;;  %v669_v45 = vadd.f32 %v930_v9, %v668_v41 }
 0x11b   : > { %v670_v49 = vadd.f32 %v669_v45, %v1200_v31  ;;  %v738_v51 = vadd.f32 %v737_v44, %v707_v43  ;;  %v712_v31 = vmul.f32 %v1220_v50, %v1220_v50 }
 0x11d   : > { %v739_v46 = vadd.f32 %v738_v51, %v708_v47  ;;  %v671_v52 = vadd.f32 %v670_v49, %v1210_v35 }
 0x11f   : > { %v672_v58 = vadd.f32 %v1195_v29, %v671_v52  ;;  %v740_v59 = vadd.f32 %v739_v46, %v709_v53  ;;  %v714_v29 = vmul.f32 %v1215_v48, %v1215_v48 }
 0x121   : > { %v741_v61 = vadd.f32 %v740_v59, %v710_v55  ;;  %v673_v62 = vadd.f32 %v1205_v33, %v672_v58  ;;  %v715_v33 = vmul.f32 %v1225_v54, %v1225_v54 }
 0x123   : > { %v674_v63 = vadd.f32 %v673_v62, %v1220_v50  ;;  %v742_v39 = vadd.f32 %v741_v61, %v711_v60  ;;  %v716_v50 = vmul.f32 %v1240_v4, %v1240_v4 }
 0x125   : > { %v743_v57 = vadd.f32 %v742_v39, %v712_v31  ;;  %v675_v35 = vadd.f32 %v674_v63, %v1230_v56 }
 0x127   : > { %v676_v1 = vadd.f32 %v1215_v48, %v675_v35  ;;  %v744_v3 = vadd.f32 %v743_v57, %v713_v0  ;;  %v718_v48 = vmul.f32 %v1235_v2, %v1235_v2 }
 0x129   : > { %v745_v5 = vadd.f32 %v744_v3, %v714_v29  ;;  %v677_v7 = vadd.f32 %v1225_v54, %v676_v1  ;;  %v719_v54 = vmul.f32 %v1245_v11, %v1245_v11 }
 0x12b   : > { %v678_v8 = vadd.f32 %v677_v7, %v1240_v4  ;;  %v746_v10 = vadd.f32 %v745_v5, %v715_v33 }
 0x12d   : > { %v747_v12 = vadd.f32 %v746_v10, %v716_v50  ;;  %v679_v56 = vadd.f32 %v678_v8, %v1250_v13  ;;  %v721_v13 = vmul.f32 %v611_v34, %v611_v34 }
 0x12f   : > { %v680_v15 = vadd.f32 %v1235_v2, %v679_v56  ;;  %v748_v16 = vadd.f32 %v747_v12, %v717_v14 }
 0x131   : > { %v749_v17 = vadd.f32 %v748_v16, %v718_v48  ;;  %v681_v4 = vadd.f32 %v1245_v11, %v680_v15 }
 0x133   : > { %v682_v19 = vadd.f32 %v681_v4, %v608_v25  ;;  %v750_v20 = vadd.f32 %v749_v17, %v719_v54 }
 0x135   : > { %v751_v21 = vadd.f32 %v750_v20, %v720_v18  ;;  %v683_v22 = vadd.f32 %v682_v19, %v611_v34 }
 0x137   : > { %v684_v2 = vadd.f32 %v1255_v6, %v683_v22  ;;  %v752_v24 = vadd.f32 %v751_v21, %v721_v13 }
 0x139   : > { %v685_v27 = vadd.f32 %v946_v30, %v684_v2  ;;  %v753_v28 = vadd.f32 %v752_v24, %v722_v23 }
 0x13b   : > { %v686_v9 = vrot.slane %v685_v27, 4  ;;  %v754_v32 = vadd.f32 %v753_v28, %v723_v26 }
 0x13d   : > { %v687_v11 = vadd.f32 %v686_v9, %v685_v27  ;;  %v755_v36 = vrot.slane %v754_v32, 4 }
 0x13f   : > { %v688_v25 = vrot.slane %v687_v11, 2  ;;  %v756_v37 = vadd.f32 %v755_v36, %v754_v32 }
 0x141   : > { %v689_v38 = vadd.f32 %v688_v25, %v687_v11  ;;  %v757_v40 = vrot.slane %v756_v37, 2 }
 0x143   : > { %v690_v34 = vrot.slane %v689_v38, 1  ;;  %v758_v41 = vadd.f32 %v757_v40, %v756_v37 }
 0x145   : > { %v759_v42 = vrot.slane %v758_v41, 1  ;;  %v691_v6 = vadd.f32 %v690_v34, %v689_v38 }
 0x147   : > { %v760_v43 = vadd.f32 %v759_v42, %v758_v41 }
 0x149   : > { %v762_v30 = vsel %vm761_vm0, %v691_v6, %v760_v43 }
 0x14a   : > { %v764_v44 = vsel %vm763_vm1, %v762_v30, 0.0 }
 0x14b   : > { %765 = vst [vmem:[%s238_s28] sm:$0xff] %v764_v44 }
 0x14c PF: > { %s16_s18 = sadd.s32 1, %s985_s18  }
 0x14d   : > { %p13_p5 = scmp.ge.s32.totalorder %s16_s18, 4  }
 0x14f   :  { %15 = sbr.rel (!%p13_p5) target bundleno = 1 (0x1), region = 78 }

// kernel: bottleneck_forward.7
= control target key start
LH: loop header
LB: loop body
LE: loop exit
PB: predicated region body
PF: predicated region fallthrough
CT: control target
= control target key end

     0   :  { %s2596_s18 = smov 0   ;;  %s2598_s19 = smov 0   ;;  %s3100_s0 = inlined_call_operand.vmem [shape: f32[2,18,18,128], index: 0, kind: input, shape index: {}, may-alias: {0,1,2}]   ;;  %s3101_s1 = inlined_call_operand.vmem [shape: f32[2,18,18,128], index: 1, kind: input, shape index: {}, may-alias: {0,1,2}]   ;;  %s3102_s2 = inlined_call_operand.vmem [shape: f32[2,18,18,128], index: 2, kind: input, shape index: {}, may-alias: {0,1,2}]   ;;  %s3103_s3 = inlined_call_operand.vmem [shape: bf16[9,128,128], index: 3, kind: input, shape index: {}]   ;;  %s3104_s4 = inlined_call_operand.vmem [shape: f32[2,16,16,128], index: 4, kind: output, shape index: {0}]   ;;  %s3105_s5 = inlined_call_operand.vmem [shape: f32[16,8,128], index: 5, kind: output, shape index: {1}]  }
   0x1   :  { %s2600_s20 = smov 0   ;;  %s2602_s21 = smov 0  }
   0x2   :  { %s2604_s22 = smov 0   ;;  %s2606_s23 = smov 0  }
   0x3   :  { %s2608_s24 = smov 0  }
   0x4 LB: > { %s2632_s25 = sadd.s32 4294967295, %s2564_s24   ;;  %s2635_s26 = sadd.s32 1, %s2564_s24   ;;  %s2564_s24 = sphi %s2608_s24, %s3116_s24   ;;  %s2560_s23 = sphi %s2606_s23, %s3115_s23   ;;  %s2556_s22 = sphi %s2604_s22, %s3114_s22   ;;  %s2552_s21 = sphi %s2602_s21, %s3113_s21   ;;  %s2548_s20 = sphi %s2600_s20, %s3112_s20   ;;  %s2544_s19 = sphi %s2598_s19, %s3111_s19   ;;  %s2540_s18 = sphi %s2596_s18, %s3110_s18  }
   0x5   : > { %s20_s27 = ssub.s32 %s2564_s24, %s2635_s26  ;;  %s23_s28 = sadd.s32 1, %s2560_s23 }
   0x6   : > { %p21_p0 = scmp.eq.s32.totalorder %s20_s27, 0  ;;  %p30_p1 = scmp.ne.s32.totalorder %s2560_s23, %s2556_s22 }
   0x7   : > { %p31_p2 = scmp.eq.s32.totalorder %s2564_s24, 0  ;;  %s47_s29 = sadd.s32 1, %s2635_s26 }
   0x8   : > { %s2645_s30 = scalar_select %p21_p0, %s2560_s23, %s23_s28  }
   0x9   : > { %p2652_p3 = por %p31_p2, %p30_p1  ;;  %s48_s7 = ssub.s32 %s2635_s26, %s47_s29 }
   0xa   : > { %p49_p4 = scmp.eq.s32.totalorder %s48_s7, 0  ;;  %s51_s8 = sadd.s32 1, %s2552_s21 }
   0xb   : > { %p58_p5 = scmp.ne.s32.totalorder %s2552_s21, %s2548_s20  ;;  %s74_s9 = sadd.s32 2, %s2564_s24 }
   0xc   : > { %s2662_s10 = scalar_select %p49_p4, %s2552_s21, %s51_s8  }
   0xd   : > { %p2666_p6 = por %p58_p5, %p31_p2  ;;  %s75_s12 = sadd.s32 2, %s2635_s26 }
   0xe   : > { %s76_s13 = ssub.s32 %s74_s9, %s75_s12  ;;  %s79_s14 = sadd.s32 1, %s2544_s19 }
   0xf   : > { %p77_p7 = scmp.eq.s32.totalorder %s76_s13, 0  ;;  %p86_p8 = scmp.ne.s32.totalorder %s2544_s19, %s2540_s18 }
  0x10   : > { %p137_p9 = scmp.eq.s32.totalorder %s2632_s25, 15  ;;  %p1850_p12 = scmp.ge.s32.totalorder %s2564_s24, 16 }
  0x11   : > { %s2676_s15 = scalar_select %p77_p7, %s2544_s19, %s79_s14  }
  0x12   : > { %p2680_p10 = por %p86_p8, %p31_p2  ;;  %p2687_p11 = por %p137_p9, %p30_p1 }
  0x13   : > { %188 = sbr.rel (%p1850_p12) target bundleno = 50 (0x32), region = 20 }
  0x1a   : > { %191 = sbr.rel (!%p2652_p3) target bundleno = 34 (0x22), region = 24  ;;  %s193_s27 = sand.u32 (%p2652_p3), 1, %s2560_s23  }
  0x1b   : > { %s2376_s28 = smul.u32 (%p2652_p3), 24, %s2564_s24 }
  0x1c   : > { %s2375_s29 = smul.u32 (%p2652_p3), 48, %s193_s27 }
  0x1d   : > { %s198_s9 = scalar_lea.vmem (%p2652_p3), %s3100_s0, %s2376_s28 }
  0x1e   : > { %v236_v0 = vld [vmem:[%s198_s9] sm:$0xff] (%p2652_p3)  ;;  %v238_v1 = vld [vmem:[%s198_s9 + $0x8] sm:$0xff] (%p2652_p3)  ;;  %v240_v2 = vld [vmem:[%s198_s9 + $0x10] sm:$0xff] (%p2652_p3)  ;;  %s195_s12 = scalar_lea.vmem (%p2652_p3), [#allocation2], %s2375_s29 }
  0x1f   : > { %237 = vst [vmem:[%s195_s12] sm:$0xff] (%p2652_p3), %v236_v0  ;;  %239 = vst [vmem:[%s195_s12 + $0x8] sm:$0xff] (%p2652_p3), %v238_v1  ;;  %v242_v3 = vld [vmem:[%s198_s9 + $0x1b0] sm:$0xff] (%p2652_p3)  ;;  %v244_v4 = vld [vmem:[%s198_s9 + $0x1b8] sm:$0xff] (%p2652_p3) }
  0x20   : > { %241 = vst [vmem:[%s195_s12 + $0x10] sm:$0xff] (%p2652_p3), %v240_v2  ;;  %v246_v5 = vld [vmem:[%s198_s9 + $0x1c0] sm:$0xff] (%p2652_p3)  ;;  %243 = vst [vmem:[%s195_s12 + $0x18] sm:$0xff] (%p2652_p3), %v242_v3 }
  0x21   : > { %245 = vst [vmem:[%s195_s12 + $0x20] sm:$0xff] %v244_v4  ;;  %247 = vst [vmem:[%s195_s12 + $0x28] sm:$0xff] %v246_v5 }
  0x22 PF: > { %253 = sbr.rel (!%p2666_p6) target bundleno = 42 (0x2a), region = 62  ;;  %s255_s6 = sand.u32 (%p2666_p6), 1, %s2552_s21  }
  0x23   : > { %s1754_s13 = smul.u32 (%p2666_p6), 24, %s2564_s24 }
  0x24   : > { %s2377_s14 = smul.u32 (%p2666_p6), 48, %s255_s6 }
  0x25   : > { %s1755_s29 = scalar_lea.vmem (%p2666_p6), %s3101_s1, %s1754_s13 }
  0x26   : > { %v1852_v6 = vld [vmem:[%s1755_s29 + $0x18] sm:$0xff] (%p2666_p6)  ;;  %v1853_v7 = vld [vmem:[%s1755_s29 + $0x20] sm:$0xff] (%p2666_p6)  ;;  %v1854_v8 = vld [vmem:[%s1755_s29 + $0x28] sm:$0xff] (%p2666_p6)  ;;  %s257_s7 = scalar_lea.vmem (%p2666_p6), [#allocation3], %s2377_s14 }
  0x27   : > { %300 = vst [vmem:[%s257_s7] sm:$0xff] (%p2666_p6), %v1852_v6  ;;  %302 = vst [vmem:[%s257_s7 + $0x8] sm:$0xff] (%p2666_p6), %v1853_v7  ;;  %v1855_v9 = vld [vmem:[%s1755_s29 + $0x1c8] sm:$0xff] (%p2666_p6)  ;;  %v1856_v10 = vld [vmem:[%s1755_s29 + $0x1d0] sm:$0xff] (%p2666_p6) }
  0x28   : > { %304 = vst [vmem:[%s257_s7 + $0x10] sm:$0xff] (%p2666_p6), %v1854_v8  ;;  %v1857_v11 = vld [vmem:[%s1755_s29 + $0x1d8] sm:$0xff] (%p2666_p6)  ;;  %306 = vst [vmem:[%s257_s7 + $0x18] sm:$0xff] (%p2666_p6), %v1855_v9 }
  0x29   : > { %308 = vst [vmem:[%s257_s7 + $0x20] sm:$0xff] %v1856_v10  ;;  %310 = vst [vmem:[%s257_s7 + $0x28] sm:$0xff] %v1857_v11 }
  0x2a PF: > { %316 = sbr.rel (!%p2680_p10) target bundleno = 50 (0x32), region = 100  ;;  %s318_s11 = sand.u32 (%p2680_p10), 1, %s2544_s19  }
  0x2b   : > { %s1759_s8 = smul.u32 (%p2680_p10), 24, %s2564_s24 }
  0x2c   : > { %s2378_s9 = smul.u32 (%p2680_p10), 48, %s318_s11 }
  0x2d   : > { %s1760_s13 = scalar_lea.vmem (%p2680_p10), %s3102_s2, %s1759_s8 }
  0x2e   : > { %v1858_v12 = vld [vmem:[%s1760_s13 + $0x30] sm:$0xff] (%p2680_p10)  ;;  %v1859_v13 = vld [vmem:[%s1760_s13 + $0x38] sm:$0xff] (%p2680_p10)  ;;  %v1860_v14 = vld [vmem:[%s1760_s13 + $0x40] sm:$0xff] (%p2680_p10)  ;;  %s320_s14 = scalar_lea.vmem (%p2680_p10), [#allocation4], %s2378_s9 }
  0x2f   : > { %363 = vst [vmem:[%s320_s14] sm:$0xff] (%p2680_p10), %v1858_v12  ;;  %365 = vst [vmem:[%s320_s14 + $0x8] sm:$0xff] (%p2680_p10), %v1859_v13  ;;  %v1861_v15 = vld [vmem:[%s1760_s13 + $0x1e0] sm:$0xff] (%p2680_p10)  ;;  %v1862_v16 = vld [vmem:[%s1760_s13 + $0x1e8] sm:$0xff] (%p2680_p10) }
  0x30   : > { %367 = vst [vmem:[%s320_s14 + $0x10] sm:$0xff] (%p2680_p10), %v1860_v14  ;;  %v1863_v17 = vld [vmem:[%s1760_s13 + $0x1f0] sm:$0xff] (%p2680_p10)  ;;  %369 = vst [vmem:[%s320_s14 + $0x18] sm:$0xff] (%p2680_p10), %v1861_v15 }
  0x31   : > { %371 = vst [vmem:[%s320_s14 + $0x20] sm:$0xff] %v1862_v16  ;;  %373 = vst [vmem:[%s320_s14 + $0x28] sm:$0xff] %v1863_v17 }
  0x32 PF: > { %p1864_p13 = scmp.ge.s32.totalorder %s2564_s24, 1  ;;  %p378_p0 = scmp.lt.s32.totalorder %s2564_s24, 17 }
  0x34   : > { %p379_p1 = pnand %p1864_p13, %p378_p0 }
  0x35   : > { %v2438_v18 = vld [vmem:[%s3103_s3 + $0x40] sm:$0xff] (!%p379_p1)   ;;  %v2440_v20 = vld [vmem:[%s3103_s3 + $0x48] sm:$0xff] (!%p379_p1)   ;;  %v2442_v22 = vld [vmem:[%s3103_s3 + $0x50] sm:$0xff] (!%p379_p1)   ;;  %s385_s14 = sand.u32 (!%p379_p1), 1, %s2556_s22   ;;  %s392_s28 = sand.u32 (!%p379_p1), 1, %s2548_s20   ;;  %vm474_vm0 = vcmask (!%p379_p1), 1046528  }
  0x36   : > { %382 = sbr.rel (%p379_p1) target bundleno = 455 (0x1c7), region = 138  ;;  %v2439_v19 = vld [vmem:[%s3103_s3 + $0x100] sm:$0xff] (!%p379_p1)   ;;  %2163 = vmatprep.subr.bf16.mxu1 (!%p379_p1), %v2438_v18  ;;  %v2441_v21 = vld [vmem:[%s3103_s3 + $0x108] sm:$0xff] (!%p379_p1)   ;;  %v2443_v23 = vld [vmem:[%s3103_s3 + $0x110] sm:$0xff] (!%p379_p1)   ;;  %vm702_vm1 = vcmask (!%p379_p1), 1045504   ;;  %s399_s6 = sand.u32 (!%p379_p1), 1, %s2540_s18  }
  0x37   : > { %2243 = vmatprep.subr.bf16.mxu0 (!%p379_p1), %v2439_v19  ;;  %2164 = vmatpush3.bf16.msra.mxu1 (!%p379_p1), %v2438_v18  ;;  %v2444_v24 = vld [vmem:[%s3103_s3 + $0x58] sm:$0xff] (!%p379_p1)   ;;  %s2379_s11 = smul.u32 (!%p379_p1), 48, %s385_s14  ;;  %v2446_v26 = vld [vmem:[%s3103_s3 + $0x60] sm:$0xff] (!%p379_p1)   ;;  %v2448_v28 = vld [vmem:[%s3103_s3 + $0x68] sm:$0xff] (!%p379_p1)   ;;  %s1865_s8 = sshll.u32 (!%p379_p1), %s385_s14, 5  ;;  %vm1663_vm2 = vcmask (!%p379_p1), 1040384  }
  0x38   : > { %2244 = vmatpush3.bf16.msra.mxu0 (!%p379_p1), %v2439_v19  ;;  %2165 = vmatprep.subr.bf16.mxu1 (!%p379_p1), %v2440_v20  ;;  %v2445_v25 = vld [vmem:[%s3103_s3 + $0x118] sm:$0xff] (!%p379_p1)   ;;  %s2380_s24 = smul.u32 (!%p379_p1), 48, %s392_s28  ;;  %v2447_v27 = vld [vmem:[%s3103_s3 + $0x120] sm:$0xff] (!%p379_p1)   ;;  %v2449_v32 = vld [vmem:[%s3103_s3 + $0x128] sm:$0xff] (!%p379_p1)   ;;  %p439_p2 = scmp.lt.s32.totalorder (!%p379_p1), %s2632_s25, 15  ;;  %vm1665_vm3 = vcmask (!%p379_p1), 1041408  }
  0x39   : > { %2245 = vmatprep.subr.bf16.mxu0 (!%p379_p1), %v2441_v21  ;;  %s387_s16 = scalar_lea.vmem (!%p379_p1), [#allocation2], %s2379_s11  ;;  %v2450_v42 = vld [vmem:[%s3103_s3 + $0x70] sm:$0xff] (!%p379_p1)   ;;  %v2452_v60 = vld [vmem:[%s3103_s3 + $0x78] sm:$0xff] (!%p379_p1)   ;;  %v2454_v6 = vld [vmem:[%s3103_s3] sm:$0xff] (!%p379_p1)   ;;  %s2381_s28 = smul.u32 (!%p379_p1), 48, %s399_s6 }
  0x3a   : > { %v2752_v29 = vld [vmem:[%s387_s16] sm:$0xff] (!%p379_p1)  ;;  %v2754_v30 = vld [vmem:[%s387_s16 + $0x8] sm:$0xff] (!%p379_p1)  ;;  %v2756_v31 = vld [vmem:[%s387_s16 + $0x10] sm:$0x3] (!%p379_p1)  ;;  %s394_s29 = scalar_lea.vmem (!%p379_p1), [#allocation3], %s2380_s24  ;;  %s3057_s24 = scalar_lea.vmem (!%p379_p1), [#allocation5], %s1865_s8 }
  0x3b   : > { %2166 = vmatpush3.bf16.msra.mxu1 (!%p379_p1), %v2440_v20  ;;  %v475_v33 = vrot.slane (!%p379_p1), %v2752_v29, 1  ;;  %v476_v34 = vrot.slane (!%p379_p1), %v2754_v30, 1  ;;  %v478_v35 = vrot.slane (!%p379_p1), %v2756_v31, 1  ;;  %v2764_v36 = vld [vmem:[%s394_s29] sm:$0xff] (!%p379_p1)  ;;  %v2768_v39 = vld [vmem:[%s394_s29 + $0x8] sm:$0xff] (!%p379_p1)  ;;  %v2778_v47 = vld [vmem:[%s387_s16 + $0x18] sm:$0xff] (!%p379_p1) }
  0x3c   : > { %2246 = vmatpush3.bf16.msra.mxu0 (!%p379_p1), %v2441_v21  ;;  %2167 = vmatprep.subr.bf16.mxu1 (!%p379_p1), %v2442_v22  ;;  %v839_v40 = vld [vmem:[%s394_s29 + $0x10] sm:$0x3] (!%p379_p1)  ;;  %v969_v41 = vrot.slane (!%p379_p1), %v2764_v36, 1  ;;  %v970_v45 = vrot.slane (!%p379_p1), %v2768_v39, 1  ;;  %v2780_v48 = vld [vmem:[%s387_s16 + $0x20] sm:$0xff] (!%p379_p1)  ;;  %v480_v52 = vrot.slane (!%p379_p1), %v2778_v47, 1  ;;  %v843_v9 = vpack.c.bf16 (!%p379_p1), %v2768_v39, %v2764_v36 }
  0x3d   : > { %2247 = vmatprep.subr.bf16.mxu0 %v2443_v23  ;;  %v477_v37 = vsel %vm474_vm0, %v475_v33, %v476_v34  ;;  %v479_v38 = vsel %vm474_vm0, %v476_v34, %v478_v35  ;;  %v2451_v43 = vld [vmem:[%s3103_s3 + $0x130] sm:$0xff]   ;;  %v972_v46 = vrot.slane %v839_v40, 1  ;;  %v449_v49 = vld [vmem:[%s387_s16 + $0x28] sm:$0x3]  ;;  %v2785_v53 = vld [vmem:[%s394_s29 + $0x18] sm:$0xff]  ;;  %v481_v57 = vrot.slane %v2780_v48, 1 }
  0x3e   : > { %v489_v44 = vpack.c.bf16 %v479_v38, %v477_v37  ;;  %v971_v50 = vsel %vm474_vm0, %v969_v41, %v970_v45  ;;  %v2787_v54 = vld [vmem:[%s394_s29 + $0x20] sm:$0xff]  ;;  %v2789_v55 = vld [vmem:[%s394_s29 + $0x28] sm:$0x3]  ;;  %v483_v58 = vrot.slane %v449_v49, 1  ;;  %v974_v59 = vrot.slane %v2785_v53, 1  ;;  %s2892_s6 = scalar_lea.vmem [#allocation4], %s2381_s28 }
  0x3f   : > { %2168 = vmatpush3.bf16.msra.mxu1 %v2442_v22  ;;  %v973_v51 = vsel %vm474_vm0, %v970_v45, %v972_v46  ;;  %v2453_v61 = vld [vmem:[%s3103_s3 + $0x138] sm:$0xff]   ;;  %v975_v62 = vrot.slane %v2787_v54, 1  ;;  %v977_v63 = vrot.slane %v2789_v55, 1  ;;  %v1106_v0 = vrot.slane %v839_v40, 2  ;;  %v2455_v11 = vld [vmem:[%s3103_s3 + $0x140] sm:$0xff]   ;;  %v2456_v18 = vld [vmem:[%s3103_s3 + $0x8] sm:$0xff]  }
  0x40   : > { %2248 = vmatpush3.bf16.msra.mxu0 %v2443_v23  ;;  %2169 = vmatprep.subr.bf16.mxu1 %v2444_v24  ;;  %v983_v56 = vpack.c.bf16 %v973_v51, %v971_v50  ;;  %v1103_v1 = vrot.slane %v2764_v36, 2  ;;  %v482_v2 = vsel %vm474_vm0, %v480_v52, %v481_v57  ;;  %v484_v3 = vsel %vm474_vm0, %v481_v57, %v483_v58  ;;  %v2457_v21 = vld [vmem:[%s3103_s3 + $0x148] sm:$0xff]   ;;  %v2463_v33 = vld [vmem:[%s3103_s3 + $0x160] sm:$0xff]   ;;  %v2466_v37 = vld [vmem:[%s3103_s3 + $0x30] sm:$0xff]   ;;  %s440_s22 = scalar_select %p439_p2, %s2632_s25, 15 }
  0x41   : > { %2249 = vmatprep.subr.bf16.mxu0 %v2445_v25  ;;  %2179 = vmatprep.mubr.bf16.mxu1 %v489_v44  ;;  %v976_v4 = vsel %vm474_vm0, %v974_v59, %v975_v62  ;;  %v1104_v5 = vrot.slane %v2768_v39, 2  ;;  %v711_v7 = vrot.slane %v449_v49, 2  ;;  %v978_v8 = vsel %vm474_vm0, %v975_v62, %v977_v63  ;;  %v2464_v34 = vld [vmem:[%s3103_s3 + $0x28] sm:$0xff]   ;;  %v2467_v38 = vld [vmem:[%s3103_s3 + $0x170] sm:$0xff]   ;;  %v2468_v41 = vld [vmem:[%s3103_s3 + $0x38] sm:$0xff]   ;;  %s2072_s13 = sshll.u32 (%p2687_p11), %s2632_s25, 4 }
  0x42   : > { %2259 = vmatprep.mubr.bf16.mxu0 %v983_v56  ;;  %v844_v10 = vpack.c.bf16 %v2787_v54, %v2785_v53  ;;  %v708_v12 = vrot.slane %v2778_v47, 2  ;;  %v490_v13 = vpack.c.bf16 %v484_v3, %v482_v2  ;;  %v709_v14 = vrot.slane %v2780_v48, 2  ;;  %v2465_v35 = vld [vmem:[%s3103_s3 + $0x168] sm:$0xff]   ;;  %v2469_v45 = vld [vmem:[%s3103_s3 + $0x178] sm:$0xff]   ;;  %v2470_v50 = vld [vmem:[%s3103_s3 + $0x80] sm:$0xff]   ;;  %s1866_s14 = sshll.u32 %s440_s22, 3  ;;  %s1681_s28 = scalar_lea.vmem (%p2687_p11), %s3104_s4, %s2072_s13 }
  0x43   : > { %2170 = vmatpush3.bf16.msra.mxu1 %v2444_v24  ;;  %v984_v15 = vpack.c.bf16 %v978_v8, %v976_v4  ;;  %v1105_v16 = vsel %vm702_vm1, %v1103_v1, %v1104_v5  ;;  %v1107_v17 = vsel %vm702_vm1, %v1104_v5, %v1106_v0  ;;  %v450_v22 = vpack.c.bf16 %v2754_v30, %v2752_v29  ;;  %v2471_v52 = vld [vmem:[%s3103_s3 + $0x180] sm:$0xff]   ;;  %v2898_v58 = vld [vmem:[%s2892_s6 + $0x8] sm:$0xff]  ;;  %v2475_v62 = vld [vmem:[%s3103_s3 + $0x190] sm:$0xff]   ;;  %s442_s20 = scalar_lea.vmem %s3105_s5, %s1866_s14 }
  0x44   : > { %2250 = vmatpush3.bf16.msra.mxu0 %v2445_v25  ;;  %2171 = vmatprep.subr.bf16.mxu1 %v2446_v26  ;;  %v2825_v19 = vsel %vm702_vm1, %v708_v12, %v709_v14  ;;  %v2828_v20 = vsel %vm702_vm1, %v709_v14, %v711_v7  ;;  %v1117_v24 = vpack.c.bf16 %v1107_v17, %v1105_v16  ;;  %v2458_v25 = vld [vmem:[%s3103_s3 + $0x10] sm:$0xff]   ;;  %v1111_v40 = vrot.slane %v2789_v55, 2  ;;  %v2476_v63 = vld [vmem:[%s3103_s3 + $0x98] sm:$0xff]   ;;  %v2478_v1 = vld [vmem:[%s3103_s3 + $0xa0] sm:$0xff]  }
  0x45   : > { %2251 = vmatprep.subr.bf16.mxu0 %v2447_v27  ;;  %v718_v23 = vpack.c.bf16 %v2828_v20, %v2825_v19  ;;  %v706_v44 = vrot.slane %v2756_v31, 2  ;;  %v703_v46 = vrot.slane %v2752_v29, 2  ;;  %v704_v49 = vrot.slane %v2754_v30, 2  ;;  %v2895_v56 = vld [vmem:[%s2892_s6] sm:$0xff]  ;;  %v2477_v0 = vld [vmem:[%s3103_s3 + $0x198] sm:$0xff]   ;;  %v2480_v3 = vld [vmem:[%s3103_s3 + $0xa8] sm:$0xff]  }
  0x46   : > { %v451_v29 = vpack.c.bf16 %v2780_v48, %v2778_v47  ;;  %v2472_v47 = vld [vmem:[%s3103_s3 + $0x88] sm:$0xff]   ;;  %v2479_v2 = vld [vmem:[%s3103_s3 + $0x1a0] sm:$0xff]   ;;  %v2482_v5 = vld [vmem:[%s3103_s3 + $0xb0] sm:$0xff]   ;;  %v1369_v12 = vrot.slane %v2895_v56, 1 }
  0x47   : > { %2172 = vmatpush3.bf16.msra.mxu1 %v2446_v26  ;;  %v2459_v26 = vld [vmem:[%s3103_s3 + $0x150] sm:$0xff]   ;;  %v705_v30 = vsel %vm702_vm1, %v703_v46, %v704_v49  ;;  %v707_v55 = vsel %vm702_vm1, %v704_v49, %v706_v44  ;;  %v2473_v48 = vld [vmem:[%s3103_s3 + $0x188] sm:$0xff]   ;;  %v2484_v7 = vld [vmem:[%s3103_s3 + $0xb8] sm:$0xff]  }
  0x48   : > { %2252 = vmatpush3.bf16.msra.mxu0 %v2447_v27  ;;  %2173 = vmatprep.subr.bf16.mxu1 %v2448_v28  ;;  %v2460_v27 = vld [vmem:[%s3103_s3 + $0x18] sm:$0xff]   ;;  %v717_v59 = vpack.c.bf16 %v707_v55, %v705_v30  ;;  %v2481_v4 = vld [vmem:[%s3103_s3 + $0x1a8] sm:$0xff]   ;;  %v2942_v8 = vld [vmem:[%s2892_s6 + $0x10] sm:$0x3] }
  0x49   : > { %2253 = vmatprep.subr.bf16.mxu0 %v2449_v32  ;;  %v1372_v14 = vrot.slane %v2942_v8, 1  ;;  %v2954_v16 = vld [vmem:[%s2892_s6 + $0x18] sm:$0xff]  ;;  %v2957_v17 = vld [vmem:[%s2892_s6 + $0x20] sm:$0xff] }
  0x4a   : > { %v2492_v19 = vld [vmem:[%s3103_s3 + $0xd8] sm:$0xff]   ;;  %v2494_v36 = vld [vmem:[%s3103_s3 + $0xe0] sm:$0xff]   ;;  %v2503_v30 = vld [vmem:[%s3103_s3 + $0x208] sm:$0xff]  }
  0x4b   : > { %2174 = vmatpush3.bf16.msra.mxu1 %v2448_v28  ;;  %v2461_v28 = vld [vmem:[%s3103_s3 + $0x158] sm:$0xff]   ;;  %v2495_v39 = vld [vmem:[%s3103_s3 + $0x1e0] sm:$0xff]   ;;  %v2504_v55 = vld [vmem:[%s3103_s3 + $0x210] sm:$0xff]  }
  0x4c   : > { %2254 = vmatpush3.bf16.msra.mxu0 %v2449_v32  ;;  %2175 = vmatprep.subr.bf16.mxu1 %v2450_v42  ;;  %v2462_v32 = vld [vmem:[%s3103_s3 + $0x20] sm:$0xff]   ;;  %v2493_v20 = vld [vmem:[%s3103_s3 + $0x1d8] sm:$0xff]  }
  0x4d   : > { %2255 = vmatprep.subr.bf16.mxu0 %v2451_v43  ;;  %v2501_v44 = vld [vmem:[%s3103_s3 + $0x1f8] sm:$0xff]  }
  0x4f   : > { %2176 = vmatpush3.bf16.msra.mxu1 %v2450_v42  ;;  %v1108_v42 = vrot.slane %v2785_v53, 2  ;;  %v2506_v53 = vld [vmem:[%s3103_s3 + $0x220] sm:$0xff]  }
  0x50   : > { %2256 = vmatpush3.bf16.msra.mxu0 %v2451_v43  ;;  %2177 = vmatprep.subr.bf16.mxu1 %v2452_v60  ;;  %v1109_v43 = vrot.slane %v2787_v54, 2  ;;  %v2507_v54 = vld [vmem:[%s3103_s3 + $0x228] sm:$0xff]  }
  0x51   : > { %2257 = vmatprep.subr.bf16.mxu0 %v2453_v61 }
  0x52   : > { %v1110_v51 = vsel %vm702_vm1, %v1108_v42, %v1109_v43  ;;  %v1112_v31 = vsel %vm702_vm1, %v1109_v43, %v1111_v40  ;;  %v2500_v40 = vld [vmem:[%s3103_s3 + $0xf8] sm:$0xff]   ;;  %v1503_v42 = vrot.slane %v2895_v56, 2  ;;  %v1504_v43 = vrot.slane %v2898_v58, 2 }
  0x53   : > { %2178 = vmatpush3.bf16.msra.mxu1 %v2452_v60  ;;  %v1118_v57 = vpack.c.bf16 %v1112_v31, %v1110_v51  ;;  %v1243_v60 = vpack.c.bf16 %v2898_v58, %v2895_v56  ;;  %v2505_v56 = vld [vmem:[%s3103_s3 + $0x218] sm:$0xff]  }
  0x54   : > { %2258 = vmatpush3.bf16.msra.mxu0 %v2453_v61  ;;  %2183 = vmatprep.subr.bf16.mxu1 %v2454_v6  ;;  %v2474_v61 = vld [vmem:[%s3103_s3 + $0x90] sm:$0xff]   ;;  %v1505_v51 = vsel %vm702_vm1, %v1503_v42, %v1504_v43 }
  0x55   : > { %2263 = vmatprep.subr.bf16.mxu0 %v2455_v11 }
  0x56   : > { %2180 = vmatmul.mubr.bf16.vlgmr.msra.gmra.mrb[0].mxu1 %v490_v13  ;;  %v1370_v13 = vrot.slane %v2898_v58, 1  ;;  %v1509_v58 = vrot.slane %v2957_v17, 2 }
  0x57   : > { %2184 = vmatpush3.bf16.msra.mxu1 %v2454_v6  ;;  %2260 = vmatmul.mubr.bf16.vlgmr.msra.gmra.mrb[0].mxu0 %v984_v15  ;;  %v2483_v6 = vld [vmem:[%s3103_s3 + $0x1b0] sm:$0xff]   ;;  %v2486_v15 = vld [vmem:[%s3103_s3 + $0xc0] sm:$0xff]  }
  0x58   : > { %2264 = vmatpush3.bf16.msra.mxu0 %v2455_v11  ;;  %2185 = vmatprep.subr.bf16.mxu1 %v2456_v18  ;;  %v2485_v11 = vld [vmem:[%s3103_s3 + $0x1b8] sm:$0xff]  }
  0x59   : > { %2265 = vmatprep.subr.bf16.mxu0 %v2457_v21  ;;  %2199 = vmatprep.mubr.bf16.mxu1 %v450_v22  ;;  %v1371_v22 = vsel %vm474_vm0, %v1369_v12, %v1370_v13 }
  0x5a   : > { %2279 = vmatprep.mubr.bf16.mxu0 %v1117_v24  ;;  %v1373_v24 = vsel %vm474_vm0, %v1370_v13, %v1372_v14 }
  0x5b   : > { %2186 = vmatpush3.bf16.msra.mxu1 %v2456_v18  ;;  %v2487_v18 = vld [vmem:[%s3103_s3 + $0x1c0] sm:$0xff]  }
  0x5c   : > { %2266 = vmatpush3.bf16.msra.mxu0 %v2457_v21  ;;  %2187 = vmatprep.subr.bf16.mxu1 %v2458_v25  ;;  %v1244_v21 = vpack.c.bf16 %v2957_v17, %v2954_v16 }
  0x5d   : > { %2267 = vmatprep.subr.bf16.mxu0 %v2459_v26 }
  0x5f   : > { %2188 = vmatpush3.bf16.msra.mxu1 %v2458_v25  ;;  %v2488_v25 = vld [vmem:[%s3103_s3 + $0xc8] sm:$0xff]  }
  0x60   : > { %2268 = vmatpush3.bf16.msra.mxu0 %v2459_v26  ;;  %2189 = vmatprep.subr.bf16.mxu1 %v2460_v27  ;;  %v2489_v26 = vld [vmem:[%s3103_s3 + $0x1c8] sm:$0xff]  }
  0x61   : > { %2269 = vmatprep.subr.bf16.mxu0 %v2461_v28 }
  0x63   : > { %2190 = vmatpush3.bf16.msra.mxu1 %v2460_v27  ;;  %v1383_v27 = vpack.c.bf16 %v1373_v24, %v1371_v22 }
  0x64   : > { %2270 = vmatpush3.bf16.msra.mxu0 %v2461_v28  ;;  %2191 = vmatprep.subr.bf16.mxu1 %v2462_v32  ;;  %v2490_v28 = vld [vmem:[%s3103_s3 + $0xd0] sm:$0xff]  }
  0x65   : > { %2271 = vmatprep.subr.bf16.mxu0 %v2463_v33 }
  0x67   : > { %2192 = vmatpush3.bf16.msra.mxu1 %v2462_v32  ;;  %v2491_v32 = vld [vmem:[%s3103_s3 + $0x1d0] sm:$0xff]  }
  0x68   : > { %2272 = vmatpush3.bf16.msra.mxu0 %v2463_v33  ;;  %2193 = vmatprep.subr.bf16.mxu1 %v2464_v34  ;;  %v2498_v33 = vld [vmem:[%s3103_s3 + $0xf0] sm:$0xff]  }
  0x69   : > { %2273 = vmatprep.subr.bf16.mxu0 %v2465_v35 }
  0x6b   : > { %2194 = vmatpush3.bf16.msra.mxu1 %v2464_v34  ;;  %v2499_v34 = vld [vmem:[%s3103_s3 + $0x1f0] sm:$0xff]  }
  0x6c   : > { %2274 = vmatpush3.bf16.msra.mxu0 %v2465_v35  ;;  %2195 = vmatprep.subr.bf16.mxu1 %v2466_v37  ;;  %v1242_v35 = vld [vmem:[%s2892_s6 + $0x28] sm:$0x3] }
  0x6d   : > { %2275 = vmatprep.subr.bf16.mxu0 %v2467_v38 }
  0x6f   : > { %2196 = vmatpush3.bf16.msra.mxu1 %v2466_v37  ;;  %v1374_v37 = vrot.slane %v2954_v16, 1 }
  0x70   : > { %2276 = vmatpush3.bf16.msra.mxu0 %v2467_v38  ;;  %2197 = vmatprep.subr.bf16.mxu1 %v2468_v41  ;;  %v1375_v38 = vrot.slane %v2957_v17, 1 }
  0x71   : > { %2277 = vmatprep.subr.bf16.mxu0 %v2469_v45 }
  0x72   : > { %v1376_v46 = vsel %vm474_vm0, %v1374_v37, %v1375_v38 }
  0x73   : > { %2198 = vmatpush3.bf16.msra.mxu1 %v2468_v41  ;;  %v1377_v41 = vrot.slane %v1242_v35, 1 }
  0x74   : > { %2278 = vmatpush3.bf16.msra.mxu0 %v2469_v45  ;;  %2203 = vmatprep.subr.bf16.mxu1 %v2470_v50  ;;  %v1506_v45 = vrot.slane %v2942_v8, 2 }
  0x75   : > { %2283 = vmatprep.subr.bf16.mxu0 %v2471_v52  ;;  %v1378_v49 = vsel %vm474_vm0, %v1375_v38, %v1377_v41 }
  0x76   : > { %2200 = vmatmul.mubr.bf16.vlgmr.msra.gmra.mrb[0].mxu1 %v451_v29  ;;  %v1507_v31 = vsel %vm702_vm1, %v1504_v43, %v1506_v45 }
  0x77   : > { %2204 = vmatpush3.bf16.msra.mxu1 %v2470_v50  ;;  %2280 = vmatmul.mubr.bf16.vlgmr.msra.gmra.mrb[0].mxu0 %v1118_v57  ;;  %v2502_v50 = vld [vmem:[%s3103_s3 + $0x200] sm:$0xff]   ;;  %v1517_v29 = vpack.c.bf16 %v1507_v31, %v1505_v51  ;;  %v1508_v57 = vrot.slane %v2954_v16, 2 }
  0x78   : > { %2284 = vmatpush3.bf16.msra.mxu0 %v2471_v52  ;;  %2205 = vmatprep.subr.bf16.mxu1 %v2472_v47  ;;  %v1384_v52 = vpack.c.bf16 %v1378_v49, %v1376_v46 }
  0x79   : > { %2285 = vmatprep.subr.bf16.mxu0 %v2473_v48  ;;  %2219 = vmatprep.mubr.bf16.mxu1 %v717_v59  ;;  %v1510_v59 = vsel %vm702_vm1, %v1508_v57, %v1509_v58 }
  0x7a   : > { %2299 = vmatprep.mubr.bf16.mxu0 %v1243_v60 }
  0x7b   : > { %2206 = vmatpush3.bf16.msra.mxu1 %v2472_v47  ;;  %v1511_v47 = vrot.slane %v1242_v35, 2 }
  0x7c   : > { %2286 = vmatpush3.bf16.msra.mxu0 %v2473_v48  ;;  %2207 = vmatprep.subr.bf16.mxu1 %v2474_v61  ;;  %v2509_v48 = vld [vmem:[%s3103_s3 + $0x238] sm:$0xff]  }
  0x7d   : > { %2287 = vmatprep.subr.bf16.mxu0 %v2475_v62  ;;  %v1512_v60 = vsel %vm702_vm1, %v1509_v58, %v1511_v47 }
  0x7f   : > { %2208 = vmatpush3.bf16.msra.mxu1 %v2474_v61  ;;  %v1518_v61 = vpack.c.bf16 %v1512_v60, %v1510_v59 }
  0x80   : > { %2288 = vmatpush3.bf16.msra.mxu0 %v2475_v62  ;;  %2209 = vmatprep.subr.bf16.mxu1 %v2476_v63 }
  0x81   : > { %2289 = vmatprep.subr.bf16.mxu0 %v2477_v0 }
  0x83   : > { %2210 = vmatpush3.bf16.msra.mxu1 %v2476_v63 }
  0x84   : > { %2290 = vmatpush3.bf16.msra.mxu0 %v2477_v0  ;;  %2211 = vmatprep.subr.bf16.mxu1 %v2478_v1 }
  0x85   : > { %2291 = vmatprep.subr.bf16.mxu0 %v2479_v2 }
  0x87   : > { %2212 = vmatpush3.bf16.msra.mxu1 %v2478_v1 }
  0x88   : > { %2292 = vmatpush3.bf16.msra.mxu0 %v2479_v2  ;;  %2213 = vmatprep.subr.bf16.mxu1 %v2480_v3 }
  0x89   : > { %2293 = vmatprep.subr.bf16.mxu0 %v2481_v4 }
  0x8b   : > { %2214 = vmatpush3.bf16.msra.mxu1 %v2480_v3 }
  0x8c   : > { %2294 = vmatpush3.bf16.msra.mxu0 %v2481_v4  ;;  %2215 = vmatprep.subr.bf16.mxu1 %v2482_v5 }
  0x8d   : > { %2295 = vmatprep.subr.bf16.mxu0 %v2483_v6 }
  0x8f   : > { %2216 = vmatpush3.bf16.msra.mxu1 %v2482_v5 }
  0x90   : > { %2296 = vmatpush3.bf16.msra.mxu0 %v2483_v6  ;;  %2217 = vmatprep.subr.bf16.mxu1 %v2484_v7 }
  0x91   : > { %2297 = vmatprep.subr.bf16.mxu0 %v2485_v11 }
  0x93   : > { %2218 = vmatpush3.bf16.msra.mxu1 %v2484_v7 }
  0x94   : > { %2298 = vmatpush3.bf16.msra.mxu0 %v2485_v11  ;;  %2223 = vmatprep.subr.bf16.mxu1 %v2486_v15 }
  0x95   : > { %2303 = vmatprep.subr.bf16.mxu0 %v2487_v18 }
  0x96   : > { %2220 = vmatmul.mubr.bf16.vlgmr.msra.gmra.mrb[0].mxu1 %v718_v23  ;;  %v2497_v23 = vld [vmem:[%s3103_s3 + $0x1e8] sm:$0xff]  }
  0x97   : > { %2224 = vmatpush3.bf16.msra.mxu1 %v2486_v15  ;;  %2300 = vmatmul.mubr.bf16.vlgmr.msra.gmra.mrb[0].mxu0 %v1244_v21 }
  0x98   : > { %2304 = vmatpush3.bf16.msra.mxu0 %v2487_v18  ;;  %2225 = vmatprep.subr.bf16.mxu1 %v2488_v25 }
  0x99   : > { %2305 = vmatprep.subr.bf16.mxu0 %v2489_v26  ;;  %2239 = vmatprep.mubr.bf16.mxu1 %v843_v9  ;;  %v2496_v9 = vld [vmem:[%s3103_s3 + $0xe8] sm:$0xff]  }
  0x9a   : > { %2319 = vmatprep.mubr.bf16.mxu0 %v1383_v27 }
  0x9b   : > { %2226 = vmatpush3.bf16.msra.mxu1 %v2488_v25 }
  0x9c   : > { %2306 = vmatpush3.bf16.msra.mxu0 %v2489_v26  ;;  %2227 = vmatprep.subr.bf16.mxu1 %v2490_v28 }
  0x9d   : > { %2307 = vmatprep.subr.bf16.mxu0 %v2491_v32 }
  0x9f   : > { %2228 = vmatpush3.bf16.msra.mxu1 %v2490_v28 }
  0xa0   : > { %2308 = vmatpush3.bf16.msra.mxu0 %v2491_v32  ;;  %2229 = vmatprep.subr.bf16.mxu1 %v2492_v19 }
  0xa1   : > { %2309 = vmatprep.subr.bf16.mxu0 %v2493_v20 }
  0xa3   : > { %2230 = vmatpush3.bf16.msra.mxu1 %v2492_v19 }
  0xa4   : > { %2310 = vmatpush3.bf16.msra.mxu0 %v2493_v20  ;;  %2231 = vmatprep.subr.bf16.mxu1 %v2494_v36 }
  0xa5   : > { %2311 = vmatprep.subr.bf16.mxu0 %v2495_v39 }
  0xa7   : > { %2232 = vmatpush3.bf16.msra.mxu1 %v2494_v36 }
  0xa8   : > { %2312 = vmatpush3.bf16.msra.mxu0 %v2495_v39  ;;  %2233 = vmatprep.subr.bf16.mxu1 %v2496_v9 }
  0xa9   : > { %2313 = vmatprep.subr.bf16.mxu0 %v2497_v23 }
  0xab   : > { %2234 = vmatpush3.bf16.msra.mxu1 %v2496_v9 }
  0xac   : > { %2314 = vmatpush3.bf16.msra.mxu0 %v2497_v23  ;;  %2235 = vmatprep.subr.bf16.mxu1 %v2498_v33 }
  0xad   : > { %2315 = vmatprep.subr.bf16.mxu0 %v2499_v34 }
  0xaf   : > { %2236 = vmatpush3.bf16.msra.mxu1 %v2498_v33 }
  0xb0   : > { %2316 = vmatpush3.bf16.msra.mxu0 %v2499_v34  ;;  %2237 = vmatprep.subr.bf16.mxu1 %v2500_v40 }
  0xb1   : > { %2317 = vmatprep.subr.bf16.mxu0 %v2501_v44 }
  0xb3   : > { %2238 = vmatpush3.bf16.msra.mxu1 %v2500_v40 }
  0xb4   : > { %2318 = vmatpush3.bf16.msra.mxu0 %v2501_v44 }
  0xb5   : > { %2323 = vmatprep.subr.bf16.mxu0 %v2502_v50 }
  0xb6   : > { %2240 = vmatmul.mubr.bf16.vlgmr.msra.gmra.mrb[0].mxu1 %v844_v10  ;;  %v2508_v10 = vld [vmem:[%s3103_s3 + $0x230] sm:$0xff]  }
  0xb7   : > { %2320 = vmatmul.mubr.bf16.vlgmr.msra.gmra.mrb[0].mxu0 %v1384_v52 }
  0xb8   : > { %2324 = vmatpush3.bf16.msra.mxu0 %v2502_v50  ;;  %2339 = vmatprep.mubr.bf16.mxu0 %v1517_v29 }
  0xb9   : > { %2325 = vmatprep.subr.bf16.mxu0 %v2503_v30 }
  0xbc   : > { %2326 = vmatpush3.bf16.msra.mxu0 %v2503_v30 }
  0xbd   : > { %2327 = vmatprep.subr.bf16.mxu0 %v2504_v55 }
  0xc0   : > { %2328 = vmatpush3.bf16.msra.mxu0 %v2504_v55 }
  0xc1   : > { %2329 = vmatprep.subr.bf16.mxu0 %v2505_v56 }
  0xc4   : > { %2330 = vmatpush3.bf16.msra.mxu0 %v2505_v56 }
  0xc5   : > { %2331 = vmatprep.subr.bf16.mxu0 %v2506_v53 }
  0xc8   : > { %2332 = vmatpush3.bf16.msra.mxu0 %v2506_v53 }
  0xc9   : > { %2333 = vmatprep.subr.bf16.mxu0 %v2507_v54 }
  0xcc   : > { %2334 = vmatpush3.bf16.msra.mxu0 %v2507_v54 }
  0xcd   : > { %2335 = vmatprep.subr.bf16.mxu0 %v2508_v10 }
  0xd0   : > { %2336 = vmatpush3.bf16.msra.mxu0 %v2508_v10 }
  0xd1   : > { %2337 = vmatprep.subr.bf16.mxu0 %v2509_v48 }
  0xd4   : > { %2338 = vmatpush3.bf16.msra.mxu0 %v2509_v48 }
  0xd7   : > { %2340 = vmatmul.mubr.bf16.vlgmr.msra.gmra.mrb[0].mxu0 %v1518_v61 }
 0x189   : > { %v2241_v62 = vpop.f32.mrb[0].mxu1 }
 0x18a   : > { %v944_v63 = vpop.f32.mrb[1].mxu1 }
 0x18b   : > { %v2242_v0 = vpop.f32.mrb[2].mxu1 }
 0x18c   : > { %v947_v1 = vpop.f32.mrb[3].mxu1 }
 0x1aa   : > { %v2341_v2 = vpop.f32.mrb[0].mxu0 }
 0x1ab   : > { %v2343_v3 = vadd.f32 %v2341_v2, %v2241_v62  ;;  %v1618_v4 = vpop.f32.mrb[1].mxu0 }
 0x1ac   : > { %v2344_v5 = vadd.f32 %v1618_v4, %v944_v63  ;;  %v2342_v6 = vpop.f32.mrb[2].mxu0 }
 0x1ad   : > { %1639 = vst [vmem:[%s3057_s24 + $0x10] sm:$0xff] %v2343_v3  ;;  %v2345_v7 = vadd.f32 %v2342_v6, %v2242_v0  ;;  %v1621_v8 = vpop.f32.mrb[3].mxu0  ;;  %v1652_v15 = vmul.f32 %v2343_v3, %v2343_v3 }
 0x1ae   : > { %1637 = vst [vmem:[%s3057_s24] sm:$0xff] %v2344_v5  ;;  %v2346_v11 = vadd.f32 %v1621_v8, %v947_v1  ;;  %v1650_v12 = vmul.f32 %v2344_v5, %v2344_v5 }
 0x1af   : > { %1640 = vst [vmem:[%s3057_s24 + $0x18] sm:$0xff] %v2345_v7  ;;  %v1653_v18 = vmul.f32 %v2345_v7, %v2345_v7 }
 0x1b0   : > { %1638 = vst [vmem:[%s3057_s24 + $0x8] sm:$0xff] %v2346_v11  ;;  %v1641_v13 = vadd.f32 %v2346_v11, %v2344_v5  ;;  %v1651_v14 = vmul.f32 %v2346_v11, %v2346_v11 }
 0x1b2   : > { %v1642_v16 = vadd.f32 %v2343_v3, %v1641_v13  ;;  %v1654_v17 = vadd.f32 %v1651_v14, %v1650_v12 }
 0x1b4   : > { %v1643_v21 = vadd.f32 %v2345_v7, %v1642_v16  ;;  %v1655_v22 = vadd.f32 %v1654_v17, %v1652_v15  ;;  %v1719_v40 = vld [vmem:[%s3057_s24 + $0x10] sm:$0xff] (%p2687_p11) }
 0x1b5   : > { %v1715_v37 = vld [vmem:[%s3057_s24] sm:$0xff] (%p2687_p11)  ;;  %1720 = vst [vmem:[%s1681_s28 + $0x100] sm:$0xff] (%p2687_p11), %v1719_v40 }
 0x1b6   : > { %v1644_v24 = vrot.slane %v1643_v21, 4  ;;  %v1656_v25 = vadd.f32 %v1655_v22, %v1653_v18  ;;  %v1721_v41 = vld [vmem:[%s3057_s24 + $0x18] sm:$0xff] (%p2687_p11)  ;;  %1716 = vst [vmem:[%s1681_s28] sm:$0xff] (%p2687_p11), %v1715_v37 }
 0x1b7   : > { %v1717_v38 = vld [vmem:[%s3057_s24 + $0x8] sm:$0xff] (%p2687_p11)  ;;  %1722 = vst [vmem:[%s1681_s28 + $0x108] sm:$0xff] (%p2687_p11), %v1721_v41 }
 0x1b8   : > { %v1645_v26 = vadd.f32 %v1644_v24, %v1643_v21  ;;  %v1657_v27 = vrot.slane %v1656_v25, 4  ;;  %1718 = vst [vmem:[%s1681_s28 + $0x8] sm:$0xff] (%p2687_p11), %v1717_v38 }
 0x1ba   : > { %v1646_v28 = vrot.slane %v1645_v26, 2  ;;  %v1658_v32 = vadd.f32 %v1657_v27, %v1656_v25 }
 0x1bc   : > { %v1647_v19 = vadd.f32 %v1646_v28, %v1645_v26  ;;  %v1659_v20 = vrot.slane %v1658_v32, 2 }
 0x1be   : > { %v1648_v36 = vrot.slane %v1647_v19, 1  ;;  %v1660_v39 = vadd.f32 %v1659_v20, %v1658_v32 }
 0x1c0   : > { %v1661_v9 = vrot.slane %v1660_v39, 1  ;;  %v1649_v23 = vadd.f32 %v1648_v36, %v1647_v19  ;;  %1678 = sbr.rel (!%p2687_p11) target bundleno = 455 (0x1c7), region = 154 }
 0x1c2   : > { %v1662_v33 = vadd.f32 %v1661_v9, %v1660_v39 }
 0x1c4   : > { %v1664_v34 = vsel %vm1663_vm2, %v1649_v23, %v1662_v33 }
 0x1c5   : > { %v1666_v35 = vsel %vm1665_vm3, %v1664_v34, 0.0 }
 0x1c6   : > { %1667 = vst [vmem:[%s442_s20] sm:$0xff] %v1666_v35 }
 0x1c7 PF: > { %p13_p3 = scmp.ge.s32.totalorder %s2635_s26, 18   ;;  %s3110_s18 = smov %s2544_s19 }
 0x1c8   : > { %s3111_s19 = smov %s2676_s15  ;;  %s3112_s20 = smov %s2552_s21 }
 0x1c9   : > { %s3113_s21 = smov %s2662_s10  ;;  %s3114_s22 = smov %s2560_s23 }
 0x1ca   : > { %s3115_s23 = smov %s2645_s30  ;;  %s3116_s24 = smov %s2635_s26 }
 0x1cb   :  { %15 = sbr.rel (!%p13_p3) target bundleno = 4 (0x4), region = 259 }

// kernel: bottleneck_forward.9
= control target key start
LH: loop header
LB: loop body
LE: loop exit
PB: predicated region body
PF: predicated region fallthrough
CT: control target
= control target key end

     0   :  { %9 = vsyncpa [#allocation3], 0  ;;  %s986_s0 = inlined_call_operand.vmem [shape: f32[512,128], index: 0, kind: input, shape index: {}]   ;;  %s987_s1 = inlined_call_operand.vmem [shape: f32[512,128], index: 1, kind: input, shape index: {}]   ;;  %s988_s2 = inlined_call_operand.vmem [shape: f32[1,128], index: 2, kind: input, shape index: {}]   ;;  %s989_s3 = inlined_call_operand.vmem [shape: f32[1,128], index: 3, kind: input, shape index: {}]   ;;  %s990_s4 = inlined_call_operand.hbm [shape: f32[512,128], index: 4, kind: output, shape index: {}]  }
   0x1   :  { %11 = vsyncpa [#allocation3 + $0x1], 0  ;;  %s697_s15 = smov 0   ;;  %s699_s16 = smov 0  }
   0x2   :  { %s701_s17 = smov 0   ;;  %s703_s18 = smov 0  }
   0x3 LB: > { %s718_s19 = sadd.s32 4294967295, %s667_s18   ;;  %s547_s20 = sadd.s32 4294967294, %s667_s18   ;;  %s667_s18 = sphi %s703_s18, %s996_s18   ;;  %s663_s17 = sphi %s701_s17, %s995_s17   ;;  %s659_s16 = sphi %s699_s16, %s994_s16   ;;  %s655_s15 = sphi %s697_s15, %s993_s15  }
   0x4   : > { %s722_s21 = sadd.s32 1, %s667_s18   ;;  %s118_s22 = sadd.s32 1, %s663_s17 }
   0x5   : > { %s115_s23 = ssub.s32 %s667_s18, %s722_s21  ;;  %p128_p0 = scmp.ne.s32.totalorder %s663_s17, %s659_s16 }
   0x6   : > { %p116_p1 = scmp.eq.s32.totalorder %s115_s23, 0  ;;  %p129_p2 = scmp.eq.s32.totalorder %s718_s19, 1 }
   0x7   : > { %p134_p3 = scmp.ne.s32.totalorder %s659_s16, %s655_s15  ;;  %p135_p4 = scmp.eq.s32.totalorder %s547_s20, 1 }
   0x8   : > { %s733_s24 = scalar_select %p116_p1, %s663_s17, %s118_s22  }
   0x9   : > { %p735_p5 = por %p129_p2, %p128_p0  ;;  %p739_p6 = por %p135_p4, %p134_p3 }
   0xa   : > { %p550_p7 = scmp.ge.s32.totalorder %s667_s18, 1  ;;  %p177_p8 = scmp.lt.s32.totalorder %s667_s18, 3 }
   0xc   : > { %p178_p9 = pnand %p550_p7, %p177_p8 }
   0xd   : > { %s552_s27 = sshll.u32 (!%p178_p9), %s718_s19, 5  ;;  %v749_v0 = vld [vmem:[%s988_s2] ss:$0 sm:$0xff] (!%p178_p9)  ;;  %s205_s11 = sand.u32 (!%p178_p9), 1, %s659_s16  }
   0xe   : > { %181 = sbr.rel (%p178_p9) target bundleno = 77 (0x4d), region = 36  ;;  %p209_p10 = scmp.lt.s32.totalorder (!%p178_p9), %s552_s27, 63  ;;  %v766_v2 = vld [vmem:[%s989_s3] ss:$0 sm:$0xff] (!%p178_p9) }
   0xf   : > { %s779_s14 = sshll.u32 (!%p178_p9), %s205_s11, 8  ;;  %s563_s22 = sshll.u32 (!%p178_p9), %s718_s19, 12 }
  0x10   : > { %s809_s20 = scalar_lea.vmem (!%p178_p9), [#allocation2], %s779_s14  ;;  %s936_s29 = scalar_lea.hbm (!%p178_p9), %s990_s4, %s563_s22 }
  0x11   : > { %s473_s23 = sshll.u32 (!%p178_p9), %s809_s20, 4  ;;  %s945_s19 = scalar_lea.sflag (!%p178_p9), [#allocation3], %s205_s11  ;;  %s938_s23 = int_to_ptr.vmem [resolvable:$true] %s473_s23 }
  0x12   : > { %s605_s30 = scalar_lea.vmem (!%p178_p9), %s938_s23, 4096  ;;  %s669_s5 = smov (!%p178_p9), [#allocation2]  }
  0x13   : > { %p606_p11 = scmp.ne.s32.totalorder (!%p178_p9), %s938_s23, %s605_s30  ;;  %s609_s6 = sshll.u32 (!%p178_p9), %s669_s5, 4  ;;  %s610_s6 = int_to_ptr.vmem [resolvable:$false] %s609_s6 }
  0x14   : > { %p612_p0 = scmp.lt.s32.totalorder (!%p178_p9), %s938_s23, %s610_s6 }
  0x15   : > { %s998_s27 = smov (!%p209_p10, %s552_s27), 63  ;;  %p607_p12 = pnand %p606_p11, %p735_p5 }
  0x16   : > { %s553_s28 = sshll.u32 %s998_s27, 3 }
  0x17   : > { %s754_s7 = scalar_lea.vmem %s986_s0, %s553_s28  ;;  %s759_s10 = scalar_lea.vmem %s987_s1, %s553_s28 }
  0x18   : > { %v221_v1 = vld [vmem:[%s754_s7] sm:$0xff]  ;;  %v222_v3 = vld [vmem:[%s754_s7 + $0x8] sm:$0xff]  ;;  %v223_v7 = vld [vmem:[%s754_s7 + $0x10] sm:$0xff]  ;;  %p608_p13 = pneg %p607_p12 }
  0x19   : > { %v260_v4 = vmul.f32 %v749_v0, %v221_v1  ;;  %v331_v5 = vld [vmem:[%s759_s10] sm:$0xff]  ;;  %v261_v6 = vmul.f32 %v749_v0, %v222_v3  ;;  %v332_v8 = vld [vmem:[%s759_s10 + $0x8] sm:$0xff]  ;;  %v262_v9 = vmul.f32 %v749_v0, %v223_v7  ;;  %v224_v10 = vld [vmem:[%s754_s7 + $0x18] sm:$0xff] }
  0x1a   : > { %v225_v11 = vld [vmem:[%s754_s7 + $0x20] sm:$0xff]  ;;  %v333_v14 = vld [vmem:[%s759_s10 + $0x10] sm:$0xff]  ;;  %v263_v15 = vmul.f32 %v749_v0, %v224_v10  ;;  %v334_v16 = vld [vmem:[%s759_s10 + $0x18] sm:$0xff] }
  0x1b   : > { %v299_v12 = vadd.f32 %v766_v2, %v260_v4  ;;  %v300_v13 = vadd.f32 %v766_v2, %v261_v6  ;;  %v264_v17 = vmul.f32 %v749_v0, %v225_v11  ;;  %v226_v18 = vld [vmem:[%s754_s7 + $0x28] sm:$0xff]  ;;  %v301_v19 = vadd.f32 %v766_v2, %v262_v9  ;;  %v335_v20 = vld [vmem:[%s759_s10 + $0x20] sm:$0xff]  ;;  %v227_v22 = vld [vmem:[%s754_s7 + $0x30] sm:$0xff] }
  0x1c   : > { %v265_v21 = vmul.f32 %v749_v0, %v226_v18  ;;  %v228_v23 = vld [vmem:[%s754_s7 + $0x38] sm:$0xff]  ;;  %v302_v26 = vadd.f32 %v766_v2, %v263_v15  ;;  %v336_v28 = vld [vmem:[%s759_s10 + $0x28] sm:$0xff]  ;;  %v266_v31 = vmul.f32 %v749_v0, %v227_v22  ;;  %v229_v33 = vld [vmem:[%s754_s7 + $0x40] sm:$0xff] }
  0x1d   : > { %v363_v24 = vadd.f32 %v331_v5, %v299_v12  ;;  %v364_v25 = vadd.f32 %v332_v8, %v300_v13  ;;  %v303_v27 = vadd.f32 %v766_v2, %v264_v17  ;;  %v365_v29 = vadd.f32 %v333_v14, %v301_v19  ;;  %v230_v34 = vld [vmem:[%s754_s7 + $0x48] sm:$0xff]  ;;  %v337_v39 = vld [vmem:[%s759_s10 + $0x30] sm:$0xff]  ;;  %v338_v40 = vld [vmem:[%s759_s10 + $0x38] sm:$0xff] }
  0x1e   : > { %v304_v30 = vadd.f32 %v766_v2, %v265_v21  ;;  %v267_v32 = vmul.f32 %v749_v0, %v228_v23  ;;  %v366_v37 = vadd.f32 %v334_v16, %v302_v26  ;;  %v231_v41 = vld [vmem:[%s754_s7 + $0x50] sm:$0xff]  ;;  %v305_v44 = vadd.f32 %v766_v2, %v266_v31  ;;  %v232_v46 = vld [vmem:[%s754_s7 + $0x58] sm:$0xff]  ;;  %v233_v47 = vld [vmem:[%s754_s7 + $0x60] sm:$0xff] }
  0x1f   : > { %v395_v35 = vmax.f32 %v363_v24, 0.0  ;;  %v396_v36 = vmax.f32 %v364_v25, 0.0  ;;  %v367_v38 = vadd.f32 %v335_v20, %v303_v27  ;;  %v397_v42 = vmax.f32 %v365_v29, 0.0  ;;  %v234_v52 = vld [vmem:[%s754_s7 + $0x68] sm:$0xff]  ;;  %v339_v56 = vld [vmem:[%s759_s10 + $0x40] sm:$0xff]  ;;  %v341_v61 = vld [vmem:[%s759_s10 + $0x50] sm:$0xff] }
  0x20   : > { %v368_v43 = vadd.f32 %v336_v28, %v304_v30  ;;  %v306_v45 = vadd.f32 %v766_v2, %v267_v32  ;;  %v398_v48 = vmax.f32 %v366_v37, 0.0  ;;  %v268_v50 = vmul.f32 %v749_v0, %v229_v33  ;;  %v340_v57 = vld [vmem:[%s759_s10 + $0x48] sm:$0xff]  ;;  %v235_v1 = vld [vmem:[%s754_s7 + $0x70] sm:$0xff]  ;;  %v236_v3 = vld [vmem:[%s754_s7 + $0x78] sm:$0xff] }
  0x21   : > { %427 = vst [vmem:[%s809_s20] sm:$0xff] %v395_v35  ;;  %428 = vst [vmem:[%s809_s20 + $0x8] sm:$0xff] %v396_v36  ;;  %v399_v49 = vmax.f32 %v367_v38, 0.0  ;;  %v269_v51 = vmul.f32 %v749_v0, %v230_v34  ;;  %v369_v54 = vadd.f32 %v337_v39, %v305_v44  ;;  %v270_v58 = vmul.f32 %v749_v0, %v231_v41  ;;  %v342_v7 = vld [vmem:[%s759_s10 + $0x58] sm:$0xff]  ;;  %v343_v8 = vld [vmem:[%s759_s10 + $0x60] sm:$0xff] }
  0x22   : > { %429 = vst [vmem:[%s809_s20 + $0x10] sm:$0xff] %v397_v42  ;;  %v400_v53 = vmax.f32 %v368_v43, 0.0  ;;  %v370_v55 = vadd.f32 %v338_v40, %v306_v45  ;;  %430 = vst [vmem:[%s809_s20 + $0x18] sm:$0xff] %v398_v48  ;;  %v307_v59 = vadd.f32 %v766_v2, %v268_v50  ;;  %v271_v62 = vmul.f32 %v749_v0, %v232_v46  ;;  %v344_v14 = vld [vmem:[%s759_s10 + $0x68] sm:$0xff]  ;;  %v237_v19 = vld [vmem:[%s754_s7 + $0x80] sm:$0xff] }
  0x23   : > { %431 = vst [vmem:[%s809_s20 + $0x20] sm:$0xff] %v399_v49  ;;  %v308_v60 = vadd.f32 %v766_v2, %v269_v51  ;;  %v272_v63 = vmul.f32 %v749_v0, %v233_v47  ;;  %v401_v4 = vmax.f32 %v369_v54, 0.0  ;;  %v309_v6 = vadd.f32 %v766_v2, %v270_v58  ;;  %v238_v20 = vld [vmem:[%s754_s7 + $0x88] sm:$0xff]  ;;  %v345_v25 = vld [vmem:[%s759_s10 + $0x70] sm:$0xff]  ;;  %v346_v26 = vld [vmem:[%s759_s10 + $0x78] sm:$0xff] }
  0x24   : > { %432 = vst [vmem:[%s809_s20 + $0x28] sm:$0xff] %v400_v53  ;;  %v402_v5 = vmax.f32 %v370_v55, 0.0  ;;  %v273_v9 = vmul.f32 %v749_v0, %v234_v52  ;;  %v371_v10 = vadd.f32 %v339_v56, %v307_v59  ;;  %v310_v12 = vadd.f32 %v766_v2, %v271_v62  ;;  %v239_v27 = vld [vmem:[%s754_s7 + $0x90] sm:$0xff]  ;;  %v240_v32 = vld [vmem:[%s754_s7 + $0x98] sm:$0xff]  ;;  %v241_v33 = vld [vmem:[%s754_s7 + $0xa0] sm:$0xff] }
  0x25   : > { %v372_v11 = vadd.f32 %v340_v57, %v308_v60  ;;  %v311_v13 = vadd.f32 %v766_v2, %v272_v63  ;;  %433 = vst [vmem:[%s809_s20 + $0x30] sm:$0xff] %v401_v4  ;;  %v373_v15 = vadd.f32 %v341_v61, %v309_v6  ;;  %v274_v17 = vmul.f32 %v749_v0, %v235_v1  ;;  %v242_v38 = vld [vmem:[%s754_s7 + $0xa8] sm:$0xff]  ;;  %v347_v42 = vld [vmem:[%s759_s10 + $0x80] sm:$0xff]  ;;  %v349_v47 = vld [vmem:[%s759_s10 + $0x90] sm:$0xff] }
  0x26   : > { %434 = vst [vmem:[%s809_s20 + $0x38] sm:$0xff] %v402_v5  ;;  %v312_v16 = vadd.f32 %v766_v2, %v273_v9  ;;  %v275_v18 = vmul.f32 %v749_v0, %v236_v3  ;;  %v403_v21 = vmax.f32 %v371_v10, 0.0  ;;  %v374_v23 = vadd.f32 %v342_v7, %v310_v12  ;;  %v348_v43 = vld [vmem:[%s759_s10 + $0x88] sm:$0xff]  ;;  %v243_v50 = vld [vmem:[%s754_s7 + $0xb0] sm:$0xff]  ;;  %v244_v51 = vld [vmem:[%s754_s7 + $0xb8] sm:$0xff] }
  0x27   : > { %v404_v22 = vmax.f32 %v372_v11, 0.0  ;;  %v375_v24 = vadd.f32 %v343_v8, %v311_v13  ;;  %v405_v28 = vmax.f32 %v373_v15, 0.0  ;;  %v313_v30 = vadd.f32 %v766_v2, %v274_v17  ;;  %v350_v55 = vld [vmem:[%s759_s10 + $0x98] sm:$0xff]  ;;  %v351_v56 = vld [vmem:[%s759_s10 + $0xa0] sm:$0xff]  ;;  %v352_v62 = vld [vmem:[%s759_s10 + $0xa8] sm:$0xff] }
  0x28   : > { %v376_v29 = vadd.f32 %v344_v14, %v312_v16  ;;  %v314_v31 = vadd.f32 %v766_v2, %v275_v18  ;;  %435 = vst [vmem:[%s809_s20 + $0x40] sm:$0xff] %v403_v21  ;;  %v406_v34 = vmax.f32 %v374_v23, 0.0  ;;  %v276_v36 = vmul.f32 %v749_v0, %v237_v19  ;;  %v245_v5 = vld [vmem:[%s754_s7 + $0xc0] sm:$0xff]  ;;  %v246_v6 = vld [vmem:[%s754_s7 + $0xc8] sm:$0xff]  ;;  %v353_v11 = vld [vmem:[%s759_s10 + $0xb0] sm:$0xff] }
  0x29   : > { %436 = vst [vmem:[%s809_s20 + $0x48] sm:$0xff] %v404_v22  ;;  %v407_v35 = vmax.f32 %v375_v24, 0.0  ;;  %v277_v37 = vmul.f32 %v749_v0, %v238_v20  ;;  %437 = vst [vmem:[%s809_s20 + $0x50] sm:$0xff] %v405_v28  ;;  %v377_v40 = vadd.f32 %v345_v25, %v313_v30  ;;  %v278_v44 = vmul.f32 %v749_v0, %v239_v27  ;;  %v354_v12 = vld [vmem:[%s759_s10 + $0xb8] sm:$0xff]  ;;  %v247_v13 = vld [vmem:[%s754_s7 + $0xd0] sm:$0xff] }
  0x2a   : > { %v408_v39 = vmax.f32 %v376_v29, 0.0  ;;  %v378_v41 = vadd.f32 %v346_v26, %v314_v31  ;;  %438 = vst [vmem:[%s809_s20 + $0x58] sm:$0xff] %v406_v34  ;;  %v315_v45 = vadd.f32 %v766_v2, %v276_v36  ;;  %v279_v48 = vmul.f32 %v749_v0, %v240_v32  ;;  %v248_v18 = vld [vmem:[%s754_s7 + $0xd8] sm:$0xff]  ;;  %v249_v19 = vld [vmem:[%s754_s7 + $0xe0] sm:$0xff]  ;;  %v250_v24 = vld [vmem:[%s754_s7 + $0xe8] sm:$0xff] }
  0x2b   : > { %439 = vst [vmem:[%s809_s20 + $0x60] sm:$0xff] %v407_v35  ;;  %v316_v46 = vadd.f32 %v766_v2, %v277_v37  ;;  %v280_v49 = vmul.f32 %v749_v0, %v241_v33  ;;  %v409_v52 = vmax.f32 %v377_v40, 0.0  ;;  %v317_v54 = vadd.f32 %v766_v2, %v278_v44  ;;  %v355_v28 = vld [vmem:[%s759_s10 + $0xc0] sm:$0xff]  ;;  %v356_v29 = vld [vmem:[%s759_s10 + $0xc8] sm:$0xff]  ;;  %v357_v33 = vld [vmem:[%s759_s10 + $0xd0] sm:$0xff] }
  0x2c   : > { %440 = vst [vmem:[%s809_s20 + $0x68] sm:$0xff] %v408_v39  ;;  %v410_v53 = vmax.f32 %v378_v41, 0.0  ;;  %v281_v57 = vmul.f32 %v749_v0, %v242_v38  ;;  %v379_v58 = vadd.f32 %v347_v42, %v315_v45  ;;  %v318_v60 = vadd.f32 %v766_v2, %v279_v48  ;;  %v251_v36 = vld [vmem:[%s754_s7 + $0xf0] sm:$0xff]  ;;  %v252_v37 = vld [vmem:[%s754_s7 + $0xf8] sm:$0xff]  ;;  %v359_v42 = vld [vmem:[%s759_s10 + $0xe0] sm:$0xff]  ;;  %s611_s7 = scalar_lea.vmem %s610_s6, 8192 }
  0x2d   : > { %v380_v59 = vadd.f32 %v348_v43, %v316_v46  ;;  %v319_v61 = vadd.f32 %v766_v2, %v280_v49  ;;  %441 = vst [vmem:[%s809_s20 + $0x70] sm:$0xff] %v409_v52  ;;  %v381_v63 = vadd.f32 %v349_v47, %v317_v54  ;;  %v282_v3 = vmul.f32 %v749_v0, %v243_v50  ;;  %v358_v41 = vld [vmem:[%s759_s10 + $0xd8] sm:$0xff]  ;;  %v360_v48 = vld [vmem:[%s759_s10 + $0xe8] sm:$0xff]  ;;  %p613_p1 = scmp.lt.s32.totalorder %s611_s7, %s605_s30 }
  0x2e   : > { %442 = vst [vmem:[%s809_s20 + $0x78] sm:$0xff] %v410_v53  ;;  %v320_v1 = vadd.f32 %v766_v2, %v281_v57  ;;  %v283_v4 = vmul.f32 %v749_v0, %v244_v51  ;;  %v411_v7 = vmax.f32 %v379_v58, 0.0  ;;  %v382_v9 = vadd.f32 %v350_v55, %v318_v60  ;;  %v361_v57 = vld [vmem:[%s759_s10 + $0xf0] sm:$0xff]  ;;  %v362_v58 = vld [vmem:[%s759_s10 + $0xf8] sm:$0xff] }
  0x2f   : > { %v412_v8 = vmax.f32 %v380_v59, 0.0  ;;  %v383_v10 = vadd.f32 %v351_v56, %v319_v61  ;;  %v413_v14 = vmax.f32 %v381_v63, 0.0  ;;  %v321_v16 = vadd.f32 %v766_v2, %v282_v3  ;;  %p614_p2 = por %p613_p1, %p612_p0 }
  0x30   : > { %v384_v15 = vadd.f32 %v352_v62, %v320_v1  ;;  %v322_v17 = vadd.f32 %v766_v2, %v283_v4  ;;  %443 = vst [vmem:[%s809_s20 + $0x80] sm:$0xff] %v411_v7  ;;  %v414_v20 = vmax.f32 %v382_v9, 0.0  ;;  %v284_v22 = vmul.f32 %v749_v0, %v245_v5 }
  0x31   : > { %444 = vst [vmem:[%s809_s20 + $0x88] sm:$0xff] %v412_v8  ;;  %v415_v21 = vmax.f32 %v383_v10, 0.0  ;;  %v285_v23 = vmul.f32 %v749_v0, %v246_v6  ;;  %445 = vst [vmem:[%s809_s20 + $0x90] sm:$0xff] %v413_v14  ;;  %v385_v26 = vadd.f32 %v353_v11, %v321_v16  ;;  %v286_v30 = vmul.f32 %v749_v0, %v247_v13  ;;  %p615_p3 = pnand %p614_p2, %p608_p13 }
  0x32   : > { %v416_v25 = vmax.f32 %v384_v15, 0.0  ;;  %v386_v27 = vadd.f32 %v354_v12, %v322_v17  ;;  %446 = vst [vmem:[%s809_s20 + $0x98] sm:$0xff] %v414_v20  ;;  %v323_v31 = vadd.f32 %v766_v2, %v284_v22  ;;  %v287_v34 = vmul.f32 %v749_v0, %v248_v18 }
  0x33   : > { %447 = vst [vmem:[%s809_s20 + $0xa0] sm:$0xff] %v415_v21  ;;  %v324_v32 = vadd.f32 %v766_v2, %v285_v23  ;;  %v288_v35 = vmul.f32 %v749_v0, %v249_v19  ;;  %v417_v38 = vmax.f32 %v385_v26, 0.0  ;;  %v325_v40 = vadd.f32 %v766_v2, %v286_v30 }
  0x34   : > { %448 = vst [vmem:[%s809_s20 + $0xa8] sm:$0xff] %v416_v25  ;;  %v418_v39 = vmax.f32 %v386_v27, 0.0  ;;  %v289_v43 = vmul.f32 %v749_v0, %v250_v24  ;;  %v387_v44 = vadd.f32 %v355_v28, %v323_v31  ;;  %v326_v46 = vadd.f32 %v766_v2, %v287_v34 }
  0x35   : > { %v388_v45 = vadd.f32 %v356_v29, %v324_v32  ;;  %v327_v47 = vadd.f32 %v766_v2, %v288_v35  ;;  %449 = vst [vmem:[%s809_s20 + $0xb0] sm:$0xff] %v417_v38  ;;  %v389_v49 = vadd.f32 %v357_v33, %v325_v40  ;;  %v290_v51 = vmul.f32 %v749_v0, %v251_v36 }
  0x36   : > { %450 = vst [vmem:[%s809_s20 + $0xb8] sm:$0xff] %v418_v39  ;;  %v328_v50 = vadd.f32 %v766_v2, %v289_v43  ;;  %v291_v52 = vmul.f32 %v749_v0, %v252_v37  ;;  %v419_v53 = vmax.f32 %v387_v44, 0.0  ;;  %v390_v55 = vadd.f32 %v358_v41, %v326_v46 }
  0x37   : > { %v420_v54 = vmax.f32 %v388_v45, 0.0  ;;  %v391_v56 = vadd.f32 %v359_v42, %v327_v47  ;;  %v421_v59 = vmax.f32 %v389_v49, 0.0  ;;  %v329_v61 = vadd.f32 %v766_v2, %v290_v51 }
  0x38   : > { %v392_v60 = vadd.f32 %v360_v48, %v328_v50  ;;  %v330_v62 = vadd.f32 %v766_v2, %v291_v52  ;;  %451 = vst [vmem:[%s809_s20 + $0xc0] sm:$0xff] %v419_v53  ;;  %v422_v0 = vmax.f32 %v390_v55, 0.0 }
  0x39   : > { %452 = vst [vmem:[%s809_s20 + $0xc8] sm:$0xff] %v420_v54  ;;  %v423_v63 = vmax.f32 %v391_v56, 0.0  ;;  %453 = vst [vmem:[%s809_s20 + $0xd0] sm:$0xff] %v421_v59  ;;  %v393_v3 = vadd.f32 %v361_v57, %v329_v61 }
  0x3a   : > { %v424_v1 = vmax.f32 %v392_v60, 0.0  ;;  %v394_v4 = vadd.f32 %v362_v58, %v330_v62  ;;  %454 = vst [vmem:[%s809_s20 + $0xd8] sm:$0xff] %v422_v0 }
  0x3b   : > { %455 = vst [vmem:[%s809_s20 + $0xe0] sm:$0xff] %v423_v63  ;;  %v425_v2 = vmax.f32 %v393_v3, 0.0 }
  0x3c   : > { %456 = vst [vmem:[%s809_s20 + $0xe8] sm:$0xff] %v424_v1  ;;  %v426_v5 = vmax.f32 %v394_v4, 0.0 }
  0x3d   : > { %457 = vst [vmem:[%s809_s20 + $0xf0] sm:$0xff] %v425_v2 }
  0x3e   : > { %458 = vst [vmem:[%s809_s20 + $0xf8] sm:$0xff] %v426_v5 }
  0x3f   : > { %618 = shalt.err (!%p615_p3)
}
  0x40   : > { %s619_s8 = scalar_lea.hbm %s936_s29, 4096  ;;  %s623_s11 = scalar_lea.hbm %s990_s4, 8192 }
  0x41   : > { %p620_p4 = scmp.ne.s32.totalorder %s936_s29, %s619_s8  ;;  %p624_p9 = scmp.lt.u32.totalorder %s936_s29, %s990_s4 }
  0x42   : > { %p625_p10 = scmp.lt.u32.totalorder %s623_s11, %s619_s8  ;;  %p627_p12 = scmp.lt.u32.totalorder %s619_s8, %s936_s29 }
  0x43   : > { %p621_p7 = pnand %p620_p4, %p735_p5 }
  0x44   : > { %p626_p11 = por %p625_p10, %p624_p9 }
  0x45   : > { %p622_p8 = pneg %p621_p7 }
  0x46   : > { %p628_p13 = por %p627_p12, %p626_p11 }
  0x48   : > { %p629_p0 = pnand %p628_p13, %p622_p8 }
  0x4a   : > { %632 = shalt.err (!%p629_p0)
}
  0x4b   : > { %s670_s14 = smov 128   ;;  %s671_s20 = smov 8  }
  0x4c   : > { %564 = dma.vmem_to_hbm [thread:$0]  (%p735_p5), %s938_s23, 4096, %s936_s29, %s945_s19, %s670_s14, %s670_s14, %s671_s20  }
  0x4d PF: > { %p570_p1 = scmp.ge.s32.totalorder %s667_s18, 2  ;;  %s488_s22 = sand.u32 1, %s655_s15  }
  0x4e   : > { %s489_s27 = scalar_lea.sflag [#allocation3], %s488_s22 }
  0x4f   : > { %p567_p2 = pnand %p570_p1, %p739_p6 }
  0x51   : > { %650 = dma.done.wait (!%p567_p2), %s489_s27, 4096  }
  0x52   : > { %652 = vsyncadd (!%p567_p2), %s489_s27, 4294963200  ;;  %p14_p3 = scmp.ge.s32.totalorder %s722_s21, 4   ;;  %s993_s15 = smov %s659_s16 }
  0x53   : > { %s994_s16 = smov %s663_s17  ;;  %s995_s17 = smov %s733_s24 }
  0x54   : > { %s996_s18 = smov %s722_s21  ;;  %16 = sbr.rel (!%p14_p3) target bundleno = 3 (0x3), region = 74 }
  0x5b   :  { %494 = vsyncpa [#allocation3], 1 }
  0x5c   :  { %496 = vsyncpa [#allocation3 + $0x1], 1 }

</bundles_post_ra>
